<compile_context>
chip_gen: v5e
topology: v5e:2x2
jax: 0.10.0
libtpu: 0.0.40
codegen_flags: <defaults>
</compile_context>

<pallas_src>
import functools

import jax
import jax.numpy as jnp
import numpy as np
from jax.experimental import pallas as pl
from jax.experimental.pallas import tpu as pltpu


def _round_up(x, m):
    return (x + m - 1) // m * m


def _pick_tile_h(Ho, Wo):
    """Largest divisor of Ho (<= 8) keeping TH*Wo <= 128 rows per matmul."""
    best = 1
    for d in range(1, min(Ho, 8) + 1):
        if Ho % d == 0 and d * Wo <= 128:
            best = d
    return best


def _basic_block_kernel(x_ref, w1_ref, s1_ref, b1_ref,
                        w2_ref, s2_ref, b2_ref,
                        ws_ref, ss_ref, bs_ref,
                        out_ref, mid_ref, *, stride, Ho, Wo, TH):
    """One (batch, row-tile) grid step.

    x_ref   : (Hp, Wp, Cp) bf16   zero-padded input (H pad = 1+stride, W pad = 1)
    w1_ref  : (9, Cp, Pp)  bf16   conv1 3x3 weights, tap-major
    w2_ref  : (9, Pp, Pp)  bf16   conv2 3x3 weights, tap-major
    ws_ref  : (Cp, Pp)     bf16   shortcut 1x1 weight (identity if no shortcut)
    s*/b*   : (1, Pp)      f32    folded BN scale / shift
    out_ref : (TH, Wo, Pp) f32    output row tile
    mid_ref : (TH+2, Wo+2, Pp) bf16 VMEM scratch (conv1 activation + halo)
    """
    Cp = x_ref.shape[-1]
    Pp = out_ref.shape[-1]
    R = TH + 2                               # conv1 rows incl. 1-row halo each side
    r0 = pl.program_id(1) * TH               # first output row of this tile

    def h_slice(start, n):
        if stride == 1:
            return pl.ds(start, n)
        return pl.ds(start, n, stride)

    # ---- conv1: 3x3, stride, pad=1 over the extended row range (streamed taps) ----
    acc1 = jnp.zeros((R * Wo, Pp), jnp.float32)
    for kh in range(3):
        for kw in range(3):
            patch = x_ref[h_slice(r0 * stride + kh, R),
                          h_slice(kw, Wo), :]                      # (R, Wo, Cp) bf16
            acc1 = acc1 + jnp.dot(patch.reshape(R * Wo, Cp),
                                  w1_ref[kh * 3 + kw],
                                  preferred_element_type=jnp.float32)

    # bn1 + relu in f32 (v5e-safe), then zero halo rows that fall outside the image
    h = jnp.maximum(acc1 * s1_ref[...] + b1_ref[...], 0.0).reshape(R, Wo, Pp)
    gj = (r0 - 1) + jax.lax.broadcasted_iota(jnp.int32, (R, Wo, Pp), 0)
    h = jnp.where((gj >= 0) & (gj < Ho), h, 0.0)

    # Stage into the W-padded scratch; only the 2 halo columns are zeroed.
    mid_ref[:, 0:1, :] = jnp.zeros((R, 1, Pp), mid_ref.dtype)
    mid_ref[:, Wo + 1:Wo + 2, :] = jnp.zeros((R, 1, Pp), mid_ref.dtype)
    mid_ref[:, 1:Wo + 1, :] = h.astype(mid_ref.dtype)

    # ---- conv2: 3x3, stride 1, pad=1 (streamed taps from scratch) ----
    acc2 = jnp.zeros((TH * Wo, Pp), jnp.float32)
    for kh in range(3):
        for kw in range(3):
            patch = mid_ref[kh:kh + TH, kw:kw + Wo, :]             # (TH, Wo, Pp) bf16
            acc2 = acc2 + jnp.dot(patch.reshape(TH * Wo, Pp),
                                  w2_ref[kh * 3 + kw],
                                  preferred_element_type=jnp.float32)
    o = acc2 * s2_ref[...] + b2_ref[...]                           # bn2

    # ---- shortcut: 1x1 conv (stride) + bn (identity expressed via I / 1 / 0) ----
    xs = x_ref[h_slice(r0 * stride + 1 + stride, TH),
               h_slice(1, Wo), :]                                  # (TH, Wo, Cp) bf16
    sc = jnp.dot(xs.reshape(TH * Wo, Cp), ws_ref[...],
                 preferred_element_type=jnp.float32)
    sc = sc * ss_ref[...] + bs_ref[...]

    out = jnp.maximum(o + sc, 0.0)                                 # residual + relu
    out_ref[...] = out.reshape(TH, Wo, Pp).astype(out_ref.dtype)


def basic_block_forward(x_nhwc, params, *, stride=1):
    B, H, W, Cin = x_nhwc.shape
    P = params["w1"].shape[-1]
    Ho = (H + 2 - 3) // stride + 1
    Wo = (W + 2 - 3) // stride + 1

    Cp = _round_up(Cin, 128)     # lane-dense input channels
    Pp = _round_up(P, 128)       # lane-dense output channels
    TH = _pick_tile_h(Ho, Wo)
    nRT = Ho // TH

    # bf16 activations, extra H padding so conv1 halo rows never index negative.
    xb = jnp.pad(x_nhwc.astype(jnp.bfloat16),
                 ((0, 0), (1 + stride, 1 + stride), (1, 1), (0, Cp - Cin)))
    Hp, Wp = H + 2 + 2 * stride, W + 2

    w1 = jnp.pad(params["w1"], ((0, 0), (0, 0), (0, Cp - Cin), (0, Pp - P))) \
            .reshape(9, Cp, Pp).astype(jnp.bfloat16)
    w2 = jnp.pad(params["w2"], ((0, 0), (0, 0), (0, Pp - P), (0, Pp - P))) \
            .reshape(9, Pp, Pp).astype(jnp.bfloat16)
    ws = jnp.pad(params["ws"], ((0, Cp - Cin), (0, Pp - P))).astype(jnp.bfloat16)

    def vec(v):
        return jnp.pad(v.astype(jnp.float32), (0, Pp - P)).reshape(1, Pp)

    s1, b1 = vec(params["s1"]), vec(params["b1"])
    s2, b2 = vec(params["s2"]), vec(params["b2"])
    ss, bs = vec(params["ss"]), vec(params["bs"])

    kernel = functools.partial(_basic_block_kernel,
                               stride=stride, Ho=Ho, Wo=Wo, TH=TH)

    def const(shape):
        return pl.BlockSpec(shape, lambda b, t, _n=len(shape): (0,) * _n)

    grid_spec = pltpu.PrefetchScalarGridSpec(
        num_scalar_prefetch=0,
        grid=(B, nRT),
        in_specs=[
            pl.BlockSpec((None, Hp, Wp, Cp), lambda b, t: (b, 0, 0, 0)),
            const((9, Cp, Pp)),
            const((1, Pp)), const((1, Pp)),
            const((9, Pp, Pp)),
            const((1, Pp)), const((1, Pp)),
            const((Cp, Pp)),
            const((1, Pp)), const((1, Pp)),
        ],
        out_specs=pl.BlockSpec((None, TH, Wo, Pp), lambda b, t: (b, t, 0, 0)),
        scratch_shapes=[pltpu.VMEM((TH + 2, Wo + 2, Pp), jnp.bfloat16)],
    )

    out = pl.pallas_call(
        kernel,
        out_shape=jax.ShapeDtypeStruct((B, Ho, Wo, Pp), jnp.float32),
        grid_spec=grid_spec,
        compiler_params=pltpu.CompilerParams(
            dimension_semantics=("parallel", "parallel")),
    )(xb, w1, s1, b1, w2, s2, b2, ws, ss, bs)

    return out[..., :P]


def make_params(key, in_planes, planes, *, stride=1, eps=1e-5):
    ks = jax.random.split(key, 6)

    def bn_fold(k):
        k1, k2, k3, k4 = jax.random.split(k, 4)
        gamma = jax.random.uniform(k1, (planes,), minval=0.5, maxval=1.5)
        beta = jax.random.normal(k2, (planes,)) * 0.1
        mean = jax.random.normal(k3, (planes,)) * 0.1
        var = jax.random.uniform(k4, (planes,), minval=0.5, maxval=1.5)
        scale = gamma / jnp.sqrt(var + eps)
        shift = beta - mean * scale
        return scale.astype(jnp.float32), shift.astype(jnp.float32)

    w1 = (jax.random.normal(ks[0], (3, 3, in_planes, planes)) * 0.1).astype(jnp.float32)
    w2 = (jax.random.normal(ks[1], (3, 3, planes, planes)) * 0.1).astype(jnp.float32)
    s1, b1 = bn_fold(ks[2])
    s2, b2 = bn_fold(ks[3])

    if stride != 1 or in_planes != planes:
        ws = (jax.random.normal(ks[4], (in_planes, planes)) * 0.1).astype(jnp.float32)
        ss, bs = bn_fold(ks[5])
    else:
        # identity shortcut expressed through the same 1x1-conv path
        ws = jnp.eye(in_planes, dtype=jnp.float32)
        ss = jnp.ones((planes,), jnp.float32)
        bs = jnp.zeros((planes,), jnp.float32)

    return dict(w1=w1, w2=w2, ws=ws, s1=s1, b1=b1, s2=s2, b2=b2, ss=ss, bs=bs)


def reference_forward(x_nhwc, params, *, stride=1):
    """Pure-JAX reference with the same bf16-in / f32-accumulate policy."""
    dn = ("NHWC", "HWIO", "NHWC")
    f32 = jnp.float32
    x = x_nhwc.astype(jnp.bfloat16).astype(f32)
    w1 = params["w1"].astype(jnp.bfloat16).astype(f32)
    w2 = params["w2"].astype(jnp.bfloat16).astype(f32)
    ws = params["ws"].astype(jnp.bfloat16).astype(f32)

    h = jax.lax.conv_general_dilated(x, w1, (stride, stride),
                                     padding=((1, 1), (1, 1)), dimension_numbers=dn)
    h = jnp.maximum(h * params["s1"] + params["b1"], 0.0)
    h = h.astype(jnp.bfloat16).astype(f32)        # kernel stages conv1 act in bf16
    o = jax.lax.conv_general_dilated(h, w2, (1, 1),
                                     padding=((1, 1), (1, 1)), dimension_numbers=dn)
    o = o * params["s2"] + params["b2"]

    cin, p = ws.shape
    sc = jax.lax.conv_general_dilated(x, ws.reshape(1, 1, cin, p), (stride, stride),
                                      padding="VALID", dimension_numbers=dn)
    sc = sc * params["ss"] + params["bs"]
    return jnp.maximum(o + sc, 0.0)


if __name__ == "__main__":
    # x is NCHW [2, 4, 16, 16] like the PyTorch module;
    # BasicBlock(in_planes=4, planes=8, stride=1) -> shortcut = 1x1 conv + BN.
    B, C_IN, H, W = 2, 4, 16, 16
    PLANES, STRIDE = 8, 1

    key = jax.random.PRNGKey(0)
    kx, kp = jax.random.split(key)
    x_nchw = jax.random.normal(kx, (B, C_IN, H, W), jnp.float32)
    x_nhwc = jnp.transpose(x_nchw, (0, 2, 3, 1))          # NCHW -> NHWC

    params = make_params(kp, C_IN, PLANES, stride=STRIDE)

    out = basic_block_forward(x_nhwc, params, stride=STRIDE)
    out = jax.block_until_ready(out)

    ref = jax.block_until_ready(reference_forward(x_nhwc, params, stride=STRIDE))
    np.testing.assert_allclose(np.asarray(out), np.asarray(ref), atol=2e-2, rtol=2e-2)

    print("KERNEL_OK")
</pallas_src>

<mosaic_0001>
module attributes {stable_mosaic.version = 11 : i64} {
  func.func @_basic_block_kernel(%arg0: i32, %arg1: i32, %arg2: memref<1x20x18x128xbf16, #tpu.memory_space<vmem>>, %arg3: memref<9x128x128xbf16, #tpu.memory_space<vmem>>, %arg4: memref<1x128xf32, #tpu.memory_space<vmem>>, %arg5: memref<1x128xf32, #tpu.memory_space<vmem>>, %arg6: memref<9x128x128xbf16, #tpu.memory_space<vmem>>, %arg7: memref<1x128xf32, #tpu.memory_space<vmem>>, %arg8: memref<1x128xf32, #tpu.memory_space<vmem>>, %arg9: memref<128x128xbf16, #tpu.memory_space<vmem>>, %arg10: memref<1x128xf32, #tpu.memory_space<vmem>>, %arg11: memref<1x128xf32, #tpu.memory_space<vmem>>, %arg12: memref<1x8x16x128xf32, #tpu.memory_space<vmem>>, %arg13: memref<10x18x128xbf16, #tpu.memory_space<vmem>>) attributes {dimension_semantics = [#tpu.dimension_semantics<parallel>, #tpu.dimension_semantics<parallel>], iteration_bounds = array<i64: 2, 2>, scalar_prefetch = 0 : i64, scratch_operands = 1 : i64, tpu.core_type = #tpu.core_type<tc>, window_params = [{transform_indices = @transform_0, window_bounds = array<i64: 1, 20, 18, 128>}, {pipeline_mode = #tpu.pipeline_mode<synchronous>, transform_indices = @transform_1, window_bounds = array<i64: 9, 128, 128>}, {pipeline_mode = #tpu.pipeline_mode<synchronous>, transform_indices = @transform_2, window_bounds = array<i64: 1, 128>}, {pipeline_mode = #tpu.pipeline_mode<synchronous>, transform_indices = @transform_3, window_bounds = array<i64: 1, 128>}, {pipeline_mode = #tpu.pipeline_mode<synchronous>, transform_indices = @transform_4, window_bounds = array<i64: 9, 128, 128>}, {pipeline_mode = #tpu.pipeline_mode<synchronous>, transform_indices = @transform_5, window_bounds = array<i64: 1, 128>}, {pipeline_mode = #tpu.pipeline_mode<synchronous>, transform_indices = @transform_6, window_bounds = array<i64: 1, 128>}, {pipeline_mode = #tpu.pipeline_mode<synchronous>, transform_indices = @transform_7, window_bounds = array<i64: 128, 128>}, {pipeline_mode = #tpu.pipeline_mode<synchronous>, transform_indices = @transform_8, window_bounds = array<i64: 1, 128>}, {pipeline_mode = #tpu.pipeline_mode<synchronous>, transform_indices = @transform_9, window_bounds = array<i64: 1, 128>}, {transform_indices = @transform_10, window_bounds = array<i64: 1, 8, 16, 128>}]} {
    %c8_i32 = arith.constant 8 : i32
    %0 = arith.muli %arg1, %c8_i32 : i32
    %cst = arith.constant 0.000000e+00 : f32
    %1 = vector.broadcast %cst : f32 to vector<160x128xf32>
    %c1_i32 = arith.constant 1 : i32
    %2 = arith.muli %0, %c1_i32 : i32
    %c0_i32 = arith.constant 0 : i32
    %3 = arith.addi %2, %c0_i32 : i32
    %c0 = arith.constant 0 : index
    %4 = arith.index_cast %3 : i32 to index
    %c0_0 = arith.constant 0 : index
    %c0_1 = arith.constant 0 : index
    %5 = vector.load %arg2[%c0, %4, %c0_0, %c0_1] : memref<1x20x18x128xbf16, #tpu.memory_space<vmem>>, vector<1x10x16x128xbf16>
    %6 = vector.shape_cast %5 : vector<1x10x16x128xbf16> to vector<10x16x128xbf16>
    %7 = vector.shape_cast %6 : vector<10x16x128xbf16> to vector<160x128xbf16>
    %c0_2 = arith.constant 0 : index
    %c0_3 = arith.constant 0 : index
    %c0_4 = arith.constant 0 : index
    %8 = vector.load %arg3[%c0_2, %c0_3, %c0_4] : memref<9x128x128xbf16, #tpu.memory_space<vmem>>, vector<1x128x128xbf16>
    %9 = vector.shape_cast %8 : vector<1x128x128xbf16> to vector<128x128xbf16>
    %cst_5 = arith.constant dense<0.000000e+00> : vector<160x128xf32>
    %10 = tpu.matmul %7, %9, %cst_5 {dimension_numbers = #tpu.dot_dimension_numbers<[1], [0], [0], [1], [0, 0, 1, 1], [], []>} : vector<160x128xbf16>, vector<128x128xbf16>, vector<160x128xf32> -> vector<160x128xf32>
    %11 = arith.addf %1, %10 : vector<160x128xf32>
    %c1_i32_6 = arith.constant 1 : i32
    %12 = arith.muli %0, %c1_i32_6 : i32
    %c0_i32_7 = arith.constant 0 : i32
    %13 = arith.addi %12, %c0_i32_7 : i32
    %c0_8 = arith.constant 0 : index
    %14 = arith.index_cast %13 : i32 to index
    %c1 = arith.constant 1 : index
    %c0_9 = arith.constant 0 : index
    %15 = vector.load %arg2[%c0_8, %14, %c1, %c0_9] : memref<1x20x18x128xbf16, #tpu.memory_space<vmem>>, vector<1x10x16x128xbf16>
    %16 = vector.shape_cast %15 : vector<1x10x16x128xbf16> to vector<10x16x128xbf16>
    %17 = vector.shape_cast %16 : vector<10x16x128xbf16> to vector<160x128xbf16>
    %c1_10 = arith.constant 1 : index
    %c0_11 = arith.constant 0 : index
    %c0_12 = arith.constant 0 : index
    %18 = vector.load %arg3[%c1_10, %c0_11, %c0_12] : memref<9x128x128xbf16, #tpu.memory_space<vmem>>, vector<1x128x128xbf16>
    %19 = vector.shape_cast %18 : vector<1x128x128xbf16> to vector<128x128xbf16>
    %cst_13 = arith.constant dense<0.000000e+00> : vector<160x128xf32>
    %20 = tpu.matmul %17, %19, %cst_13 {dimension_numbers = #tpu.dot_dimension_numbers<[1], [0], [0], [1], [0, 0, 1, 1], [], []>} : vector<160x128xbf16>, vector<128x128xbf16>, vector<160x128xf32> -> vector<160x128xf32>
    %21 = arith.addf %11, %20 : vector<160x128xf32>
    %c1_i32_14 = arith.constant 1 : i32
    %22 = arith.muli %0, %c1_i32_14 : i32
    %c0_i32_15 = arith.constant 0 : i32
    %23 = arith.addi %22, %c0_i32_15 : i32
    %c0_16 = arith.constant 0 : index
    %24 = arith.index_cast %23 : i32 to index
    %c2 = arith.constant 2 : index
    %c0_17 = arith.constant 0 : index
    %25 = vector.load %arg2[%c0_16, %24, %c2, %c0_17] : memref<1x20x18x128xbf16, #tpu.memory_space<vmem>>, vector<1x10x16x128xbf16>
    %26 = vector.shape_cast %25 : vector<1x10x16x128xbf16> to vector<10x16x128xbf16>
    %27 = vector.shape_cast %26 : vector<10x16x128xbf16> to vector<160x128xbf16>
    %c2_18 = arith.constant 2 : index
    %c0_19 = arith.constant 0 : index
    %c0_20 = arith.constant 0 : index
    %28 = vector.load %arg3[%c2_18, %c0_19, %c0_20] : memref<9x128x128xbf16, #tpu.memory_space<vmem>>, vector<1x128x128xbf16>
    %29 = vector.shape_cast %28 : vector<1x128x128xbf16> to vector<128x128xbf16>
    %cst_21 = arith.constant dense<0.000000e+00> : vector<160x128xf32>
    %30 = tpu.matmul %27, %29, %cst_21 {dimension_numbers = #tpu.dot_dimension_numbers<[1], [0], [0], [1], [0, 0, 1, 1], [], []>} : vector<160x128xbf16>, vector<128x128xbf16>, vector<160x128xf32> -> vector<160x128xf32>
    %31 = arith.addf %21, %30 : vector<160x128xf32>
    %c1_i32_22 = arith.constant 1 : i32
    %32 = arith.muli %0, %c1_i32_22 : i32
    %c1_i32_23 = arith.constant 1 : i32
    %33 = arith.addi %32, %c1_i32_23 : i32
    %c0_24 = arith.constant 0 : index
    %34 = arith.index_cast %33 : i32 to index
    %c0_25 = arith.constant 0 : index
    %c0_26 = arith.constant 0 : index
    %35 = vector.load %arg2[%c0_24, %34, %c0_25, %c0_26] : memref<1x20x18x128xbf16, #tpu.memory_space<vmem>>, vector<1x10x16x128xbf16>
    %36 = vector.shape_cast %35 : vector<1x10x16x128xbf16> to vector<10x16x128xbf16>
    %37 = vector.shape_cast %36 : vector<10x16x128xbf16> to vector<160x128xbf16>
    %c3 = arith.constant 3 : index
    %c0_27 = arith.constant 0 : index
    %c0_28 = arith.constant 0 : index
    %38 = vector.load %arg3[%c3, %c0_27, %c0_28] : memref<9x128x128xbf16, #tpu.memory_space<vmem>>, vector<1x128x128xbf16>
    %39 = vector.shape_cast %38 : vector<1x128x128xbf16> to vector<128x128xbf16>
    %cst_29 = arith.constant dense<0.000000e+00> : vector<160x128xf32>
    %40 = tpu.matmul %37, %39, %cst_29 {dimension_numbers = #tpu.dot_dimension_numbers<[1], [0], [0], [1], [0, 0, 1, 1], [], []>} : vector<160x128xbf16>, vector<128x128xbf16>, vector<160x128xf32> -> vector<160x128xf32>
    %41 = arith.addf %31, %40 : vector<160x128xf32>
    %c1_i32_30 = arith.constant 1 : i32
    %42 = arith.muli %0, %c1_i32_30 : i32
    %c1_i32_31 = arith.constant 1 : i32
    %43 = arith.addi %42, %c1_i32_31 : i32
    %c0_32 = arith.constant 0 : index
    %44 = arith.index_cast %43 : i32 to index
    %c1_33 = arith.constant 1 : index
    %c0_34 = arith.constant 0 : index
    %45 = vector.load %arg2[%c0_32, %44, %c1_33, %c0_34] : memref<1x20x18x128xbf16, #tpu.memory_space<vmem>>, vector<1x10x16x128xbf16>
    %46 = vector.shape_cast %45 : vector<1x10x16x128xbf16> to vector<10x16x128xbf16>
    %47 = vector.shape_cast %46 : vector<10x16x128xbf16> to vector<160x128xbf16>
    %c4 = arith.constant 4 : index
    %c0_35 = arith.constant 0 : index
    %c0_36 = arith.constant 0 : index
    %48 = vector.load %arg3[%c4, %c0_35, %c0_36] : memref<9x128x128xbf16, #tpu.memory_space<vmem>>, vector<1x128x128xbf16>
    %49 = vector.shape_cast %48 : vector<1x128x128xbf16> to vector<128x128xbf16>
    %cst_37 = arith.constant dense<0.000000e+00> : vector<160x128xf32>
    %50 = tpu.matmul %47, %49, %cst_37 {dimension_numbers = #tpu.dot_dimension_numbers<[1], [0], [0], [1], [0, 0, 1, 1], [], []>} : vector<160x128xbf16>, vector<128x128xbf16>, vector<160x128xf32> -> vector<160x128xf32>
    %51 = arith.addf %41, %50 : vector<160x128xf32>
    %c1_i32_38 = arith.constant 1 : i32
    %52 = arith.muli %0, %c1_i32_38 : i32
    %c1_i32_39 = arith.constant 1 : i32
    %53 = arith.addi %52, %c1_i32_39 : i32
    %c0_40 = arith.constant 0 : index
    %54 = arith.index_cast %53 : i32 to index
    %c2_41 = arith.constant 2 : index
    %c0_42 = arith.constant 0 : index
    %55 = vector.load %arg2[%c0_40, %54, %c2_41, %c0_42] : memref<1x20x18x128xbf16, #tpu.memory_space<vmem>>, vector<1x10x16x128xbf16>
    %56 = vector.shape_cast %55 : vector<1x10x16x128xbf16> to vector<10x16x128xbf16>
    %57 = vector.shape_cast %56 : vector<10x16x128xbf16> to vector<160x128xbf16>
    %c5 = arith.constant 5 : index
    %c0_43 = arith.constant 0 : index
    %c0_44 = arith.constant 0 : index
    %58 = vector.load %arg3[%c5, %c0_43, %c0_44] : memref<9x128x128xbf16, #tpu.memory_space<vmem>>, vector<1x128x128xbf16>
    %59 = vector.shape_cast %58 : vector<1x128x128xbf16> to vector<128x128xbf16>
    %cst_45 = arith.constant dense<0.000000e+00> : vector<160x128xf32>
    %60 = tpu.matmul %57, %59, %cst_45 {dimension_numbers = #tpu.dot_dimension_numbers<[1], [0], [0], [1], [0, 0, 1, 1], [], []>} : vector<160x128xbf16>, vector<128x128xbf16>, vector<160x128xf32> -> vector<160x128xf32>
    %61 = arith.addf %51, %60 : vector<160x128xf32>
    %c1_i32_46 = arith.constant 1 : i32
    %62 = arith.muli %0, %c1_i32_46 : i32
    %c2_i32 = arith.constant 2 : i32
    %63 = arith.addi %62, %c2_i32 : i32
    %c0_47 = arith.constant 0 : index
    %64 = arith.index_cast %63 : i32 to index
    %c0_48 = arith.constant 0 : index
    %c0_49 = arith.constant 0 : index
    %65 = vector.load %arg2[%c0_47, %64, %c0_48, %c0_49] : memref<1x20x18x128xbf16, #tpu.memory_space<vmem>>, vector<1x10x16x128xbf16>
    %66 = vector.shape_cast %65 : vector<1x10x16x128xbf16> to vector<10x16x128xbf16>
    %67 = vector.shape_cast %66 : vector<10x16x128xbf16> to vector<160x128xbf16>
    %c6 = arith.constant 6 : index
    %c0_50 = arith.constant 0 : index
    %c0_51 = arith.constant 0 : index
    %68 = vector.load %arg3[%c6, %c0_50, %c0_51] : memref<9x128x128xbf16, #tpu.memory_space<vmem>>, vector<1x128x128xbf16>
    %69 = vector.shape_cast %68 : vector<1x128x128xbf16> to vector<128x128xbf16>
    %cst_52 = arith.constant dense<0.000000e+00> : vector<160x128xf32>
    %70 = tpu.matmul %67, %69, %cst_52 {dimension_numbers = #tpu.dot_dimension_numbers<[1], [0], [0], [1], [0, 0, 1, 1], [], []>} : vector<160x128xbf16>, vector<128x128xbf16>, vector<160x128xf32> -> vector<160x128xf32>
    %71 = arith.addf %61, %70 : vector<160x128xf32>
    %c1_i32_53 = arith.constant 1 : i32
    %72 = arith.muli %0, %c1_i32_53 : i32
    %c2_i32_54 = arith.constant 2 : i32
    %73 = arith.addi %72, %c2_i32_54 : i32
    %c0_55 = arith.constant 0 : index
    %74 = arith.index_cast %73 : i32 to index
    %c1_56 = arith.constant 1 : index
    %c0_57 = arith.constant 0 : index
    %75 = vector.load %arg2[%c0_55, %74, %c1_56, %c0_57] : memref<1x20x18x128xbf16, #tpu.memory_space<vmem>>, vector<1x10x16x128xbf16>
    %76 = vector.shape_cast %75 : vector<1x10x16x128xbf16> to vector<10x16x128xbf16>
    %77 = vector.shape_cast %76 : vector<10x16x128xbf16> to vector<160x128xbf16>
    %c7 = arith.constant 7 : index
    %c0_58 = arith.constant 0 : index
    %c0_59 = arith.constant 0 : index
    %78 = vector.load %arg3[%c7, %c0_58, %c0_59] : memref<9x128x128xbf16, #tpu.memory_space<vmem>>, vector<1x128x128xbf16>
    %79 = vector.shape_cast %78 : vector<1x128x128xbf16> to vector<128x128xbf16>
    %cst_60 = arith.constant dense<0.000000e+00> : vector<160x128xf32>
    %80 = tpu.matmul %77, %79, %cst_60 {dimension_numbers = #tpu.dot_dimension_numbers<[1], [0], [0], [1], [0, 0, 1, 1], [], []>} : vector<160x128xbf16>, vector<128x128xbf16>, vector<160x128xf32> -> vector<160x128xf32>
    %81 = arith.addf %71, %80 : vector<160x128xf32>
    %c1_i32_61 = arith.constant 1 : i32
    %82 = arith.muli %0, %c1_i32_61 : i32
    %c2_i32_62 = arith.constant 2 : i32
    %83 = arith.addi %82, %c2_i32_62 : i32
    %c0_63 = arith.constant 0 : index
    %84 = arith.index_cast %83 : i32 to index
    %c2_64 = arith.constant 2 : index
    %c0_65 = arith.constant 0 : index
    %85 = vector.load %arg2[%c0_63, %84, %c2_64, %c0_65] : memref<1x20x18x128xbf16, #tpu.memory_space<vmem>>, vector<1x10x16x128xbf16>
    %86 = vector.shape_cast %85 : vector<1x10x16x128xbf16> to vector<10x16x128xbf16>
    %87 = vector.shape_cast %86 : vector<10x16x128xbf16> to vector<160x128xbf16>
    %c8 = arith.constant 8 : index
    %c0_66 = arith.constant 0 : index
    %c0_67 = arith.constant 0 : index
    %88 = vector.load %arg3[%c8, %c0_66, %c0_67] : memref<9x128x128xbf16, #tpu.memory_space<vmem>>, vector<1x128x128xbf16>
    %89 = vector.shape_cast %88 : vector<1x128x128xbf16> to vector<128x128xbf16>
    %cst_68 = arith.constant dense<0.000000e+00> : vector<160x128xf32>
    %90 = tpu.matmul %87, %89, %cst_68 {dimension_numbers = #tpu.dot_dimension_numbers<[1], [0], [0], [1], [0, 0, 1, 1], [], []>} : vector<160x128xbf16>, vector<128x128xbf16>, vector<160x128xf32> -> vector<160x128xf32>
    %91 = arith.addf %81, %90 : vector<160x128xf32>
    %c0_69 = arith.constant 0 : index
    %c0_70 = arith.constant 0 : index
    %92 = vector.load %arg4[%c0_69, %c0_70] : memref<1x128xf32, #tpu.memory_space<vmem>>, vector<1x128xf32>
    %93 = vector.broadcast %92 : vector<1x128xf32> to vector<160x128xf32>
    %94 = arith.mulf %91, %93 : vector<160x128xf32>
    %c0_71 = arith.constant 0 : index
    %c0_72 = arith.constant 0 : index
    %95 = vector.load %arg5[%c0_71, %c0_72] : memref<1x128xf32, #tpu.memory_space<vmem>>, vector<1x128xf32>
    %96 = vector.broadcast %95 : vector<1x128xf32> to vector<160x128xf32>
    %97 = arith.addf %94, %96 : vector<160x128xf32>
    %cst_73 = arith.constant 0.000000e+00 : f32
    %98 = vector.broadcast %cst_73 : f32 to vector<160x128xf32>
    %99 = arith.maximumf %97, %98 : vector<160x128xf32>
    %100 = vector.shape_cast %99 : vector<160x128xf32> to vector<10x16x128xf32>
    %c1_i32_74 = arith.constant 1 : i32
    %101 = arith.subi %0, %c1_i32_74 : i32
    %102 = tpu.iota {dimensions = array<i32: 0>} : vector<10x16x128xi32>
    %103 = vector.broadcast %101 : i32 to vector<10x16x128xi32>
    %104 = arith.addi %103, %102 : vector<10x16x128xi32>
    %c0_i32_75 = arith.constant 0 : i32
    %105 = vector.broadcast %c0_i32_75 : i32 to vector<10x16x128xi32>
    %106 = arith.cmpi sge, %104, %105 : vector<10x16x128xi32>
    %c16_i32 = arith.constant 16 : i32
    %107 = vector.broadcast %c16_i32 : i32 to vector<10x16x128xi32>
    %108 = arith.cmpi slt, %104, %107 : vector<10x16x128xi32>
    %109 = arith.andi %106, %108 : vector<10x16x128xi1>
    %cst_76 = arith.constant 0.000000e+00 : f32
    %110 = vector.broadcast %cst_76 : f32 to vector<10x16x128xf32>
    %111 = arith.select %109, %100, %110 : vector<10x16x128xi1>, vector<10x16x128xf32>
    %cst_77 = arith.constant 0.000000e+00 : bf16
    %112 = vector.broadcast %cst_77 : bf16 to vector<10x1x128xbf16>
    %c0_78 = arith.constant 0 : index
    %c0_79 = arith.constant 0 : index
    %c0_80 = arith.constant 0 : index
    %113 = vector.load %arg13[%c0_78, %c0_79, %c0_80] : memref<10x18x128xbf16, #tpu.memory_space<vmem>>, vector<10x1x128xbf16>
    tpu.vector_store %arg13[%c0_78, %c0_79, %c0_80], %112 {strides = array<i32>} : memref<10x18x128xbf16, #tpu.memory_space<vmem>>, vector<10x1x128xbf16>,
    %cst_81 = arith.constant 0.000000e+00 : bf16
    %114 = vector.broadcast %cst_81 : bf16 to vector<10x1x128xbf16>
    %c0_82 = arith.constant 0 : index
    %c17 = arith.constant 17 : index
    %c0_83 = arith.constant 0 : index
    %115 = vector.load %arg13[%c0_82, %c17, %c0_83] : memref<10x18x128xbf16, #tpu.memory_space<vmem>>, vector<10x1x128xbf16>
    tpu.vector_store %arg13[%c0_82, %c17, %c0_83], %114 {strides = array<i32>} : memref<10x18x128xbf16, #tpu.memory_space<vmem>>, vector<10x1x128xbf16>,
    %116 = arith.truncf %111 : vector<10x16x128xf32> to vector<10x16x128xbf16>
    %c0_84 = arith.constant 0 : index
    %c1_85 = arith.constant 1 : index
    %c0_86 = arith.constant 0 : index
    %117 = vector.load %arg13[%c0_84, %c1_85, %c0_86] : memref<10x18x128xbf16, #tpu.memory_space<vmem>>, vector<10x16x128xbf16>
    tpu.vector_store %arg13[%c0_84, %c1_85, %c0_86], %116 {strides = array<i32>} : memref<10x18x128xbf16, #tpu.memory_space<vmem>>, vector<10x16x128xbf16>,
    %cst_87 = arith.constant 0.000000e+00 : f32
    %118 = vector.broadcast %cst_87 : f32 to vector<128x128xf32>
    %c0_88 = arith.constant 0 : index
    %c0_89 = arith.constant 0 : index
    %c0_90 = arith.constant 0 : index
    %119 = vector.load %arg13[%c0_88, %c0_89, %c0_90] : memref<10x18x128xbf16, #tpu.memory_space<vmem>>, vector<8x16x128xbf16>
    %120 = vector.shape_cast %119 : vector<8x16x128xbf16> to vector<128x128xbf16>
    %c0_91 = arith.constant 0 : index
    %c0_92 = arith.constant 0 : index
    %c0_93 = arith.constant 0 : index
    %121 = vector.load %arg6[%c0_91, %c0_92, %c0_93] : memref<9x128x128xbf16, #tpu.memory_space<vmem>>, vector<1x128x128xbf16>
    %122 = vector.shape_cast %121 : vector<1x128x128xbf16> to vector<128x128xbf16>
    %cst_94 = arith.constant dense<0.000000e+00> : vector<128x128xf32>
    %123 = tpu.matmul %120, %122, %cst_94 {dimension_numbers = #tpu.dot_dimension_numbers<[1], [0], [0], [1], [0, 0, 1, 1], [], []>} : vector<128x128xbf16>, vector<128x128xbf16>, vector<128x128xf32> -> vector<128x128xf32>
    %124 = arith.addf %118, %123 : vector<128x128xf32>
    %c0_95 = arith.constant 0 : index
    %c1_96 = arith.constant 1 : index
    %c0_97 = arith.constant 0 : index
    %125 = vector.load %arg13[%c0_95, %c1_96, %c0_97] : memref<10x18x128xbf16, #tpu.memory_space<vmem>>, vector<8x16x128xbf16>
    %126 = vector.shape_cast %125 : vector<8x16x128xbf16> to vector<128x128xbf16>
    %c1_98 = arith.constant 1 : index
    %c0_99 = arith.constant 0 : index
    %c0_100 = arith.constant 0 : index
    %127 = vector.load %arg6[%c1_98, %c0_99, %c0_100] : memref<9x128x128xbf16, #tpu.memory_space<vmem>>, vector<1x128x128xbf16>
    %128 = vector.shape_cast %127 : vector<1x128x128xbf16> to vector<128x128xbf16>
    %cst_101 = arith.constant dense<0.000000e+00> : vector<128x128xf32>
    %129 = tpu.matmul %126, %128, %cst_101 {dimension_numbers = #tpu.dot_dimension_numbers<[1], [0], [0], [1], [0, 0, 1, 1], [], []>} : vector<128x128xbf16>, vector<128x128xbf16>, vector<128x128xf32> -> vector<128x128xf32>
    %130 = arith.addf %124, %129 : vector<128x128xf32>
    %c0_102 = arith.constant 0 : index
    %c2_103 = arith.constant 2 : index
    %c0_104 = arith.constant 0 : index
    %131 = vector.load %arg13[%c0_102, %c2_103, %c0_104] : memref<10x18x128xbf16, #tpu.memory_space<vmem>>, vector<8x16x128xbf16>
    %132 = vector.shape_cast %131 : vector<8x16x128xbf16> to vector<128x128xbf16>
    %c2_105 = arith.constant 2 : index
    %c0_106 = arith.constant 0 : index
    %c0_107 = arith.constant 0 : index
    %133 = vector.load %arg6[%c2_105, %c0_106, %c0_107] : memref<9x128x128xbf16, #tpu.memory_space<vmem>>, vector<1x128x128xbf16>
    %134 = vector.shape_cast %133 : vector<1x128x128xbf16> to vector<128x128xbf16>
    %cst_108 = arith.constant dense<0.000000e+00> : vector<128x128xf32>
    %135 = tpu.matmul %132, %134, %cst_108 {dimension_numbers = #tpu.dot_dimension_numbers<[1], [0], [0], [1], [0, 0, 1, 1], [], []>} : vector<128x128xbf16>, vector<128x128xbf16>, vector<128x128xf32> -> vector<128x128xf32>
    %136 = arith.addf %130, %135 : vector<128x128xf32>
    %c1_109 = arith.constant 1 : index
    %c0_110 = arith.constant 0 : index
    %c0_111 = arith.constant 0 : index
    %137 = vector.load %arg13[%c1_109, %c0_110, %c0_111] : memref<10x18x128xbf16, #tpu.memory_space<vmem>>, vector<8x16x128xbf16>
    %138 = vector.shape_cast %137 : vector<8x16x128xbf16> to vector<128x128xbf16>
    %c3_112 = arith.constant 3 : index
    %c0_113 = arith.constant 0 : index
    %c0_114 = arith.constant 0 : index
    %139 = vector.load %arg6[%c3_112, %c0_113, %c0_114] : memref<9x128x128xbf16, #tpu.memory_space<vmem>>, vector<1x128x128xbf16>
    %140 = vector.shape_cast %139 : vector<1x128x128xbf16> to vector<128x128xbf16>
    %cst_115 = arith.constant dense<0.000000e+00> : vector<128x128xf32>
    %141 = tpu.matmul %138, %140, %cst_115 {dimension_numbers = #tpu.dot_dimension_numbers<[1], [0], [0], [1], [0, 0, 1, 1], [], []>} : vector<128x128xbf16>, vector<128x128xbf16>, vector<128x128xf32> -> vector<128x128xf32>
    %142 = arith.addf %136, %141 : vector<128x128xf32>
    %c1_116 = arith.constant 1 : index
    %c1_117 = arith.constant 1 : index
    %c0_118 = arith.constant 0 : index
    %143 = vector.load %arg13[%c1_116, %c1_117, %c0_118] : memref<10x18x128xbf16, #tpu.memory_space<vmem>>, vector<8x16x128xbf16>
    %144 = vector.shape_cast %143 : vector<8x16x128xbf16> to vector<128x128xbf16>
    %c4_119 = arith.constant 4 : index
    %c0_120 = arith.constant 0 : index
    %c0_121 = arith.constant 0 : index
    %145 = vector.load %arg6[%c4_119, %c0_120, %c0_121] : memref<9x128x128xbf16, #tpu.memory_space<vmem>>, vector<1x128x128xbf16>
    %146 = vector.shape_cast %145 : vector<1x128x128xbf16> to vector<128x128xbf16>
    %cst_122 = arith.constant dense<0.000000e+00> : vector<128x128xf32>
    %147 = tpu.matmul %144, %146, %cst_122 {dimension_numbers = #tpu.dot_dimension_numbers<[1], [0], [0], [1], [0, 0, 1, 1], [], []>} : vector<128x128xbf16>, vector<128x128xbf16>, vector<128x128xf32> -> vector<128x128xf32>
    %148 = arith.addf %142, %147 : vector<128x128xf32>
    %c1_123 = arith.constant 1 : index
    %c2_124 = arith.constant 2 : index
    %c0_125 = arith.constant 0 : index
    %149 = vector.load %arg13[%c1_123, %c2_124, %c0_125] : memref<10x18x128xbf16, #tpu.memory_space<vmem>>, vector<8x16x128xbf16>
    %150 = vector.shape_cast %149 : vector<8x16x128xbf16> to vector<128x128xbf16>
    %c5_126 = arith.constant 5 : index
    %c0_127 = arith.constant 0 : index
    %c0_128 = arith.constant 0 : index
    %151 = vector.load %arg6[%c5_126, %c0_127, %c0_128] : memref<9x128x128xbf16, #tpu.memory_space<vmem>>, vector<1x128x128xbf16>
    %152 = vector.shape_cast %151 : vector<1x128x128xbf16> to vector<128x128xbf16>
    %cst_129 = arith.constant dense<0.000000e+00> : vector<128x128xf32>
    %153 = tpu.matmul %150, %152, %cst_129 {dimension_numbers = #tpu.dot_dimension_numbers<[1], [0], [0], [1], [0, 0, 1, 1], [], []>} : vector<128x128xbf16>, vector<128x128xbf16>, vector<128x128xf32> -> vector<128x128xf32>
    %154 = arith.addf %148, %153 : vector<128x128xf32>
    %c2_130 = arith.constant 2 : index
    %c0_131 = arith.constant 0 : index
    %c0_132 = arith.constant 0 : index
    %155 = vector.load %arg13[%c2_130, %c0_131, %c0_132] : memref<10x18x128xbf16, #tpu.memory_space<vmem>>, vector<8x16x128xbf16>
    %156 = vector.shape_cast %155 : vector<8x16x128xbf16> to vector<128x128xbf16>
    %c6_133 = arith.constant 6 : index
    %c0_134 = arith.constant 0 : index
    %c0_135 = arith.constant 0 : index
    %157 = vector.load %arg6[%c6_133, %c0_134, %c0_135] : memref<9x128x128xbf16, #tpu.memory_space<vmem>>, vector<1x128x128xbf16>
    %158 = vector.shape_cast %157 : vector<1x128x128xbf16> to vector<128x128xbf16>
    %cst_136 = arith.constant dense<0.000000e+00> : vector<128x128xf32>
    %159 = tpu.matmul %156, %158, %cst_136 {dimension_numbers = #tpu.dot_dimension_numbers<[1], [0], [0], [1], [0, 0, 1, 1], [], []>} : vector<128x128xbf16>, vector<128x128xbf16>, vector<128x128xf32> -> vector<128x128xf32>
    %160 = arith.addf %154, %159 : vector<128x128xf32>
    %c2_137 = arith.constant 2 : index
    %c1_138 = arith.constant 1 : index
    %c0_139 = arith.constant 0 : index
    %161 = vector.load %arg13[%c2_137, %c1_138, %c0_139] : memref<10x18x128xbf16, #tpu.memory_space<vmem>>, vector<8x16x128xbf16>
    %162 = vector.shape_cast %161 : vector<8x16x128xbf16> to vector<128x128xbf16>
    %c7_140 = arith.constant 7 : index
    %c0_141 = arith.constant 0 : index
    %c0_142 = arith.constant 0 : index
    %163 = vector.load %arg6[%c7_140, %c0_141, %c0_142] : memref<9x128x128xbf16, #tpu.memory_space<vmem>>, vector<1x128x128xbf16>
    %164 = vector.shape_cast %163 : vector<1x128x128xbf16> to vector<128x128xbf16>
    %cst_143 = arith.constant dense<0.000000e+00> : vector<128x128xf32>
    %165 = tpu.matmul %162, %164, %cst_143 {dimension_numbers = #tpu.dot_dimension_numbers<[1], [0], [0], [1], [0, 0, 1, 1], [], []>} : vector<128x128xbf16>, vector<128x128xbf16>, vector<128x128xf32> -> vector<128x128xf32>
    %166 = arith.addf %160, %165 : vector<128x128xf32>
    %c2_144 = arith.constant 2 : index
    %c2_145 = arith.constant 2 : index
    %c0_146 = arith.constant 0 : index
    %167 = vector.load %arg13[%c2_144, %c2_145, %c0_146] : memref<10x18x128xbf16, #tpu.memory_space<vmem>>, vector<8x16x128xbf16>
    %168 = vector.shape_cast %167 : vector<8x16x128xbf16> to vector<128x128xbf16>
    %c8_147 = arith.constant 8 : index
    %c0_148 = arith.constant 0 : index
    %c0_149 = arith.constant 0 : index
    %169 = vector.load %arg6[%c8_147, %c0_148, %c0_149] : memref<9x128x128xbf16, #tpu.memory_space<vmem>>, vector<1x128x128xbf16>
    %170 = vector.shape_cast %169 : vector<1x128x128xbf16> to vector<128x128xbf16>
    %cst_150 = arith.constant dense<0.000000e+00> : vector<128x128xf32>
    %171 = tpu.matmul %168, %170, %cst_150 {dimension_numbers = #tpu.dot_dimension_numbers<[1], [0], [0], [1], [0, 0, 1, 1], [], []>} : vector<128x128xbf16>, vector<128x128xbf16>, vector<128x128xf32> -> vector<128x128xf32>
    %172 = arith.addf %166, %171 : vector<128x128xf32>
    %c0_151 = arith.constant 0 : index
    %c0_152 = arith.constant 0 : index
    %173 = vector.load %arg7[%c0_151, %c0_152] : memref<1x128xf32, #tpu.memory_space<vmem>>, vector<1x128xf32>
    %174 = vector.broadcast %173 : vector<1x128xf32> to vector<128x128xf32>
    %175 = arith.mulf %172, %174 : vector<128x128xf32>
    %c0_153 = arith.constant 0 : index
    %c0_154 = arith.constant 0 : index
    %176 = vector.load %arg8[%c0_153, %c0_154] : memref<1x128xf32, #tpu.memory_space<vmem>>, vector<1x128xf32>
    %177 = vector.broadcast %176 : vector<1x128xf32> to vector<128x128xf32>
    %178 = arith.addf %175, %177 : vector<128x128xf32>
    %c1_i32_155 = arith.constant 1 : i32
    %179 = arith.muli %0, %c1_i32_155 : i32
    %c1_i32_156 = arith.constant 1 : i32
    %180 = arith.addi %179, %c1_i32_156 : i32
    %c1_i32_157 = arith.constant 1 : i32
    %181 = arith.addi %180, %c1_i32_157 : i32
    %c0_158 = arith.constant 0 : index
    %182 = arith.index_cast %181 : i32 to index
    %c1_159 = arith.constant 1 : index
    %c0_160 = arith.constant 0 : index
    %183 = vector.load %arg2[%c0_158, %182, %c1_159, %c0_160] : memref<1x20x18x128xbf16, #tpu.memory_space<vmem>>, vector<1x8x16x128xbf16>
    %184 = vector.shape_cast %183 : vector<1x8x16x128xbf16> to vector<8x16x128xbf16>
    %185 = vector.shape_cast %184 : vector<8x16x128xbf16> to vector<128x128xbf16>
    %c0_161 = arith.constant 0 : index
    %c0_162 = arith.constant 0 : index
    %186 = vector.load %arg9[%c0_161, %c0_162] : memref<128x128xbf16, #tpu.memory_space<vmem>>, vector<128x128xbf16>
    %cst_163 = arith.constant dense<0.000000e+00> : vector<128x128xf32>
    %187 = tpu.matmul %185, %186, %cst_163 {dimension_numbers = #tpu.dot_dimension_numbers<[1], [0], [0], [1], [0, 0, 1, 1], [], []>} : vector<128x128xbf16>, vector<128x128xbf16>, vector<128x128xf32> -> vector<128x128xf32>
    %c0_164 = arith.constant 0 : index
    %c0_165 = arith.constant 0 : index
    %188 = vector.load %arg10[%c0_164, %c0_165] : memref<1x128xf32, #tpu.memory_space<vmem>>, vector<1x128xf32>
    %189 = vector.broadcast %188 : vector<1x128xf32> to vector<128x128xf32>
    %190 = arith.mulf %187, %189 : vector<128x128xf32>
    %c0_166 = arith.constant 0 : index
    %c0_167 = arith.constant 0 : index
    %191 = vector.load %arg11[%c0_166, %c0_167] : memref<1x128xf32, #tpu.memory_space<vmem>>, vector<1x128xf32>
    %192 = vector.broadcast %191 : vector<1x128xf32> to vector<128x128xf32>
    %193 = arith.addf %190, %192 : vector<128x128xf32>
    %194 = arith.addf %178, %193 : vector<128x128xf32>
    %cst_168 = arith.constant 0.000000e+00 : f32
    %195 = vector.broadcast %cst_168 : f32 to vector<128x128xf32>
    %196 = arith.maximumf %194, %195 : vector<128x128xf32>
    %197 = vector.shape_cast %196 : vector<128x128xf32> to vector<8x16x128xf32>
    %c0_169 = arith.constant 0 : index
    %c0_170 = arith.constant 0 : index
    %c0_171 = arith.constant 0 : index
    %c0_172 = arith.constant 0 : index
    %198 = vector.load %arg12[%c0_169, %c0_170, %c0_171, %c0_172] : memref<1x8x16x128xf32, #tpu.memory_space<vmem>>, vector<1x8x16x128xf32>
    %199 = vector.shape_cast %198 : vector<1x8x16x128xf32> to vector<8x16x128xf32>
    %200 = vector.shape_cast %197 : vector<8x16x128xf32> to vector<1x8x16x128xf32>
    tpu.vector_store %arg12[%c0_169, %c0_170, %c0_171, %c0_172], %200 {strides = array<i32>} : memref<1x8x16x128xf32, #tpu.memory_space<vmem>>, vector<1x8x16x128xf32>,
    return
  }
  func.func @transform_0(%arg0: i32, %arg1: i32) -> (i32, i32, i32, i32) {
    %c0_i32 = arith.constant 0 : i32
    %c0_i32_0 = arith.constant 0 : i32
    %c0_i32_1 = arith.constant 0 : i32
    %c0_i32_2 = arith.constant 0 : i32
    return %arg0, %c0_i32, %c0_i32_0, %c0_i32_1 : i32, i32, i32, i32
  }
  func.func @transform_1(%arg0: i32, %arg1: i32) -> (i32, i32, i32) {
    %c0_i32 = arith.constant 0 : i32
    %c0_i32_0 = arith.constant 0 : i32
    %c0_i32_1 = arith.constant 0 : i32
    %c0_i32_2 = arith.constant 0 : i32
    return %c0_i32, %c0_i32_0, %c0_i32_1 : i32, i32, i32
  }
  func.func @transform_2(%arg0: i32, %arg1: i32) -> (i32, i32) {
    %c0_i32 = arith.constant 0 : i32
    %c0_i32_0 = arith.constant 0 : i32
    %c0_i32_1 = arith.constant 0 : i32
    return %c0_i32, %c0_i32_0 : i32, i32
  }
  func.func @transform_3(%arg0: i32, %arg1: i32) -> (i32, i32) {
    %c0_i32 = arith.constant 0 : i32
    %c0_i32_0 = arith.constant 0 : i32
    %c0_i32_1 = arith.constant 0 : i32
    return %c0_i32, %c0_i32_0 : i32, i32
  }
  func.func @transform_4(%arg0: i32, %arg1: i32) -> (i32, i32, i32) {
    %c0_i32 = arith.constant 0 : i32
    %c0_i32_0 = arith.constant 0 : i32
    %c0_i32_1 = arith.constant 0 : i32
    %c0_i32_2 = arith.constant 0 : i32
    return %c0_i32, %c0_i32_0, %c0_i32_1 : i32, i32, i32
  }
  func.func @transform_5(%arg0: i32, %arg1: i32) -> (i32, i32) {
    %c0_i32 = arith.constant 0 : i32
    %c0_i32_0 = arith.constant 0 : i32
    %c0_i32_1 = arith.constant 0 : i32
    return %c0_i32, %c0_i32_0 : i32, i32
  }
  func.func @transform_6(%arg0: i32, %arg1: i32) -> (i32, i32) {
    %c0_i32 = arith.constant 0 : i32
    %c0_i32_0 = arith.constant 0 : i32
    %c0_i32_1 = arith.constant 0 : i32
    return %c0_i32, %c0_i32_0 : i32, i32
  }
  func.func @transform_7(%arg0: i32, %arg1: i32) -> (i32, i32) {
    %c0_i32 = arith.constant 0 : i32
    %c0_i32_0 = arith.constant 0 : i32
    %c0_i32_1 = arith.constant 0 : i32
    return %c0_i32, %c0_i32_0 : i32, i32
  }
  func.func @transform_8(%arg0: i32, %arg1: i32) -> (i32, i32) {
    %c0_i32 = arith.constant 0 : i32
    %c0_i32_0 = arith.constant 0 : i32
    %c0_i32_1 = arith.constant 0 : i32
    return %c0_i32, %c0_i32_0 : i32, i32
  }
  func.func @transform_9(%arg0: i32, %arg1: i32) -> (i32, i32) {
    %c0_i32 = arith.constant 0 : i32
    %c0_i32_0 = arith.constant 0 : i32
    %c0_i32_1 = arith.constant 0 : i32
    return %c0_i32, %c0_i32_0 : i32, i32
  }
  func.func @transform_10(%arg0: i32, %arg1: i32) -> (i32, i32, i32, i32) {
    %c0_i32 = arith.constant 0 : i32
    %c0_i32_0 = arith.constant 0 : i32
    %c0_i32_1 = arith.constant 0 : i32
    return %arg0, %arg1, %c0_i32, %c0_i32_0 : i32, i32, i32, i32
  }
}

</mosaic_0001>

<bundles_post_ra>
// kernel: tpu_custom_call.1
= control target key start
LH: loop header
LB: loop body
LE: loop exit
PB: predicated region body
PF: predicated region fallthrough
CT: control target
= control target key end

     0   :  { %s10937_s0 = inlined_call_operand.vmem [shape: bf16[2,20,18,128], index: 0, kind: input, shape index: {}]   ;;  %s10938_s1 = inlined_call_operand.vmem [shape: bf16[9,128,128], index: 1, kind: input, shape index: {}]   ;;  %s10939_s2 = inlined_call_operand.vmem [shape: f32[1,128], index: 2, kind: input, shape index: {}]   ;;  %s10940_s3 = inlined_call_operand.vmem [shape: f32[1,128], index: 3, kind: input, shape index: {}]   ;;  %s10941_s4 = inlined_call_operand.hbm [shape: bf16[9,128,128], index: 4, kind: input, shape index: {}]   ;;  %s10942_s5 = inlined_call_operand.vmem [shape: f32[1,128], index: 5, kind: input, shape index: {}]   ;;  %s10943_s6 = inlined_call_operand.vmem [shape: f32[1,128], index: 6, kind: input, shape index: {}]   ;;  %s10944_s7 = inlined_call_operand.vmem [shape: bf16[128,128], index: 7, kind: input, shape index: {}]   ;;  %s10945_s8 = inlined_call_operand.vmem [shape: f32[1,128], index: 8, kind: input, shape index: {}]   ;;  %s10946_s9 = inlined_call_operand.vmem [shape: f32[1,128], index: 9, kind: input, shape index: {}]   ;;  %s10947_s10 = inlined_call_operand.hbm [shape: f32[2,16,16,128], index: 10, kind: output, shape index: {}]  }
   0x1   :  { %10955 = sst [smem:[#allocation28_spill]] %s10941_s4 }
   0x2   :  { %15 = vsyncpa [#allocation4], 0 }
   0x3   :  { %16 = vsyncpa [#allocation5], 0 }
   0x4   :  { %18 = vsyncpa [#allocation5 + $0x1], 0  ;;  %s8460_s13 = smov 0   ;;  %s8462_s14 = smov 0  }
   0x5   :  { %s8464_s15 = smov 0   ;;  %s8466_s16 = smov 0  }
   0x6   :  { %s8468_s17 = smov 0   ;;  %s8470_s18 = smov 0  }
   0x7   :  { %s8472_s19 = smov 0   ;;  %s8474_s20 = smov 0  }
   0x8 LB: > { %10956 = sst [smem:[#allocation9_spill]] %s8390_s18  ;;  %s6759_s21 = sadd.s32 4294967295, %s8398_s20   ;;  %s8398_s20 = sphi %s8474_s20, %s24_s20   ;;  %s8394_s19 = sphi %s8472_s19, %s11056_s19   ;;  %s8390_s18 = sphi %s8470_s18, %s11055_s18   ;;  %s8386_s17 = sphi %s8468_s17, %s11054_s17   ;;  %s8382_s16 = sphi %s8466_s16, %s11053_s16   ;;  %s8378_s15 = sphi %s8464_s15, %s11059_s15   ;;  %s8374_s14 = sphi %s8462_s14, %s11058_s14   ;;  %s8370_s13 = sphi %s8460_s13, %s11057_s13  }
   0x9   : > { %10957 = sst [smem:[#allocation10_spill]] %s8394_s19  ;;  %s6760_s22 = sadd.s32 4294967294, %s8398_s20  }
   0xa   : > { %s33_s23 = sadd.s32 1, %s8390_s18  ;;  %s36_s24 = sadd.s32 1, %s8394_s19 }
   0xb   : > { %p34_p0 = scmp.ge.s32.totalorder %s33_s23, 2  ;;  %s260_s25 = sadd.s32 1, %s8378_s15 }
   0xc   : > { %p270_p1 = scmp.ne.s32.totalorder %s8378_s15, %s8374_s14  ;;  %p271_p2 = scmp.eq.s32.totalorder %s6759_s21, 3 }
   0xd   : > { %s11061_s23 = smov (%p34_p0, %s33_s23), 0  ;;  %s11063_s24 = smov (!%p34_p0, %s36_s24), %s8394_s19 }
   0xe   : > { %10958 = sst [smem:[#allocation11_spill]] %s11061_s23  ;;  %s256_s26 = ssub.s32 %s8390_s18, %s11061_s23 }
   0xf   : > { %p8512_p3 = por %p271_p2, %p270_p1  ;;  %p38_p4 = scmp.ge.s32.totalorder %s11063_s24, 2 }
  0x10   : > { %p276_p5 = scmp.ne.s32.totalorder %s8374_s14, %s8370_s13  ;;  %p277_p6 = scmp.eq.s32.totalorder %s6760_s22, 3 }
  0x11   : > { %p6761_p7 = scmp.ge.s32.totalorder %s8398_s20, 1  ;;  %s11065_s24 = smov (%p38_p4, %s11063_s24), 0 }
  0x12   : > { %10960 = sst [smem:[#allocation12_spill]] %s11065_s24  ;;  %p8521_p8 = por %p277_p6, %p276_p5 }
  0x13   : > { %p284_p9 = scmp.lt.s32.totalorder %s8398_s20, 5  ;;  %s255_s29 = ssub.s32 %s8394_s19, %s11065_s24 }
  0x14   : > { %s10961_s28 = scalar_select %p8521_p8, 1, 0 }
  0x15   : > { %s257_s30 = sor.u32 %s256_s26, %s255_s29  ;;  %p8528_p10 = pnand %p6761_p7, %p284_p9 }
  0x16   : > { %10962 = sst [smem:[#allocation13_spill]] %s10961_s28  ;;  %p258_p11 = scmp.eq.s32.totalorder %s257_s30, 0 }
  0x17   : > { %p8532_p12 = scmp.eq.s32.totalorder %s6759_s21, 0  ;;  %p8172_p13 = pneg %p8528_p10 }
  0x18   : > { %s10965_s4 = sld [smem:[#allocation28_spill]]  ;;  %s8400_s26 = smov [#allocation3]  }
  0x19   : > { %s8542_s28 = scalar_select %p258_p11, %s8378_s15, %s260_s25  }
  0x1a   : > { %s306_s29 = sshll.u32 %s8400_s26, 4  ;;  %p8173_p0 = pnand %p8532_p12, %p8172_p13  ;;  %s307_s29 = int_to_ptr.vmem [resolvable:$true] %s306_s29 }
  0x1b   : > { %s8401_s30 = smov 64   ;;  %s8402_s21 = smov 4  }
  0x1c   : > { %345 = sbr.rel (%p8528_p10) target bundleno = 1066 (0x42a), region = 60 }
  0x1e   : > { %s304_s18 = sshll.u32 %s10965_s4, 4  ;;  %s305_s18 = int_to_ptr.hbm [resolvable:$true] %s304_s18 }
  0x1f   : > { %8175 = dma.hbm_to_vmem [thread:$0]  (!%p8173_p0), %s305_s18, 9216, %s307_s29, [#allocation4], %s8401_s30, %s8401_s30, %s8402_s21  }
  0x21   : > { %8361 = dma.done.wait (%p8532_p12), [#allocation4], 9216  }
  0x22   : > { %8363 = vsyncadd (%p8532_p12), [#allocation4], 4294958080  ;;  %p384_p1 = scmp.lt.s32.totalorder %s8386_s17, 1  ;;  %v7959_v0 = vld [vmem:[%s10938_s1 + $0x78] sm:$0xff]  ;;  %v7958_v4 = vld [vmem:[%s10938_s1 + $0x70] sm:$0xff]  ;;  %s7933_s29 = smul.u32 96, %s8382_s16 }
  0x23   : > { %v7951_v1 = vld [vmem:[%s10938_s1 + $0x38] sm:$0xff]  ;;  %789 = vmatpush.bf16.msra.mxu0 %v7959_v0  ;;  %v7950_v5 = vld [vmem:[%s10938_s1 + $0x30] sm:$0xff]  ;;  %v7957_v8 = vld [vmem:[%s10938_s1 + $0x68] sm:$0xff]  ;;  %vm441_vm0 = vsmask.f32 3328  ;;  %vm1045_vm2 = vcmask 1042432  }
  0x24   : > { %s385_s23 = scalar_select %p384_p1, %s8386_s17, 1  ;;  %v7967_v2 = vld [vmem:[%s10938_s1 + $0xb8] sm:$0xff]  ;;  %956 = vmatpush.bf16.msra.mxu1 %v7951_v1  ;;  %v7966_v6 = vld [vmem:[%s10938_s1 + $0xb0] sm:$0xff]  ;;  %v7949_v9 = vld [vmem:[%s10938_s1 + $0x28] sm:$0xff]  ;;  %vm442_vm1 = vsmask.f32 7440 }
  0x25   : > { %v7985_v3 = vld [vmem:[%s10938_s1 + $0xf8] sm:$0xff]  ;;  %1223 = vmatpush.bf16.msra.mxu2 %v7967_v2  ;;  %v7984_v7 = vld [vmem:[%s10938_s1 + $0xf0] sm:$0xff]  ;;  %v7965_v10 = vld [vmem:[%s10938_s1 + $0xa8] sm:$0xff]  ;;  %vm1046_vm3 = vcmask 1046532   ;;  %v10966_v37 = vmov 0  ;;  %vm3383_vm6 = vcmask 1040384  }
  0x26   : > { %s8165_s30 = smul.u32 240, %s385_s23  ;;  %1451 = vmatpush.bf16.msra.mxu3 %v7985_v3  ;;  %v7983_v11 = vld [vmem:[%s10938_s1 + $0xe8] sm:$0xff]  ;;  %v7956_v12 = vld [vmem:[%s10938_s1 + $0x60] sm:$0xff]  ;;  %v7955_v23 = vld [vmem:[%s10938_s1 + $0x58] sm:$0xff]  ;;  %vm3384_vm7 = vsmask.f32 256 }
  0x27   : > { %790 = vmatpush.bf16.msra.mxu0 %v7958_v4  ;;  %v7948_v13 = vld [vmem:[%s10938_s1 + $0x20] sm:$0xff]  ;;  %v7947_v26 = vld [vmem:[%s10938_s1 + $0x18] sm:$0xff]  ;;  %v7954_v36 = vld [vmem:[%s10938_s1 + $0x50] sm:$0xff]  ;;  %vm3416_vm9 = vsmask.f32 7938  ;;  %s6768_s12 = sshll.u32 %s8382_s16, 3 }
  0x28   : > { %s388_s4 = scalar_lea.vmem %s10937_s0, %s8165_s30  ;;  %957 = vmatpush.bf16.msra.mxu1 %v7950_v5  ;;  %v7964_v14 = vld [vmem:[%s10938_s1 + $0xa0] sm:$0xff]  ;;  %v7963_v31 = vld [vmem:[%s10938_s1 + $0x98] sm:$0xff]  ;;  %vm8629_vm4 = vmor %vm441_vm0, %vm442_vm1  ;;  %s7461_s21 = sadd.s32 4294967295, %s6768_s12  ;;  %vm3670_vm14 = vcmask 1043456  }
  0x29   : > { %1224 = vmatpush.bf16.msra.mxu2 %v7966_v6  ;;  %s8594_s30 = scalar_lea.vmem %s388_s4, %s7933_s29  ;;  %v7982_v15 = vld [vmem:[%s10938_s1 + $0xe0] sm:$0xff]  ;;  %v7981_v32 = vld [vmem:[%s10938_s1 + $0xd8] sm:$0xff]  ;;  %v10967_v37 = vsel %vm8629_vm4, 4294967295, %v10966_v37  ;;  %v7946_v39 = vld [vmem:[%s10938_s1 + $0x10] sm:$0xff]  ;;  %s381_s23 = sand.u32 1, %s8374_s14  }
  0x2a   : > { %1452 = vmatpush.bf16.msra.mxu3 %v7984_v7  ;;  %v395_v16 = vld [vmem:[%s8594_s30] sm:$0xf]  ;;  %v396_v17 = vld [vmem:[%s8594_s30 + $0x4] sm:$0xf]  ;;  %v431_v18 = vld [vmem:[%s8594_s30 + $0x8] sm:$0x1] }
  0x2b   : > { %791 = vmatpush.bf16.msra.mxu0 %v7957_v8  ;;  %v445_v19 = vshrl.u32 %v395_v16, 16  ;;  %v448_v20 = vshll.u32 %v395_v16, 16  ;;  %v454_v21 = vshll.u32 %v396_v17, 16  ;;  %v458_v22 = vshrl.u32 %v396_v17, 16  ;;  %v1015_v30 = vld [vmem:[%s8594_s30] sm:$0xe]  ;;  %vm8636_vm5 = vmor %vm1045_vm2, %vm1046_vm3 }
  0x2c   : > { %958 = vmatpush.bf16.msra.mxu1 %v7949_v9  ;;  %v464_v29 = vshll.u32 %v431_v18, 16  ;;  %v1050_v34 = vrot.slane %v396_v17, 5  ;;  %10968 = vst [vmem:[#allocation14_spill] sm:$0xff] %v10967_v37  ;;  %v6891_v38 = vrot.slane %v1015_v30, 9  ;;  %v397_v44 = vld [vmem:[%s8594_s30 + $0xc] sm:$0xf]  ;;  %vm9502_vm8 = vmand %vm3383_vm6, %vm3384_vm7 }
  0x2d   : > { %1225 = vmatpush.bf16.msra.mxu2 %v7965_v10  ;;  %v447_v24 = vrot.slane %v445_v19, 4  ;;  %v450_v25 = vrot.slane %v448_v20, 5  ;;  %v456_v27 = vrot.slane %v454_v21, 5  ;;  %v460_v28 = vrot.slane %v458_v22, 4  ;;  %v7962_v45 = vld [vmem:[%s10938_s1 + $0x90] sm:$0xff]  ;;  %v7953_v53 = vld [vmem:[%s10938_s1 + $0x48] sm:$0xff]  ;;  %vm9513_vm10 = vmand %vm3383_vm6, %vm3416_vm9 }
  0x2e   : > { %1453 = vmatpush.bf16.msra.mxu3 %v7983_v11  ;;  %v466_v42 = vrot.slane %v464_v29, 5  ;;  %v7980_v46 = vld [vmem:[%s10938_s1 + $0xd0] sm:$0xff]  ;;  %v1052_v47 = vrot.slane %v1050_v34, 4  ;;  %v1053_v48 = vrot.slane %v431_v18, 5  ;;  %v1051_v50 = vsel %vm8636_vm5, %v6891_v38, %v1050_v34  ;;  %v7945_v54 = vld [vmem:[%s10938_s1 + $0x8] sm:$0xff]  ;;  %v7952_v2 = vld [vmem:[%s10938_s1 + $0x40] sm:$0xff] }
  0x2f   : > { %792 = vmatpush.bf16.msra.mxu0 %v7956_v12  ;;  %v451_v33 = vor.u32 %v450_v25, %v447_v24  ;;  %v461_v35 = vor.u32 %v460_v28, %v456_v27  ;;  %v8648_v49 = vld [vmem:[%s8594_s30 + $0x10] sm:$0xf]  ;;  %v469_v51 = vshrl.u32 %v397_v44, 16  ;;  %v472_v52 = vshll.u32 %v397_v44, 16  ;;  %v7961_v59 = vld [vmem:[%s10938_s1 + $0x88] sm:$0xff]  ;;  %v7944_v3 = vld [vmem:[%s10938_s1] sm:$0xff] }
  0x30   : > { %959 = vmatpush.bf16.msra.mxu1 %v7948_v13  ;;  %v478_v57 = vshll.u32 %v8648_v49, 16  ;;  %v482_v58 = vshrl.u32 %v8648_v49, 16  ;;  %v7979_v60 = vld [vmem:[%s10938_s1 + $0xc8] sm:$0xff]  ;;  %v1054_v61 = vsel %vm8636_vm5, %v1052_v47, %v1053_v48  ;;  %v1135_v0 = vunpack.c.l.b16 %v1051_v50  ;;  %v7960_v8 = vld [vmem:[%s10938_s1 + $0x80] sm:$0xff]  ;;  %v432_v10 = vld [vmem:[%s8594_s30 + $0x14] sm:$0x1] }
  0x31   : > { %1226 = vmatpush.bf16.msra.mxu2 %v7964_v14  ;;  %v452_v40 = vrot.slane %v451_v33, 4  ;;  %v462_v41 = vrot.slane %v461_v35, 4  ;;  %v471_v1 = vrot.slane %v469_v51, 4  ;;  %v1136_v4 = vunpack.c.l.b16 %v1054_v61  ;;  %v7978_v9 = vld [vmem:[%s10938_s1 + $0xc0] sm:$0xff]  ;;  %v7993_v11 = vld [vmem:[%s10938_s1 + $0x138] sm:$0xff]  ;;  %v7992_v21 = vld [vmem:[%s10938_s1 + $0x130] sm:$0xff] }
  0x32   : > { %1454 = vmatpush.bf16.msra.mxu3 %v7982_v15  ;;  %v474_v5 = vrot.slane %v472_v52, 5  ;;  %v480_v6 = vrot.slane %v478_v57, 5  ;;  %v484_v7 = vrot.slane %v482_v58, 4  ;;  %v7934_v13 = vld [vmem:[%s8594_s30] sm:$0xff]  ;;  %v7968_v15 = vld [vmem:[%s8594_s30 + $0xc] sm:$0xff]  ;;  %v488_v18 = vshll.u32 %v432_v10, 16  ;;  %vm9606_vm15 = vmand %vm3670_vm14, %vm3416_vm9 }
  0x33   : > { %793 = vmatpush.bf16.msra.mxu0 %v7955_v23  ;;  %v457_v55 = vsel %vm8629_vm4, %v452_v40, %v456_v27  ;;  %v467_v56 = vsel %vm8629_vm4, %v462_v41, %v466_v42  ;;  %v1155_v14 = vpack.c.b16 %v1136_v4, %v1135_v0  ;;  %v1016_v19 = vld [vmem:[%s8594_s30 + $0xc] sm:$0xe]  ;;  %v1057_v20 = vrot.slane %v8648_v49, 5  ;;  %v400_v29 = vld [vmem:[%s8594_s30 + $0x1c] sm:$0xf]  ;;  %v7990_v0 = vld [vmem:[%s10938_s1 + $0x120] sm:$0xff] }
  0x34   : > { %960 = vmatpush.bf16.msra.mxu1 %v7947_v26  ;;  %v701_v62 = vunpack.c.l.b16 %v457_v55  ;;  %v702_v63 = vunpack.c.l.b16 %v467_v56  ;;  %v475_v16 = vor.u32 %v474_v5, %v471_v1  ;;  %v485_v17 = vor.u32 %v484_v7, %v480_v6  ;;  %v399_v26 = vld [vmem:[%s8594_s30 + $0x18] sm:$0xf]  ;;  %v7991_v30 = vld [vmem:[%s10938_s1 + $0x128] sm:$0xff]  ;;  %v433_v49 = vld [vmem:[%s8594_s30 + $0x20] sm:$0x1]  ;;  %s6766_s11 = sshll.u32 %s381_s23, 7 }
  0x35   : > { %1227 = vmatpush.bf16.msra.mxu2 %v7963_v31  ;;  %v6892_v22 = vrot.slane %v1016_v19, 9  ;;  %v490_v25 = vrot.slane %v488_v18, 5  ;;  %v1059_v27 = vrot.slane %v1057_v20, 4  ;;  %v1060_v28 = vrot.slane %v432_v10, 5  ;;  %v7935_v51 = vld [vmem:[%s8594_s30 + $0xc] sm:$0xff]  ;;  %s10724_s12 = scalar_lea.vmem [#allocation6], %s6766_s11 }
  0x36   : > { %1455 = vmatpush.bf16.msra.mxu3 %v7981_v32  ;;  %v721_v12 = vpack.c.b16 %v702_v63, %v701_v62  ;;  %v476_v23 = vrot.slane %v475_v16, 4  ;;  %v486_v24 = vrot.slane %v485_v17, 4  ;;  %v493_v32 = vshrl.u32 %v399_v26, 16  ;;  %v1017_v58 = vld [vmem:[%s8594_s30 + $0x18] sm:$0xe]  ;;  %s6658_s22 = sshll.u32 %s10724_s12, 4  ;;  %s6659_s22 = int_to_ptr.vmem [resolvable:$true] %s6658_s22 }
  0x37   : > { %794 = vmatpush.bf16.msra.mxu0 %v7954_v36  ;;  %v1058_v31 = vsel %vm8636_vm5, %v6892_v22, %v1057_v20  ;;  %v496_v33 = vshll.u32 %v399_v26, 16  ;;  %v502_v36 = vshll.u32 %v400_v29, 16  ;;  %v506_v38 = vshrl.u32 %v400_v29, 16  ;;  %v402_v63 = vld [vmem:[%s8594_s30 + $0x28] sm:$0xf]  ;;  %s6643_s29 = scalar_lea.sflag [#allocation5], %s381_s23 }
  0x38   : > { %961 = vmatpush.bf16.msra.mxu1 %v7946_v39  ;;  %v481_v34 = vsel %vm8629_vm4, %v476_v23, %v480_v6  ;;  %v491_v35 = vsel %vm8629_vm4, %v486_v24, %v490_v25  ;;  %v1061_v39 = vsel %vm8636_vm5, %v1059_v27, %v1060_v28  ;;  %v1137_v42 = vunpack.c.l.b16 %v1058_v31  ;;  %v434_v16 = vld [vmem:[%s8594_s30 + $0x2c] sm:$0x1]  ;;  %v7936_v24 = vld [vmem:[%s8594_s30 + $0x18] sm:$0xff]  ;;  %v7970_v28 = vld [vmem:[%s8594_s30 + $0x24] sm:$0xff] }
  0x39   : > { %1228 = vmatpush.bf16.msra.mxu2 %v7962_v45  ;;  %v703_v40 = vunpack.c.l.b16 %v481_v34  ;;  %v704_v41 = vunpack.c.l.b16 %v491_v35  ;;  %v495_v44 = vrot.slane %v493_v32, 4  ;;  %v1138_v45 = vunpack.c.l.b16 %v1061_v39 }
  0x3a   : > { %1456 = vmatpush.bf16.msra.mxu3 %v7980_v46  ;;  %v498_v46 = vrot.slane %v496_v33, 5  ;;  %v504_v47 = vrot.slane %v502_v36, 5  ;;  %v508_v48 = vrot.slane %v506_v38, 4  ;;  %v512_v56 = vshll.u32 %v433_v49, 16  ;;  %v403_v36 = vld [vmem:[%s8594_s30 + $0x30] sm:$0xf] }
  0x3b   : > { %795 = vmatpush.bf16.msra.mxu0 %v7953_v53  ;;  %v722_v50 = vpack.c.b16 %v704_v41, %v703_v40  ;;  %v1156_v52 = vpack.c.b16 %v1138_v45, %v1137_v42  ;;  %v7969_v53 = vld [vmem:[%s8594_s30 + $0x18] sm:$0xff]  ;;  %v1064_v57 = vrot.slane %v400_v29, 5  ;;  %v6893_v1 = vrot.slane %v1017_v58, 9  ;;  %v1018_v29 = vld [vmem:[%s8594_s30 + $0x24] sm:$0xe] }
  0x3c   : > { %962 = vmatpush.bf16.msra.mxu1 %v7945_v54  ;;  %v499_v54 = vor.u32 %v498_v46, %v495_v44  ;;  %v509_v55 = vor.u32 %v508_v48, %v504_v47  ;;  %v514_v62 = vrot.slane %v512_v56, 5  ;;  %v526_v6 = vshll.u32 %v402_v63, 16  ;;  %v404_v38 = vld [vmem:[%s8594_s30 + $0x34] sm:$0xf]  ;;  %v435_v56 = vld [vmem:[%s8594_s30 + $0x38] sm:$0x1] }
  0x3d   : > { %1229 = vmatpush.bf16.msra.mxu2 %v7961_v59  ;;  %v401_v59 = vld [vmem:[%s8594_s30 + $0x24] sm:$0xf]  ;;  %v530_v7 = vshrl.u32 %v402_v63, 16  ;;  %v1065_v10 = vsel %vm8636_vm5, %v6893_v1, %v1064_v57  ;;  %v536_v22 = vshll.u32 %v434_v16, 16  ;;  %v1071_v26 = vrot.slane %v402_v63, 5 }
  0x3e   : > { %1457 = vmatpush.bf16.msra.mxu3 %v7979_v60  ;;  %v500_v60 = vrot.slane %v499_v54, 4  ;;  %v510_v61 = vrot.slane %v509_v55, 4  ;;  %v517_v4 = vshrl.u32 %v401_v59, 16  ;;  %v520_v5 = vshll.u32 %v401_v59, 16  ;;  %v7937_v58 = vld [vmem:[%s8594_s30 + $0x24] sm:$0xff] }
  0x3f   : > { %796 = vmatpush.bf16.msra.mxu0 %v7952_v2  ;;  %v1066_v2 = vrot.slane %v1064_v57, 4  ;;  %v528_v17 = vrot.slane %v526_v6, 5  ;;  %v532_v18 = vrot.slane %v530_v7, 4  ;;  %v1139_v19 = vunpack.c.l.b16 %v1065_v10  ;;  %v1019_v1 = vld [vmem:[%s8594_s30 + $0x30] sm:$0xe]  ;;  %v7989_v7 = vld [vmem:[%s10938_s1 + $0x118] sm:$0xff] }
  0x40   : > { %963 = vmatpush.bf16.msra.mxu1 %v7944_v3  ;;  %v1067_v3 = vrot.slane %v433_v49, 5  ;;  %v538_v31 = vrot.slane %v536_v22, 5  ;;  %v6894_v33 = vrot.slane %v1018_v29, 9  ;;  %v1073_v34 = vrot.slane %v1071_v26, 4  ;;  %v406_v6 = vld [vmem:[%s8594_s30 + $0x40] sm:$0xf] }
  0x41   : > { %1230 = vmatpush.bf16.msra.mxu2 %v7960_v8  ;;  %v505_v8 = vsel %vm8629_vm4, %v500_v60, %v504_v47  ;;  %v533_v25 = vor.u32 %v532_v18, %v528_v17  ;;  %v1074_v35 = vrot.slane %v434_v16, 5  ;;  %v541_v44 = vshrl.u32 %v403_v36, 16  ;;  %v7971_v60 = vld [vmem:[%s8594_s30 + $0x30] sm:$0xff] }
  0x42   : > { %1458 = vmatpush.bf16.msra.mxu3 %v7978_v9  ;;  %797 = vmatmul.bf16.vlgmr.msra.gmra.mxu0 %v721_v12  ;;  %v515_v9 = vsel %vm8629_vm4, %v510_v61, %v514_v62  ;;  %v519_v12 = vrot.slane %v517_v4, 4  ;;  %v1072_v41 = vsel %vm8636_vm5, %v6894_v33, %v1071_v26  ;;  %v544_v45 = vshll.u32 %v403_v36, 16  ;;  %v1020_v36 = vld [vmem:[%s8594_s30 + $0x3c] sm:$0xe] }
  0x43   : > { %1905 = vmatpush.bf16.msrb.mxu0 %v7993_v11  ;;  %964 = vmatmul.bf16.vlgmr.msra.gmra.mxu1 %v7934_v13  ;;  %v1068_v11 = vsel %vm8636_vm5, %v1066_v2, %v1067_v3  ;;  %v522_v13 = vrot.slane %v520_v5, 5  ;;  %v534_v32 = vrot.slane %v533_v25, 4  ;;  %v1075_v42 = vsel %vm8636_vm5, %v1073_v34, %v1074_v35  ;;  %v405_v2 = vld [vmem:[%s8594_s30 + $0x3c] sm:$0xf] }
  0x44   : > { %1231 = vmatmul.bf16.vlgmr.msra.gmra.mxu2 %v1155_v14  ;;  %v705_v14 = vunpack.c.l.b16 %v505_v8  ;;  %v1140_v20 = vunpack.c.l.b16 %v1068_v11  ;;  %v550_v46 = vshll.u32 %v404_v38, 16  ;;  %v554_v47 = vshrl.u32 %v404_v38, 16  ;;  %v7972_v35 = vld [vmem:[%s8594_s30 + $0x3c] sm:$0xff] }
  0x45   : > { %1459 = vmatmul.bf16.vlgmr.msra.gmra.mxu3 %v7968_v15  ;;  %v706_v15 = vunpack.c.l.b16 %v515_v9  ;;  %v539_v40 = vsel %vm8629_vm4, %v534_v32, %v538_v31  ;;  %v560_v63 = vshll.u32 %v435_v56, 16  ;;  %v6895_v8 = vrot.slane %v1019_v1, 9  ;;  %v7938_v31 = vld [vmem:[%s8594_s30 + $0x30] sm:$0xff] }
  0x46   : > { %v1157_v27 = vpack.c.b16 %v1140_v20, %v1139_v19  ;;  %v708_v49 = vunpack.c.l.b16 %v539_v40  ;;  %v552_v54 = vrot.slane %v550_v46, 5  ;;  %v556_v55 = vrot.slane %v554_v47, 4  ;;  %v407_v46 = vld [vmem:[%s8594_s30 + $0x48] sm:$0xf]  ;;  %v408_v47 = vld [vmem:[%s8594_s30 + $0x4c] sm:$0xf] }
  0x47   : > { %1906 = vmatpush.bf16.msrb.mxu0 %v7992_v21  ;;  %v523_v21 = vor.u32 %v522_v13, %v519_v12  ;;  %v723_v23 = vpack.c.b16 %v706_v15, %v705_v14  ;;  %v562_v5 = vrot.slane %v560_v63, 5  ;;  %v1081_v10 = vrot.slane %v435_v56, 5 }
  0x48   : > { %v557_v62 = vor.u32 %v556_v55, %v552_v54  ;;  %v565_v11 = vshrl.u32 %v405_v2, 16  ;;  %v568_v12 = vshll.u32 %v405_v2, 16  ;;  %v574_v13 = vshll.u32 %v406_v6, 16  ;;  %v7939_v2 = vld [vmem:[%s8594_s30 + $0x3c] sm:$0xff] }
  0x49   : > { %v578_v14 = vshrl.u32 %v406_v6, 16  ;;  %v1085_v33 = vrot.slane %v406_v6, 5  ;;  %v602_v55 = vshrl.u32 %v408_v47, 16  ;;  %vm3468_vm2 = vsmask.f32 4368 }
  0x4a   : > { %v558_v4 = vrot.slane %v557_v62, 4  ;;  %v567_v19 = vrot.slane %v565_v11, 4  ;;  %v570_v20 = vrot.slane %v568_v12, 5  ;;  %vm9657_vm6 = vmor %vm3384_vm7, %vm3468_vm2 }
  0x4b   : > { %1907 = vmatpush.bf16.msrb.mxu0 %v7991_v30  ;;  %v524_v30 = vrot.slane %v523_v21, 4  ;;  %v580_v25 = vrot.slane %v578_v14, 4  ;;  %v604_v63 = vrot.slane %v602_v55, 4  ;;  %v410_v14 = vld [vmem:[%s8594_s30 + $0x58] sm:$0xf] }
  0x4c   : > { %v563_v16 = vsel %vm8629_vm4, %v558_v4, %v562_v5  ;;  %v7973_v4 = vld [vmem:[%s8594_s30 + $0x48] sm:$0xff]  ;;  %v8799_v55 = vld [vmem:[%s8594_s30 + $0x64] sm:$0xf] }
  0x4d   : > { %v529_v39 = vsel %vm8629_vm4, %v524_v30, %v528_v17  ;;  %v710_v22 = vunpack.c.l.b16 %v563_v16 }
  0x4e   : > { %v707_v48 = vunpack.c.l.b16 %v529_v39 }
  0x4f   : > { %1908 = vmatpush.bf16.msrb.mxu0 %v7990_v0  ;;  %v1078_v0 = vrot.slane %v404_v38, 5 }
  0x50   : > { %v724_v57 = vpack.c.b16 %v708_v49, %v707_v48 }
  0x51   : > { %v1080_v9 = vrot.slane %v1078_v0, 4  ;;  %v1079_v17 = vsel %vm8636_vm5, %v6895_v8, %v1078_v0  ;;  %v437_v0 = vld [vmem:[%s8594_s30 + $0x50] sm:$0x1]  ;;  %v1092_v8 = vrot.slane %v408_v47, 5 }
  0x52   : > { %802 = vmatmul.bf16.gmra.mxu0 %v722_v50  ;;  %v1141_v50 = vunpack.c.l.b16 %v1072_v41  ;;  %v1143_v26 = vunpack.c.l.b16 %v1079_v17  ;;  %v6896_v41 = vrot.slane %v1020_v36, 9 }
  0x53   : > { %969 = vmatmul.bf16.gmra.mxu1 %v7935_v51  ;;  %v1142_v51 = vunpack.c.l.b16 %v1075_v42  ;;  %1909 = vmatpush.bf16.msrb.mxu0 %v7989_v7  ;;  %v1082_v18 = vsel %vm8636_vm5, %v1080_v9, %v1081_v10  ;;  %v1087_v42 = vrot.slane %v1085_v33, 4  ;;  %v608_v7 = vshll.u32 %v437_v0, 16  ;;  %v1021_v9 = vld [vmem:[%s8594_s30 + $0x48] sm:$0xe]  ;;  %v409_v10 = vld [vmem:[%s8594_s30 + $0x54] sm:$0xf] }
  0x54   : > { %1236 = vmatmul.bf16.gmra.mxu2 %v1156_v52  ;;  %v543_v52 = vrot.slane %v541_v44, 4  ;;  %v6897_v16 = vrot.slane %v1021_v9, 9  ;;  %v1094_v17 = vrot.slane %v1092_v8, 4 }
  0x55   : > { %1464 = vmatmul.bf16.gmra.mxu3 %v7969_v53  ;;  %v546_v53 = vrot.slane %v544_v45, 5  ;;  %v1158_v59 = vpack.c.b16 %v1142_v51, %v1141_v50  ;;  %v7988_v45 = vld [vmem:[%s10938_s1 + $0x110] sm:$0xff]  ;;  %v1086_v50 = vsel %vm8636_vm5, %v6896_v41, %v1085_v33 }
  0x57   : > { %v547_v61 = vor.u32 %v546_v53, %v543_v52  ;;  %1910 = vmatpush.bf16.msrb.mxu0 %v7988_v45  ;;  %v589_v52 = vshrl.u32 %v407_v46, 16  ;;  %v592_v53 = vshll.u32 %v407_v46, 16  ;;  %v7974_v45 = vld [vmem:[%s8594_s30 + $0x54] sm:$0xff] }
  0x58   : > { %v1022_v46 = vld [vmem:[%s8594_s30 + $0x54] sm:$0xe] }
  0x59   : > { %v548_v3 = vrot.slane %v547_v61, 4  ;;  %v594_v61 = vrot.slane %v592_v53, 5  ;;  %v8019_v53 = vld [vmem:[%s10938_s1 + $0x1b8] sm:$0xff] }
  0x5a   : > { %2427 = vmatpush.bf16.msrb.mxu2 %v8019_v53  ;;  %v8022_v53 = vld [vmem:[%s10938_s1 + $0x1d0] sm:$0xff] }
  0x5b   : > { %v553_v15 = vsel %vm8629_vm4, %v548_v3, %v552_v54  ;;  %v598_v54 = vshll.u32 %v408_v47, 16 }
  0x5c   : > { %v709_v21 = vunpack.c.l.b16 %v553_v15  ;;  %v7987_v15 = vld [vmem:[%s10938_s1 + $0x108] sm:$0xff] }
  0x5d   : > { %v600_v62 = vrot.slane %v598_v54, 5  ;;  %1911 = vmatpush.bf16.msrb.mxu0 %v7987_v15  ;;  %v411_v54 = vld [vmem:[%s8594_s30 + $0x60] sm:$0xf]  ;;  %v7999_v15 = vld [vmem:[%s10938_s1 + $0x168] sm:$0xff] }
  0x5e   : > { %v725_v30 = vpack.c.b16 %v710_v22, %v709_v21  ;;  %v622_v21 = vshll.u32 %v410_v14, 16  ;;  %v626_v22 = vshrl.u32 %v410_v14, 16 }
  0x5f   : > { %v605_v6 = vor.u32 %v604_v63, %v600_v62  ;;  %v637_v63 = vshrl.u32 %v411_v54, 16 }
  0x60   : > { %v628_v33 = vrot.slane %v626_v22, 4 }
  0x61   : > { %v606_v12 = vrot.slane %v605_v6, 4 }
  0x62   : > { %807 = vmatmul.bf16.gmra.mxu0 %v723_v23  ;;  %v436_v23 = vld [vmem:[%s8594_s30 + $0x44] sm:$0x1] }
  0x63   : > { %974 = vmatmul.bf16.gmra.mxu1 %v7936_v24  ;;  %v576_v24 = vrot.slane %v574_v13, 5  ;;  %v584_v29 = vshll.u32 %v436_v23, 16  ;;  %v1088_v44 = vrot.slane %v436_v23, 5  ;;  %v610_v13 = vrot.slane %v608_v7, 5 }
  0x64   : > { %1241 = vmatmul.bf16.gmra.mxu2 %v1157_v27  ;;  %v1144_v27 = vunpack.c.l.b16 %v1082_v18  ;;  %v1095_v18 = vrot.slane %v437_v0, 5  ;;  %v640_v0 = vshll.u32 %v411_v54, 16 }
  0x65   : > { %1469 = vmatmul.bf16.gmra.mxu3 %v7970_v28  ;;  %v571_v28 = vor.u32 %v570_v20, %v567_v19  ;;  %v581_v32 = vor.u32 %v580_v25, %v576_v24  ;;  %v586_v39 = vrot.slane %v584_v29, 5  ;;  %v1089_v51 = vsel %vm8636_vm5, %v1087_v42, %v1088_v44 }
  0x66   : > { %v1159_v34 = vpack.c.b16 %v1144_v27, %v1143_v26  ;;  %v613_v19 = vshrl.u32 %v409_v10, 16  ;;  %v616_v20 = vshll.u32 %v409_v10, 16  ;;  %v1093_v25 = vsel %vm8636_vm5, %v6897_v16, %v1092_v8  ;;  %v8025_v16 = vld [vmem:[%s10938_s1 + $0x1e8] sm:$0xff] }
  0x67   : > { %v572_v38 = vrot.slane %v571_v28, 4  ;;  %v582_v40 = vrot.slane %v581_v32, 4  ;;  %v1096_v26 = vsel %vm8636_vm5, %v1094_v17, %v1095_v18  ;;  %v624_v32 = vrot.slane %v622_v21, 5  ;;  %v7941_v18 = vld [vmem:[%s8594_s30 + $0x54] sm:$0xff]  ;;  %v7975_v21 = vld [vmem:[%s8594_s30 + $0x60] sm:$0xff] }
  0x68   : > { %v615_v27 = vrot.slane %v613_v19, 4  ;;  %v618_v28 = vrot.slane %v616_v20, 5  ;;  %v1099_v42 = vrot.slane %v410_v14, 5  ;;  %v639_v10 = vrot.slane %v637_v63, 4  ;;  %v439_v14 = vld [vmem:[%s8594_s30 + $0x68] sm:$0x1] }
  0x69   : > { %v577_v48 = vsel %vm8629_vm4, %v572_v38, %v576_v24  ;;  %v587_v49 = vsel %vm8629_vm4, %v582_v40, %v586_v39  ;;  %v611_v24 = vsel %vm8629_vm4, %v606_v12, %v610_v13  ;;  %v7940_v40 = vld [vmem:[%s8594_s30 + $0x48] sm:$0xff]  ;;  %v629_v41 = vor.u32 %v628_v33, %v624_v32  ;;  %v8016_v19 = vld [vmem:[%s10938_s1 + $0x1a0] sm:$0xff]  ;;  %v440_v63 = vld [vmem:[%s8594_s30 + $0x74] sm:$0x1] }
  0x6a   : > { %v711_v56 = vunpack.c.l.b16 %v577_v48  ;;  %v619_v36 = vor.u32 %v618_v28, %v615_v27  ;;  %v7998_v27 = vld [vmem:[%s10938_s1 + $0x160] sm:$0xff] }
  0x6b   : > { %v8024_v28 = vld [vmem:[%s10938_s1 + $0x1e0] sm:$0xff] }
  0x6c   : > { %v620_v47 = vrot.slane %v619_v36, 4 }
  0x72   : > { %812 = vmatmul.bf16.gmra.mxu0 %v724_v57  ;;  %v712_v57 = vunpack.c.l.b16 %v587_v49  ;;  %v630_v49 = vrot.slane %v629_v41, 4  ;;  %v8023_v41 = vld [vmem:[%s10938_s1 + $0x1d8] sm:$0xff] }
  0x73   : > { %979 = vmatmul.bf16.gmra.mxu1 %v7937_v58  ;;  %v1145_v58 = vunpack.c.l.b16 %v1086_v50  ;;  %v6898_v50 = vrot.slane %v1022_v46, 9 }
  0x74   : > { %1246 = vmatmul.bf16.gmra.mxu2 %v1158_v59  ;;  %v1146_v59 = vunpack.c.l.b16 %v1089_v51  ;;  %v726_v1 = vpack.c.b16 %v712_v57, %v711_v56  ;;  %v1101_v51 = vrot.slane %v1099_v42, 4  ;;  %v8001_v56 = vld [vmem:[%s10938_s1 + $0x178] sm:$0xff] }
  0x75   : > { %1474 = vmatmul.bf16.gmra.mxu3 %v7971_v60  ;;  %v591_v60 = vrot.slane %v589_v52, 4  ;;  %v8027_v57 = vld [vmem:[%s10938_s1 + $0x1f8] sm:$0xff]  ;;  %2199 = vmatpush.bf16.msrb.mxu1 %v8001_v56  ;;  %v8013_v56 = vld [vmem:[%s10938_s1 + $0x188] sm:$0xff] }
  0x76   : > { %v1160_v3 = vpack.c.b16 %v1146_v59, %v1145_v58  ;;  %v625_v58 = vsel %vm8629_vm4, %v620_v47, %v624_v32  ;;  %2881 = vmatpush.bf16.msrb.mxu3 %v8027_v57  ;;  %v8014_v47 = vld [vmem:[%s10938_s1 + $0x190] sm:$0xff] }
  0x77   : > { %v595_v5 = vor.u32 %v594_v61, %v591_v60  ;;  %v1100_v60 = vsel %vm8636_vm5, %v6898_v50, %v1099_v42  ;;  %v715_v6 = vunpack.c.l.b16 %v625_v58 }
  0x78   : > { %v1149_v8 = vunpack.c.l.b16 %v1100_v60 }
  0x79   : > { %v596_v11 = vrot.slane %v595_v5, 4  ;;  %v8017_v5 = vld [vmem:[%s10938_s1 + $0x1a8] sm:$0xff] }
  0x7b   : > { %v601_v23 = vsel %vm8629_vm4, %v596_v11, %v600_v62  ;;  %v8018_v62 = vld [vmem:[%s10938_s1 + $0x1b0] sm:$0xff]  ;;  %v642_v11 = vrot.slane %v640_v0, 5  ;;  %v7995_v0 = vld [vmem:[%s10938_s1 + $0x148] sm:$0xff] }
  0x7c   : > { %v713_v29 = vunpack.c.l.b16 %v601_v23  ;;  %2428 = vmatpush.bf16.msrb.mxu2 %v8018_v62 }
  0x7d   : > { %v643_v22 = vor.u32 %v642_v11, %v639_v10  ;;  %v7976_v11 = vld [vmem:[%s8594_s30 + $0x6c] sm:$0xff] }
  0x7f   : > { %v644_v32 = vrot.slane %v643_v22, 4 }
  0x80   : > { %2429 = vmatpush.bf16.msrb.mxu2 %v8017_v5 }
  0x82   : > { %817 = vmatmul.bf16.gmra.mxu0 %v725_v30  ;;  %v714_v30 = vunpack.c.l.b16 %v611_v24  ;;  %v656_v24 = vshll.u32 %v439_v14, 16 }
  0x83   : > { %984 = vmatmul.bf16.gmra.mxu1 %v7938_v31  ;;  %v438_v31 = vld [vmem:[%s8594_s30 + $0x5c] sm:$0x1] }
  0x84   : > { %1251 = vmatmul.bf16.gmra.mxu2 %v1159_v34  ;;  %v1147_v34 = vunpack.c.l.b16 %v1093_v25  ;;  %v632_v38 = vshll.u32 %v438_v31, 16  ;;  %v727_v39 = vpack.c.b16 %v714_v30, %v713_v29  ;;  %v1102_v52 = vrot.slane %v438_v31, 5  ;;  %v7986_v25 = vld [vmem:[%s10938_s1 + $0x100] sm:$0xff]  ;;  %v413_v30 = vld [vmem:[%s8594_s30 + $0x6c] sm:$0xf]  ;;  %v8015_v31 = vld [vmem:[%s10938_s1 + $0x198] sm:$0xff] }
  0x85   : > { %1479 = vmatmul.bf16.gmra.mxu3 %v7972_v35  ;;  %v1148_v35 = vunpack.c.l.b16 %v1096_v26  ;;  %v1106_v26 = vrot.slane %v8799_v55, 5  ;;  %2430 = vmatpush.bf16.msrb.mxu2 %v8016_v19  ;;  %v1023_v29 = vld [vmem:[%s8594_s30 + $0x60] sm:$0xe]  ;;  %v661_v42 = vshrl.u32 %v413_v30, 16 }
  0x86   : > { %v634_v48 = vrot.slane %v632_v38, 5  ;;  %v1103_v61 = vsel %vm8636_vm5, %v1101_v51, %v1102_v52  ;;  %1912 = vmatpush.bf16.msrb.mxu0 %v7986_v25  ;;  %v6899_v36 = vrot.slane %v1023_v29, 9  ;;  %v7996_v52 = vld [vmem:[%s10938_s1 + $0x150] sm:$0xff]  ;;  %v8035_v25 = vld [vmem:[%s10938_s1 + $0x238] sm:$0xff] }
  0x87   : > { %v1161_v44 = vpack.c.b16 %v1148_v35, %v1147_v34  ;;  %v1150_v9 = vunpack.c.l.b16 %v1103_v61  ;;  %v658_v34 = vrot.slane %v656_v24, 5  ;;  %v8857_v35 = vld [vmem:[%s8594_s30 + $0x70] sm:$0xf]  ;;  %v1108_v38 = vrot.slane %v1106_v26, 4 }
  0x88   : > { %v635_v59 = vsel %vm8629_vm4, %v630_v49, %v634_v48  ;;  %v674_v46 = vshrl.u32 %v8857_v35, 16  ;;  %v1107_v50 = vsel %vm8636_vm5, %v6899_v36, %v1106_v26  ;;  %v663_v54 = vrot.slane %v661_v42, 4 }
  0x89   : > { %v716_v7 = vunpack.c.l.b16 %v635_v59  ;;  %v1162_v20 = vpack.c.b16 %v1150_v9, %v1149_v8  ;;  %2431 = vmatpush.bf16.msrb.mxu2 %v8015_v31  ;;  %v1151_v61 = vunpack.c.l.b16 %v1107_v50  ;;  %v7316_v31 = vld [vmem:[%s8594_s30 + $0x1c] sm:$0xf] }
  0x8a   : > { %v676_v60 = vrot.slane %v674_v46, 4  ;;  %3175 = vmatpush.bf16.msra.mxu0 %v8035_v25 }
  0x8b   : > { %v728_v17 = vpack.c.b16 %v716_v7, %v715_v6  ;;  %v680_v6 = vshll.u32 %v440_v63, 16  ;;  %v8012_v7 = vld [vmem:[%s10938_s1 + $0x180] sm:$0xff] }
  0x8d   : > { %2432 = vmatpush.bf16.msrb.mxu2 %v8014_v47 }
  0x91   : > { %2433 = vmatpush.bf16.msrb.mxu2 %v8013_v56 }
  0x92   : > { %822 = vmatmul.bf16.gmra.mxu0 %v726_v1  ;;  %v646_v1 = vshll.u32 %v8799_v55, 16 }
  0x93   : > { %989 = vmatmul.bf16.gmra.mxu1 %v7939_v2  ;;  %v650_v2 = vshrl.u32 %v8799_v55, 16 }
  0x94   : > { %1256 = vmatmul.bf16.gmra.mxu2 %v1160_v3  ;;  %v8000_v3 = vld [vmem:[%s10938_s1 + $0x170] sm:$0xff]  ;;  %v648_v12 = vrot.slane %v646_v1, 5  ;;  %v8021_v1 = vld [vmem:[%s10938_s1 + $0x1c8] sm:$0xff] }
  0x95   : > { %1484 = vmatmul.bf16.gmra.mxu3 %v7973_v4  ;;  %v8026_v4 = vld [vmem:[%s10938_s1 + $0x1f0] sm:$0xff]  ;;  %2200 = vmatpush.bf16.msrb.mxu1 %v8000_v3  ;;  %v652_v13 = vrot.slane %v650_v2, 4 }
  0x96   : > { %2882 = vmatpush.bf16.msrb.mxu3 %v8026_v4  ;;  %v649_v48 = vsel %vm8629_vm4, %v644_v32, %v648_v12  ;;  %v7942_v4 = vld [vmem:[%s8594_s30 + $0x60] sm:$0xff]  ;;  %2434 = vmatpush.bf16.msrb.mxu2 %v8012_v7 }
  0x97   : > { %v653_v23 = vor.u32 %v652_v13, %v648_v12  ;;  %v717_v57 = vunpack.c.l.b16 %v649_v48  ;;  %v7059_v12 = vld [vmem:[%s8594_s30 + $0xc] sm:$0xf]  ;;  %v2546_v48 = vshll.u32 %v7316_v31, 16 }
  0x98   : > { %v1561_v22 = vshrl.u32 %v7059_v12, 16 }
  0x99   : > { %2201 = vmatpush.bf16.msrb.mxu1 %v7999_v15  ;;  %v654_v33 = vrot.slane %v653_v23, 4  ;;  %v1113_v15 = vrot.slane %v8857_v35, 5  ;;  %v1564_v23 = vshll.u32 %v7059_v12, 16  ;;  %v7977_v12 = vld [vmem:[%s8594_s30 + $0x78] sm:$0xff] }
  0x9a   : > { %2883 = vmatpush.bf16.msrb.mxu3 %v8025_v16  ;;  %v7994_v16 = vld [vmem:[%s10938_s1 + $0x140] sm:$0xff]  ;;  %v1563_v36 = vrot.slane %v1561_v22, 4 }
  0x9b   : > { %v659_v49 = vsel %vm8629_vm4, %v654_v33, %v658_v34  ;;  %v1115_v26 = vrot.slane %v1113_v15, 4 }
  0x9c   : > { %v718_v58 = vunpack.c.l.b16 %v659_v49  ;;  %v2550_v49 = vshrl.u32 %v7316_v31, 16  ;;  %v7319_v31 = vld [vmem:[%s8594_s30 + $0x28] sm:$0xf] }
  0x9d   : > { %2202 = vmatpush.bf16.msrb.mxu1 %v7998_v27  ;;  %v1116_v27 = vrot.slane %v440_v63, 5 }
  0x9e   : > { %2884 = vmatpush.bf16.msrb.mxu3 %v8024_v28  ;;  %v729_v3 = vpack.c.b16 %v718_v58, %v717_v57  ;;  %v7315_v28 = vld [vmem:[%s8594_s30 + $0x18] sm:$0xf] }
  0x9f   : > { %v1117_v47 = vsel %vm8636_vm5, %v1115_v26, %v1116_v27  ;;  %v7318_v27 = vld [vmem:[%s8594_s30 + $0x24] sm:$0xf] }
  0xa0   : > { %v1154_v58 = vunpack.c.l.b16 %v1117_v47  ;;  %v2574_v47 = vshrl.u32 %v7319_v31, 16 }
  0xa2   : > { %827 = vmatmul.bf16.gmra.mxu0 %v727_v39  ;;  %v1109_v39 = vrot.slane %v439_v14, 5  ;;  %2885 = vmatpush.bf16.msrb.mxu3 %v8023_v41  ;;  %v1024_v14 = vld [vmem:[%s8594_s30 + $0x6c] sm:$0xe] }
  0xa3   : > { %994 = vmatmul.bf16.gmra.mxu1 %v7940_v40  ;;  %v7997_v40 = vld [vmem:[%s10938_s1 + $0x158] sm:$0xff]  ;;  %v6900_v24 = vrot.slane %v1024_v14, 9 }
  0xa4   : > { %1261 = vmatmul.bf16.gmra.mxu2 %v1161_v44  ;;  %v664_v44 = vshll.u32 %v413_v30, 16  ;;  %v1110_v51 = vsel %vm8636_vm5, %v1108_v38, %v1109_v39  ;;  %2203 = vmatpush.bf16.msrb.mxu1 %v7997_v40  ;;  %v1566_v38 = vrot.slane %v1564_v23, 5  ;;  %v8945_v23 = vld [vmem:[%s8594_s30 + $0x1c] sm:$0xf] }
  0xa5   : > { %1489 = vmatmul.bf16.gmra.mxu3 %v7974_v45  ;;  %v670_v45 = vshll.u32 %v8857_v35, 16  ;;  %v1152_v62 = vunpack.c.l.b16 %v1110_v51  ;;  %v1114_v42 = vsel %vm8636_vm5, %v6900_v24, %v1113_v15 }
  0xa6   : > { %v666_v55 = vrot.slane %v664_v44, 5  ;;  %2886 = vmatpush.bf16.msrb.mxu3 %v8022_v53  ;;  %v2537_v44 = vshrl.u32 %v7315_v28, 16  ;;  %v1567_v56 = vor.u32 %v1566_v38, %v1563_v36  ;;  %v1153_v57 = vunpack.c.l.b16 %v1114_v42 }
  0xa7   : > { %v8887_v59 = vrot.slane %v670_v45, 5  ;;  %v1163_v10 = vpack.c.b16 %v1152_v62, %v1151_v61  ;;  %v2540_v45 = vshll.u32 %v7315_v28, 16  ;;  %v8933_v61 = vrot.slane %v2546_v48, 5 }
  0xa8   : > { %2204 = vmatpush.bf16.msrb.mxu1 %v7996_v52  ;;  %v667_v2 = vor.u32 %v666_v55, %v663_v54  ;;  %v7061_v55 = vld [vmem:[%s8594_s30 + $0x14] sm:$0x1]  ;;  %v2552_v62 = vrot.slane %v2550_v49, 4 }
  0xa9   : > { %v677_v5 = vor.u32 %v676_v60, %v8887_v59  ;;  %v2542_v60 = vrot.slane %v2540_v45, 5  ;;  %v2029_v26 = vrot.slane %v7061_v55, 5 }
  0xaa   : > { %2887 = vmatpush.bf16.msrb.mxu3 %v8021_v1  ;;  %v7317_v1 = vld [vmem:[%s8594_s30 + $0x20] sm:$0x1] }
  0xab   : > { %v678_v19 = vrot.slane %v677_v5, 4  ;;  %v7943_v5 = vld [vmem:[%s8594_s30 + $0x6c] sm:$0xff] }
  0xac   : > { %2205 = vmatpush.bf16.msrb.mxu1 %v7995_v0  ;;  %v1580_v0 = vshll.u32 %v7061_v55, 16  ;;  %v8034_v55 = vld [vmem:[%s10938_s1 + $0x230] sm:$0xff] }
  0xad   : > { %3176 = vmatpush.bf16.msra.mxu0 %v8034_v55 }
  0xae   : > { %v1582_v22 = vrot.slane %v1580_v0, 5 }
  0xb0   : > { %2206 = vmatpush.bf16.msrb.mxu1 %v7994_v16  ;;  %v2553_v16 = vor.u32 %v2552_v62, %v8933_v61 }
  0xb2   : > { %832 = vmatmul.bf16.gmra.mxu0 %v728_v17  ;;  %v8020_v17 = vld [vmem:[%s10938_s1 + $0x1c0] sm:$0xff] }
  0xb3   : > { %999 = vmatmul.bf16.gmra.mxu1 %v7941_v18  ;;  %v668_v18 = vrot.slane %v667_v2, 4  ;;  %2888 = vmatpush.bf16.msrb.mxu3 %v8020_v17  ;;  %v2556_v17 = vshll.u32 %v7317_v1, 16 }
  0xb4   : > { %1266 = vmatmul.bf16.gmra.mxu2 %v1162_v20  ;;  %v682_v20 = vrot.slane %v680_v6, 5  ;;  %v1568_v6 = vrot.slane %v1567_v56, 4 }
  0xb5   : > { %1494 = vmatmul.bf16.gmra.mxu3 %v7975_v21  ;;  %v8912_v21 = vld [vmem:[%s8594_s30 + $0x10] sm:$0xf]  ;;  %v673_v34 = vsel %vm8629_vm4, %v668_v18, %v8887_v59  ;;  %v2539_v59 = vrot.slane %v2537_v44, 4  ;;  %v7062_v18 = vld [vmem:[%s8594_s30 + $0x18] sm:$0xf] }
  0xb6   : > { %v1570_v29 = vshll.u32 %v8912_v21, 16  ;;  %v1574_v30 = vshrl.u32 %v8912_v21, 16  ;;  %v683_v35 = vsel %vm8629_vm4, %v678_v19, %v682_v20  ;;  %v719_v53 = vunpack.c.l.b16 %v673_v34 }
  0xb7   : > { %v720_v54 = vunpack.c.l.b16 %v683_v35  ;;  %v2026_v7 = vrot.slane %v8912_v21, 5  ;;  %v2543_v14 = vor.u32 %v2542_v60, %v2539_v59  ;;  %v1594_v34 = vshll.u32 %v8945_v23, 16 }
  0xb8   : > { %v1572_v51 = vrot.slane %v1570_v29, 5  ;;  %v1576_v52 = vrot.slane %v1574_v30, 4  ;;  %v1585_v29 = vshrl.u32 %v7062_v18, 16  ;;  %v1588_v30 = vshll.u32 %v7062_v18, 16  ;;  %v8002_v18 = vld [vmem:[%s8594_s30 + $0x18] sm:$0xff] }
  0xb9   : > { %v2028_v25 = vrot.slane %v2026_v7, 4  ;;  %v2544_v28 = vrot.slane %v2543_v14, 4  ;;  %v1598_v35 = vshrl.u32 %v8945_v23, 16  ;;  %v8968_v59 = vrot.slane %v1594_v34, 5 }
  0xba   : > { %v1577_v63 = vor.u32 %v1576_v52, %v1572_v51  ;;  %v1573_v21 = vsel %vm8629_vm4, %v1568_v6, %v1572_v51 }
  0xbb   : > { %v1817_v38 = vunpack.c.l.b16 %v1573_v21  ;;  %v2030_v45 = vsel %vm8636_vm5, %v2028_v25, %v2029_v26  ;;  %v2549_v52 = vsel %vm8629_vm4, %v2544_v28, %v8933_v61  ;;  %v1600_v60 = vrot.slane %v1598_v35, 4 }
  0xbc   : > { %v1578_v20 = vrot.slane %v1577_v63, 4  ;;  %v2793_v6 = vunpack.c.l.b16 %v2549_v52  ;;  %v7322_v52 = vld [vmem:[%s8594_s30 + $0x34] sm:$0xf] }
  0xbe   : > { %v1583_v36 = vsel %vm8629_vm4, %v1578_v20, %v1582_v22 }
  0xbf   : > { %v798_v8 = vpop.f32.mrf.mxu0  ;;  %v1818_v63 = vunpack.c.l.b16 %v1583_v36 }
  0xc0   : > { %v965_v9 = vpop.f32.mrf.mxu1 }
  0xc1   : > { %v966_v13 = vadd.f32 %v965_v9, %v798_v8 }
  0xc2   : > { %837 = vmatmul.bf16.gmra.mxu0 %v729_v3 }
  0xc3   : > { %1004 = vmatmul.bf16.gmra.mxu1 %v7942_v4  ;;  %v730_v4 = vpack.c.b16 %v720_v54, %v719_v53  ;;  %v1587_v53 = vrot.slane %v1585_v29, 4  ;;  %v1590_v54 = vrot.slane %v1588_v30, 5  ;;  %v7065_v29 = vld [vmem:[%s8594_s30 + $0x24] sm:$0xf] }
  0xc4   : > { %1271 = vmatmul.bf16.gmra.mxu2 %v1163_v10 }
  0xc5   : > { %1499 = vmatmul.bf16.gmra.mxu3 %v7976_v11  ;;  %v1164_v11 = vpack.c.b16 %v1154_v58, %v1153_v57  ;;  %v7064_v58 = vld [vmem:[%s8594_s30 + $0x20] sm:$0x1] }
  0xc6   : > { %v2036_v35 = vrot.slane %v7064_v58, 5 }
  0xc7   : > { %v1232_v32 = vpop.f32.mrf.mxu2  ;;  %v800_v40 = vpop.f32.mrf.mxu0 }
  0xc8   : > { %v1460_v33 = vpop.f32.mrf.mxu3  ;;  %v1282_v39 = vadd.f32 %v1232_v32, %v966_v13  ;;  %v967_v41 = vpop.f32.mrf.mxu1  ;;  %v7137_v13 = vld [vmem:[%s8594_s30 + $0xc] sm:$0xe]  ;;  %v2554_v32 = vrot.slane %v2553_v16, 4 }
  0xc9   : > { %v968_v46 = vadd.f32 %v967_v41, %v800_v40  ;;  %v7147_v24 = vrot.slane %v7137_v13, 9  ;;  %v2564_v40 = vshll.u32 %v7318_v27, 16 }
  0xca   : > { %v8930_v50 = vadd.f32 %v1460_v33, %v1282_v39  ;;  %v2558_v33 = vrot.slane %v2556_v17, 5  ;;  %v2561_v39 = vshrl.u32 %v7318_v27, 16  ;;  %v1837_v17 = vpack.c.b16 %v1818_v63, %v1817_v38 }
  0xcb   : > { %v2027_v44 = vsel %vm8636_vm5, %v7147_v24, %v2026_v7  ;;  %v2566_v0 = vrot.slane %v2564_v40, 5  ;;  %v1609_v40 = vshrl.u32 %v7065_v29, 16 }
  0xcc   : > { %v2559_v57 = vsel %vm8629_vm4, %v2554_v32, %v2558_v33  ;;  %v2563_v61 = vrot.slane %v2561_v39, 4  ;;  %v2111_v1 = vunpack.c.l.b16 %v2027_v44 }
  0xcd   : > { %v2794_v7 = vunpack.c.l.b16 %v2559_v57 }
  0xce   : > { %v2567_v13 = vor.u32 %v2566_v0, %v2563_v61  ;;  %v9007_v61 = vld [vmem:[%s8594_s30 + $0x2c] sm:$0x1] }
  0xcf   : > { %v1234_v2 = vpop.f32.mrf.mxu2  ;;  %v803_v9 = vpop.f32.mrf.mxu0  ;;  %v2813_v26 = vpack.c.b16 %v2794_v7, %v2793_v6  ;;  %v2598_v6 = vshrl.u32 %v7322_v52, 16 }
  0xd0   : > { %v1462_v3 = vpop.f32.mrf.mxu3  ;;  %v1283_v8 = vadd.f32 %v1234_v2, %v968_v46  ;;  %v970_v10 = vpop.f32.mrf.mxu1  ;;  %v2570_v46 = vshll.u32 %v7319_v31, 16  ;;  %v2112_v2 = vunpack.c.l.b16 %v2030_v45  ;;  %v2568_v36 = vrot.slane %v2567_v13, 4 }
  0xd1   : > { %v971_v15 = vadd.f32 %v970_v10, %v803_v9  ;;  %v1604_v9 = vshll.u32 %v7064_v58, 16  ;;  %v1601_v10 = vor.u32 %v1600_v60, %v8968_v59 }
  0xd2   : > { %v8942_v19 = vadd.f32 %v1462_v3, %v1283_v8  ;;  %842 = vmatmul.bf16.gmra.mxu0 %v730_v4  ;;  %v7320_v3 = vld [vmem:[%s8594_s30 + $0x2c] sm:$0x1]  ;;  %v8973_v4 = vrot.slane %v2570_v46, 5  ;;  %v1591_v8 = vor.u32 %v1590_v54, %v1587_v53  ;;  %v2131_v20 = vpack.c.b16 %v2112_v2, %v2111_v1  ;;  %v7321_v46 = vld [vmem:[%s8594_s30 + $0x30] sm:$0xf] }
  0xd3   : > { %1009 = vmatmul.bf16.gmra.mxu1 %v7943_v5  ;;  %v2576_v5 = vrot.slane %v2574_v47, 4  ;;  %v2580_v14 = vshll.u32 %v7320_v3, 16  ;;  %v1606_v28 = vrot.slane %v1604_v9, 5  ;;  %v1602_v31 = vrot.slane %v1601_v10, 4 }
  0xd4   : > { %1276 = vmatmul.bf16.gmra.mxu2 %v1164_v11  ;;  %v2033_v11 = vrot.slane %v8945_v23, 5  ;;  %v1592_v27 = vrot.slane %v1591_v8, 4  ;;  %v8982_v23 = vld [vmem:[%s8594_s30 + $0x28] sm:$0xf]  ;;  %v2585_v1 = vshrl.u32 %v7321_v46, 16  ;;  %v2588_v2 = vshll.u32 %v7321_v46, 16 }
  0xd5   : > { %1504 = vmatmul.bf16.gmra.mxu3 %v7977_v12  ;;  %v7138_v12 = vld [vmem:[%s8594_s30 + $0x18] sm:$0xe]  ;;  %v2577_v22 = vor.u32 %v2576_v5, %v8973_v4  ;;  %v2582_v38 = vrot.slane %v2580_v14, 5  ;;  %v1622_v44 = vshrl.u32 %v8982_v23, 16  ;;  %v1607_v47 = vsel %vm8629_vm4, %v1602_v31, %v1606_v28 }
  0xd6   : > { %v7148_v32 = vrot.slane %v7138_v12, 9  ;;  %v2035_v33 = vrot.slane %v2033_v11, 4  ;;  %v1597_v45 = vsel %vm8629_vm4, %v1592_v27, %v8968_v59  ;;  %v2594_v5 = vshll.u32 %v7322_v52, 16 }
  0xd7   : > { %v1237_v41 = vpop.f32.mrf.mxu2  ;;  %v805_v49 = vpop.f32.mrf.mxu0  ;;  %v2578_v39 = vrot.slane %v2577_v22, 4  ;;  %v1624_v0 = vrot.slane %v1622_v44, 4  ;;  %v1820_v8 = vunpack.c.l.b16 %v1607_v47  ;;  %v2043_v47 = vrot.slane %v9007_v61, 5 }
  0xd8   : > { %v1465_v42 = vpop.f32.mrf.mxu3  ;;  %v1284_v48 = vadd.f32 %v1237_v41, %v971_v15  ;;  %v972_v51 = vpop.f32.mrf.mxu1  ;;  %v1612_v41 = vshll.u32 %v7065_v29, 16  ;;  %v9017_v22 = vrot.slane %v2594_v5, 5 }
  0xd9   : > { %v973_v56 = vadd.f32 %v972_v51, %v805_v49  ;;  %v2037_v49 = vsel %vm8636_vm5, %v2035_v33, %v2036_v35  ;;  %v2573_v51 = vsel %vm8629_vm4, %v2568_v36, %v8973_v4  ;;  %v2583_v55 = vsel %vm8629_vm4, %v2578_v39, %v2582_v38  ;;  %v8003_v38 = vld [vmem:[%s8594_s30 + $0x24] sm:$0xff] }
  0xda   : > { %v8970_v62 = vadd.f32 %v1465_v42, %v1284_v48  ;;  %v1618_v42 = vshll.u32 %v8982_v23, 16  ;;  %v2034_v48 = vsel %vm8636_vm5, %v7148_v32, %v2033_v11  ;;  %v1614_v57 = vrot.slane %v1612_v41, 5  ;;  %v8033_v11 = vld [vmem:[%s10938_s1 + $0x228] sm:$0xff] }
  0xdb   : > { %v1819_v4 = vunpack.c.l.b16 %v1597_v45  ;;  %v2113_v9 = vunpack.c.l.b16 %v2034_v48  ;;  %v2114_v10 = vunpack.c.l.b16 %v2037_v49  ;;  %v2795_v12 = vunpack.c.l.b16 %v2573_v51  ;;  %3177 = vmatpush.bf16.msra.mxu0 %v8033_v11  ;;  %v7068_v48 = vld [vmem:[%s8594_s30 + $0x30] sm:$0xf]  ;;  %v9031_v51 = vld [vmem:[%s8594_s30 + $0x34] sm:$0xf] }
  0xdc   : > { %v9004_v58 = vrot.slane %v1618_v42, 5  ;;  %v2796_v13 = vunpack.c.l.b16 %v2583_v55  ;;  %v7324_v55 = vld [vmem:[%s8594_s30 + $0x3c] sm:$0xf] }
  0xdd   : > { %v2132_v29 = vpack.c.b16 %v2114_v10, %v2113_v9  ;;  %v2612_v5 = vshll.u32 %v7324_v55, 16 }
  0xdf   : > { %v1239_v15 = vpop.f32.mrf.mxu2  ;;  %v808_v24 = vpop.f32.mrf.mxu0 }
  0xe0   : > { %v1467_v16 = vpop.f32.mrf.mxu3  ;;  %v1285_v21 = vadd.f32 %v1239_v15, %v973_v56  ;;  %v975_v25 = vpop.f32.mrf.mxu1  ;;  %v1611_v56 = vrot.slane %v1609_v40, 4  ;;  %v1628_v15 = vshll.u32 %v9007_v61, 16 }
  0xe1   : > { %v976_v30 = vadd.f32 %v975_v25, %v808_v24  ;;  %v1838_v24 = vpack.c.b16 %v1820_v8, %v1819_v4  ;;  %v2040_v25 = vrot.slane %v8982_v23, 5  ;;  %v2609_v4 = vshrl.u32 %v7324_v55, 16  ;;  %v8032_v55 = vld [vmem:[%s10938_s1 + $0x220] sm:$0xff] }
  0xe2   : > { %v8984_v34 = vadd.f32 %v1467_v16, %v1285_v21  ;;  %1913 = vmatmul.bf16.vlgmr.msrb.gmra.mxu0 %v1837_v17  ;;  %v1615_v14 = vor.u32 %v1614_v57, %v1611_v56  ;;  %v1625_v16 = vor.u32 %v1624_v0, %v9004_v58  ;;  %v2587_v17 = vrot.slane %v2585_v1, 4  ;;  %v7325_v56 = vld [vmem:[%s8594_s30 + $0x40] sm:$0xf] }
  0xe3   : > { %2207 = vmatmul.bf16.vlgmr.msrb.gmra.mxu1 %v2131_v20  ;;  %v7139_v20 = vld [vmem:[%s8594_s30 + $0x24] sm:$0xe]  ;;  %v2600_v21 = vrot.slane %v2598_v6, 4  ;;  %v1630_v32 = vrot.slane %v1628_v15, 5  ;;  %v2042_v46 = vrot.slane %v2040_v25, 4  ;;  %v1642_v0 = vshll.u32 %v9031_v51, 16  ;;  %3178 = vmatpush.bf16.msra.mxu0 %v8032_v55 }
  0xe4   : > { %2435 = vmatmul.bf16.vlgmr.msrb.gmra.mxu2 %v8002_v18  ;;  %v2590_v18 = vrot.slane %v2588_v2, 5  ;;  %v1616_v31 = vrot.slane %v1615_v14, 4  ;;  %v1626_v39 = vrot.slane %v1625_v16, 4  ;;  %v7149_v40 = vrot.slane %v7139_v20, 9  ;;  %v7329_v55 = vld [vmem:[%s8594_s30 + $0x50] sm:$0x1] }
  0xe5   : > { %2889 = vmatmul.bf16.vlgmr.msrb.gmra.mxu3 %v2813_v26  ;;  %v7323_v26 = vld [vmem:[%s8594_s30 + $0x38] sm:$0x1]  ;;  %v2601_v23 = vor.u32 %v2600_v21, %v9017_v22  ;;  %v1646_v1 = vshrl.u32 %v9031_v51, 16  ;;  %v2618_v6 = vshll.u32 %v7325_v56, 16  ;;  %v2622_v8 = vshrl.u32 %v7325_v56, 16 }
  0xe6   : > { %v2591_v41 = vor.u32 %v2590_v18, %v2587_v17  ;;  %v2604_v44 = vshll.u32 %v7323_v26, 16  ;;  %v1621_v49 = vsel %vm8629_vm4, %v1616_v31, %v9004_v58  ;;  %v1631_v52 = vsel %vm8629_vm4, %v1626_v39, %v1630_v32  ;;  %v7326_v32 = vld [vmem:[%s8594_s30 + $0x44] sm:$0x1] }
  0xe7   : > { %v1242_v53 = vpop.f32.mrf.mxu2  ;;  %v810_v60 = vpop.f32.mrf.mxu0  ;;  %v2602_v57 = vrot.slane %v2601_v23, 4  ;;  %v1821_v61 = vunpack.c.l.b16 %v1621_v49  ;;  %v2044_v58 = vsel %vm8636_vm5, %v2042_v46, %v2043_v47  ;;  %v1648_v26 = vrot.slane %v1646_v1, 4  ;;  %v7140_v23 = vld [vmem:[%s8594_s30 + $0x30] sm:$0xe] }
  0xe8   : > { %v1470_v54 = vpop.f32.mrf.mxu3  ;;  %v1286_v59 = vadd.f32 %v1242_v53, %v976_v30  ;;  %v977_v63 = vpop.f32.mrf.mxu1  ;;  %v2814_v30 = vpack.c.b16 %v2796_v13, %v2795_v12  ;;  %v2041_v53 = vsel %vm8636_vm5, %v7149_v40, %v2040_v25  ;;  %v1822_v12 = vunpack.c.l.b16 %v1631_v52 }
  0xe9   : > { %v978_v3 = vadd.f32 %v977_v63, %v810_v60  ;;  %v1633_v60 = vshrl.u32 %v7068_v48, 16  ;;  %v1636_v63 = vshll.u32 %v7068_v48, 16  ;;  %v2115_v13 = vunpack.c.l.b16 %v2041_v53  ;;  %v8004_v53 = vld [vmem:[%s8594_s30 + $0x30] sm:$0xff] }
  0xea   : > { %v9009_v7 = vadd.f32 %v1470_v54, %v1286_v59  ;;  %v2592_v54 = vrot.slane %v2591_v41, 4  ;;  %v2606_v59 = vrot.slane %v2604_v44, 5  ;;  %v2116_v21 = vunpack.c.l.b16 %v2044_v58 }
  0xeb   : > { %v1635_v17 = vrot.slane %v1633_v60, 4  ;;  %v1638_v18 = vrot.slane %v1636_v63, 5  ;;  %v9051_v25 = vrot.slane %v1642_v0, 5  ;;  %v2047_v39 = vrot.slane %v9031_v51, 5 }
  0xec   : > { %v2597_v14 = vsel %vm8629_vm4, %v2592_v54, %v9017_v22  ;;  %v2607_v16 = vsel %vm8629_vm4, %v2602_v57, %v2606_v59  ;;  %v2624_v22 = vrot.slane %v2622_v8, 4  ;;  %v2628_v47 = vshll.u32 %v7326_v32, 16  ;;  %v7071_v59 = vld [vmem:[%s8594_s30 + $0x3c] sm:$0xf]  ;;  %v7327_v8 = vld [vmem:[%s8594_s30 + $0x48] sm:$0xf] }
  0xed   : > { %v2798_v31 = vunpack.c.l.b16 %v2607_v16  ;;  %v2049_v58 = vrot.slane %v2047_v39, 4 }
  0xef   : > { %v1244_v27 = vpop.f32.mrf.mxu2  ;;  %v813_v35 = vpop.f32.mrf.mxu0 }
  0xf0   : > { %v1472_v28 = vpop.f32.mrf.mxu3  ;;  %v1287_v33 = vadd.f32 %v1244_v27, %v978_v3  ;;  %v980_v36 = vpop.f32.mrf.mxu1  ;;  %v2611_v27 = vrot.slane %v2609_v4, 4  ;;  %v9068_v4 = vld [vmem:[%s8594_s30 + $0x40] sm:$0xf] }
  0xf1   : > { %v981_v42 = vadd.f32 %v980_v36, %v813_v35  ;;  %v1839_v36 = vpack.c.b16 %v1822_v12, %v1821_v61  ;;  %v7150_v61 = vrot.slane %v7140_v23, 9  ;;  %v1670_v12 = vshrl.u32 %v9068_v4, 16 }
  0xf2   : > { %v9023_v45 = vadd.f32 %v1472_v28, %v1287_v33  ;;  %1918 = vmatmul.bf16.gmra.mxu0 %v1838_v24  ;;  %v7070_v24 = vld [vmem:[%s8594_s30 + $0x38] sm:$0x1]  ;;  %v2614_v28 = vrot.slane %v2612_v5, 5  ;;  %v1639_v33 = vor.u32 %v1638_v18, %v1635_v17  ;;  %v1657_v5 = vshrl.u32 %v7071_v59, 16 }
  0xf3   : > { %2212 = vmatmul.bf16.gmra.mxu1 %v2132_v29  ;;  %v9053_v29 = vrot.slane %v2618_v6, 5  ;;  %v1652_v35 = vshll.u32 %v7070_v24, 16  ;;  %v2050_v0 = vrot.slane %v7070_v24, 5  ;;  %v1660_v6 = vshll.u32 %v7071_v59, 16 }
  0xf4   : > { %2440 = vmatmul.bf16.gmra.mxu2 %v8003_v38  ;;  %v1649_v38 = vor.u32 %v1648_v26, %v9051_v25  ;;  %v2615_v44 = vor.u32 %v2614_v28, %v2611_v27  ;;  %v1640_v56 = vrot.slane %v1639_v33, 4  ;;  %v2048_v16 = vsel %vm8636_vm5, %v7150_v61, %v2047_v39 }
  0xf5   : > { %2894 = vmatmul.bf16.gmra.mxu3 %v2814_v30  ;;  %v2797_v30 = vunpack.c.l.b16 %v2597_v14  ;;  %v2625_v46 = vor.u32 %v2624_v22, %v9053_v29  ;;  %v1654_v57 = vrot.slane %v1652_v35, 5  ;;  %v2051_v17 = vsel %vm8636_vm5, %v2049_v58, %v2050_v0 }
  0xf6   : > { %v1650_v63 = vrot.slane %v1649_v38, 4  ;;  %v2616_v1 = vrot.slane %v2615_v44, 4  ;;  %v1659_v27 = vrot.slane %v1657_v5, 4  ;;  %v2633_v28 = vshrl.u32 %v7327_v8, 16 }
  0xf7   : > { %v1247_v2 = vpop.f32.mrf.mxu2  ;;  %v815_v10 = vpop.f32.mrf.mxu0  ;;  %v2815_v54 = vpack.c.b16 %v2798_v31, %v2797_v30  ;;  %v2636_v22 = vshll.u32 %v7327_v8, 16  ;;  %v1662_v31 = vrot.slane %v1660_v6, 5  ;;  %v2054_v61 = vrot.slane %v9068_v4, 5  ;;  %v7074_v6 = vld [vmem:[%s8594_s30 + $0x48] sm:$0xf] }
  0xf8   : > { %v1475_v3 = vpop.f32.mrf.mxu3  ;;  %v1288_v9 = vadd.f32 %v1247_v2, %v981_v42  ;;  %v982_v11 = vpop.f32.mrf.mxu1  ;;  %v2133_v42 = vpack.c.b16 %v2116_v21, %v2115_v13  ;;  %v2626_v2 = vrot.slane %v2625_v46, 4  ;;  %v7328_v13 = vld [vmem:[%s8594_s30 + $0x4c] sm:$0xf]  ;;  %v2621_v18 = vsel %vm8629_vm4, %v2616_v1, %v9053_v29 }
  0xf9   : > { %v983_v15 = vadd.f32 %v982_v11, %v815_v10  ;;  %v1655_v10 = vsel %vm8629_vm4, %v1650_v63, %v1654_v57  ;;  %v1666_v11 = vshll.u32 %v9068_v4, 16  ;;  %v2642_v32 = vshll.u32 %v7328_v13, 16  ;;  %v7141_v63 = vld [vmem:[%s8594_s30 + $0x3c] sm:$0xe] }
  0xfa   : > { %v9048_v20 = vadd.f32 %v1475_v3, %v1288_v9  ;;  %v2630_v3 = vrot.slane %v2628_v47, 5  ;;  %v1645_v9 = vsel %vm8629_vm4, %v1640_v56, %v9051_v25  ;;  %v2646_v33 = vshrl.u32 %v7328_v13, 16 }
  0xfb   : > { %v1672_v29 = vrot.slane %v1670_v12, 4  ;;  %v1823_v38 = vunpack.c.l.b16 %v1645_v9  ;;  %v1824_v39 = vunpack.c.l.b16 %v1655_v10  ;;  %v2799_v23 = vunpack.c.l.b16 %v2621_v18 }
  0xfc   : > { %v2631_v21 = vsel %vm8629_vm4, %v2626_v2, %v2630_v3  ;;  %v2635_v46 = vrot.slane %v2633_v28, 4  ;;  %v2638_v47 = vrot.slane %v2636_v22, 5  ;;  %v8005_v2 = vld [vmem:[%s8594_s30 + $0x3c] sm:$0xff]  ;;  %v2056_v4 = vrot.slane %v2054_v61, 4  ;;  %v7330_v28 = vld [vmem:[%s8594_s30 + $0x54] sm:$0xf] }
  0xfd   : > { %v2800_v44 = vunpack.c.l.b16 %v2631_v21  ;;  %v1840_v57 = vpack.c.b16 %v1824_v39, %v1823_v38  ;;  %v1681_v18 = vshrl.u32 %v7074_v6, 16  ;;  %v1684_v21 = vshll.u32 %v7074_v6, 16 }
  0xfe   : > { %v2639_v5 = vor.u32 %v2638_v47, %v2635_v46  ;;  %v2657_v47 = vshrl.u32 %v7330_v28, 16 }
  0xff   : > { %v1249_v40 = vpop.f32.mrf.mxu2  ;;  %v818_v49 = vpop.f32.mrf.mxu0  ;;  %v2816_v3 = vpack.c.b16 %v2800_v44, %v2799_v23 }
 0x100   : > { %v1477_v41 = vpop.f32.mrf.mxu3  ;;  %v1289_v48 = vadd.f32 %v1249_v40, %v983_v15  ;;  %v985_v52 = vpop.f32.mrf.mxu1  ;;  %v2117_v40 = vunpack.c.l.b16 %v2048_v16 }
 0x101   : > { %v986_v51 = vadd.f32 %v985_v52, %v818_v49  ;;  %v9093_v49 = vrot.slane %v2642_v32, 5  ;;  %v2648_v52 = vrot.slane %v2646_v33, 4  ;;  %v9119_v33 = vld [vmem:[%s8594_s30 + $0x58] sm:$0xf] }
 0x102   : > { %v9065_v60 = vadd.f32 %v1477_v41, %v1289_v48  ;;  %1923 = vmatmul.bf16.gmra.mxu0 %v1839_v36  ;;  %v9090_v36 = vrot.slane %v1666_v11, 5  ;;  %v2118_v41 = vunpack.c.l.b16 %v2051_v17  ;;  %v1663_v48 = vor.u32 %v1662_v31, %v1659_v27  ;;  %v9105_v17 = vld [vmem:[%s8594_s30 + $0x4c] sm:$0xf] }
 0x103   : > { %2217 = vmatmul.bf16.gmra.mxu1 %v2133_v42  ;;  %v7073_v42 = vld [vmem:[%s8594_s30 + $0x44] sm:$0x1]  ;;  %v2649_v10 = vor.u32 %v2648_v52, %v9093_v49  ;;  %v2652_v11 = vshll.u32 %v7329_v55, 16  ;;  %v1690_v31 = vshll.u32 %v9105_v17, 16  ;;  %v1694_v32 = vshrl.u32 %v9105_v17, 16 }
 0x104   : > { %2445 = vmatmul.bf16.gmra.mxu2 %v8004_v53  ;;  %v1673_v53 = vor.u32 %v1672_v29, %v9090_v36  ;;  %v2134_v59 = vpack.c.b16 %v2118_v41, %v2117_v40  ;;  %v1664_v9 = vrot.slane %v1663_v48, 4  ;;  %v2057_v16 = vrot.slane %v7073_v42, 5 }
 0x105   : > { %2899 = vmatmul.bf16.gmra.mxu3 %v2815_v54  ;;  %v1676_v54 = vshll.u32 %v7073_v42, 16  ;;  %v2654_v27 = vrot.slane %v2652_v11, 5  ;;  %v1683_v41 = vrot.slane %v1681_v18, 4  ;;  %v2660_v48 = vshll.u32 %v7330_v28, 16  ;;  %v9138_v11 = vld [vmem:[%s8594_s30 + $0x5c] sm:$0x1] }
 0x106   : > { %v1674_v13 = vrot.slane %v1673_v53, 4  ;;  %v1669_v22 = vsel %vm8629_vm4, %v1664_v9, %v9090_v36  ;;  %v2058_v40 = vsel %vm8636_vm5, %v2056_v4, %v2057_v16  ;;  %v1686_v36 = vrot.slane %v1684_v21, 5  ;;  %v7142_v28 = vld [vmem:[%s8594_s30 + $0x48] sm:$0xe] }
 0x107   : > { %v1252_v14 = vpop.f32.mrf.mxu2  ;;  %v820_v25 = vpop.f32.mrf.mxu0  ;;  %v2670_v55 = vshrl.u32 %v9119_v33, 16  ;;  %v2061_v18 = vrot.slane %v9105_v17, 5  ;;  %v9149_v17 = vld [vmem:[%s8594_s30 + $0x58] sm:$0xf] }
 0x108   : > { %v1480_v15 = vpop.f32.mrf.mxu3  ;;  %v1290_v24 = vadd.f32 %v1252_v14, %v986_v51  ;;  %v987_v26 = vpop.f32.mrf.mxu1  ;;  %v1678_v14 = vrot.slane %v1676_v54, 5  ;;  %v2666_v54 = vshll.u32 %v9119_v33, 16 }
 0x109   : > { %v988_v30 = vadd.f32 %v987_v26, %v820_v25  ;;  %v8031_v25 = vld [vmem:[%s10938_s1 + $0x218] sm:$0xff]  ;;  %v2650_v26 = vrot.slane %v2649_v10, 4 }
 0x10a   : > { %v9088_v35 = vadd.f32 %v1480_v15, %v1290_v24  ;;  %v7151_v15 = vrot.slane %v7141_v63, 9  ;;  %v2640_v24 = vrot.slane %v2639_v5, 4  ;;  %3179 = vmatpush.bf16.msra.mxu0 %v8031_v25  ;;  %v2662_v5 = vrot.slane %v2660_v48, 5 }
 0x10b   : > { %v2655_v53 = vsel %vm8629_vm4, %v2650_v26, %v2654_v27  ;;  %v9135_v6 = vrot.slane %v2666_v54, 5  ;;  %v8006_v26 = vld [vmem:[%s8594_s30 + $0x48] sm:$0xff] }
 0x10c   : > { %v2055_v39 = vsel %vm8636_vm5, %v7151_v15, %v2054_v61  ;;  %v2645_v46 = vsel %vm8629_vm4, %v2640_v24, %v9093_v49  ;;  %v7076_v49 = vld [vmem:[%s8594_s30 + $0x50] sm:$0x1] }
 0x10d   : > { %v2119_v61 = vunpack.c.l.b16 %v2055_v39  ;;  %v1700_v10 = vshll.u32 %v7076_v49, 16 }
 0x10f   : > { %v1254_v51 = vpop.f32.mrf.mxu2  ;;  %v823_v0 = vpop.f32.mrf.mxu0 }
 0x110   : > { %v1482_v56 = vpop.f32.mrf.mxu3  ;;  %v1291_v58 = vadd.f32 %v1254_v51, %v988_v30  ;;  %v990_v1 = vpop.f32.mrf.mxu1  ;;  %v1679_v30 = vsel %vm8629_vm4, %v1674_v13, %v1678_v14 }
 0x111   : > { %v991_v8 = vadd.f32 %v990_v1, %v823_v0  ;;  %v1826_v63 = vunpack.c.l.b16 %v1679_v30  ;;  %v1687_v0 = vor.u32 %v1686_v36, %v1683_v41  ;;  %v2801_v1 = vunpack.c.l.b16 %v2645_v46 }
 0x112   : > { %v9102_v12 = vadd.f32 %v1482_v56, %v1291_v58  ;;  %1928 = vmatmul.bf16.gmra.mxu0 %v1840_v57  ;;  %v1825_v56 = vunpack.c.l.b16 %v1669_v22  ;;  %v1692_v57 = vrot.slane %v1690_v31, 5  ;;  %v2120_v58 = vunpack.c.l.b16 %v2058_v40 }
 0x113   : > { %2222 = vmatmul.bf16.gmra.mxu1 %v2134_v59  ;;  %v1696_v59 = vrot.slane %v1694_v32, 4  ;;  %v1688_v16 = vrot.slane %v1687_v0, 4  ;;  %v2676_v32 = vshll.u32 %v9138_v11, 16  ;;  %v1702_v40 = vrot.slane %v1700_v10, 5 }
 0x114   : > { %2450 = vmatmul.bf16.gmra.mxu2 %v8005_v2  ;;  %v2802_v2 = vunpack.c.l.b16 %v2655_v53  ;;  %v1841_v15 = vpack.c.b16 %v1826_v63, %v1825_v56  ;;  %v2135_v4 = vpack.c.b16 %v2120_v58, %v2119_v61  ;;  %v7152_v36 = vrot.slane %v7142_v28, 9 }
 0x115   : > { %2904 = vmatmul.bf16.gmra.mxu3 %v2816_v3  ;;  %v2659_v3 = vrot.slane %v2657_v47, 4  ;;  %v1697_v9 = vor.u32 %v1696_v59, %v1692_v57  ;;  %v1693_v41 = vsel %vm8629_vm4, %v1688_v16, %v1692_v57  ;;  %v2678_v54 = vrot.slane %v2676_v32, 5 }
 0x116   : > { %v2817_v27 = vpack.c.b16 %v2802_v2, %v2801_v1  ;;  %v1718_v56 = vshrl.u32 %v9149_v17, 16  ;;  %v1827_v59 = vunpack.c.l.b16 %v1693_v41  ;;  %v2062_v0 = vsel %vm8636_vm5, %v7152_v36, %v2061_v18 }
 0x117   : > { %v1257_v29 = vpop.f32.mrf.mxu2  ;;  %v825_v23 = vpop.f32.mrf.mxu0  ;;  %v2663_v22 = vor.u32 %v2662_v5, %v2659_v3  ;;  %v1698_v39 = vrot.slane %v1697_v9, 4  ;;  %v2121_v28 = vunpack.c.l.b16 %v2062_v0 }
 0x118   : > { %v1485_v38 = vpop.f32.mrf.mxu3  ;;  %v1292_v42 = vadd.f32 %v1257_v29, %v991_v8  ;;  %v992_v44 = vpop.f32.mrf.mxu1  ;;  %v2672_v8 = vrot.slane %v2670_v55, 4  ;;  %v7077_v29 = vld [vmem:[%s8594_s30 + $0x54] sm:$0xf]  ;;  %v1714_v55 = vshll.u32 %v9149_v17, 16 }
 0x119   : > { %v993_v52 = vadd.f32 %v992_v44, %v825_v23  ;;  %v2064_v23 = vrot.slane %v7076_v49, 5  ;;  %v7333_v44 = vld [vmem:[%s8594_s30 + $0x60] sm:$0xf]  ;;  %v2664_v46 = vrot.slane %v2663_v22, 4  ;;  %v1705_v47 = vshrl.u32 %v7077_v29, 16 }
 0x11a   : > { %v9132_v51 = vadd.f32 %v1485_v38, %v1292_v42  ;;  %v2673_v31 = vor.u32 %v2672_v8, %v9135_v6  ;;  %v2063_v42 = vrot.slane %v2061_v18, 4  ;;  %v1708_v48 = vshll.u32 %v7077_v29, 16  ;;  %v7079_v18 = vld [vmem:[%s8594_s30 + $0x5c] sm:$0x1] }
 0x11b   : > { %v1703_v57 = vsel %vm8629_vm4, %v1698_v39, %v1702_v40  ;;  %v2681_v63 = vshrl.u32 %v7333_v44, 16  ;;  %v2684_v61 = vshll.u32 %v7333_v44, 16  ;;  %v2669_v10 = vsel %vm8629_vm4, %v2664_v46, %v9135_v6 }
 0x11c   : > { %v2674_v53 = vrot.slane %v2673_v31, 4  ;;  %v2065_v1 = vsel %vm8636_vm5, %v2063_v42, %v2064_v23  ;;  %v2803_v29 = vunpack.c.l.b16 %v2669_v10  ;;  %v1724_v41 = vshll.u32 %v7079_v18, 16  ;;  %v7143_v23 = vld [vmem:[%s8594_s30 + $0x54] sm:$0xe] }
 0x11d   : > { %v2683_v6 = vrot.slane %v2681_v63, 4  ;;  %v2122_v22 = vunpack.c.l.b16 %v2065_v1  ;;  %v2068_v42 = vrot.slane %v9149_v17, 5  ;;  %v7080_v17 = vld [vmem:[%s8594_s30 + $0x60] sm:$0xf]  ;;  %v9193_v1 = vld [vmem:[%s8594_s30 + $0x64] sm:$0xf] }
 0x11e   : > { %v2679_v16 = vsel %vm8629_vm4, %v2674_v53, %v2678_v54  ;;  %v8007_v54 = vld [vmem:[%s8594_s30 + $0x54] sm:$0xff]  ;;  %v1726_v0 = vrot.slane %v1724_v41, 5 }
 0x11f   : > { %v1259_v13 = vpop.f32.mrf.mxu2  ;;  %v828_v24 = vpop.f32.mrf.mxu0  ;;  %v2804_v39 = vunpack.c.l.b16 %v2679_v16  ;;  %v1738_v16 = vshll.u32 %v9193_v1, 16 }
 0x120   : > { %v1487_v14 = vpop.f32.mrf.mxu3  ;;  %v1293_v21 = vadd.f32 %v1259_v13, %v993_v52  ;;  %v995_v25 = vpop.f32.mrf.mxu1  ;;  %v9155_v52 = vld [vmem:[%s8594_s30 + $0x64] sm:$0xf]  ;;  %v1707_v13 = vrot.slane %v1705_v47, 4 }
 0x121   : > { %v996_v30 = vadd.f32 %v995_v25, %v828_v24  ;;  %v2690_v2 = vshll.u32 %v9155_v52, 16  ;;  %v2694_v3 = vshrl.u32 %v9155_v52, 16  ;;  %v1720_v24 = vrot.slane %v1718_v56, 4 }
 0x122   : > { %v9146_v38 = vadd.f32 %v1487_v14, %v1293_v21  ;;  %1933 = vmatmul.bf16.gmra.mxu0 %v1841_v15  ;;  %v1710_v14 = vrot.slane %v1708_v48, 5  ;;  %v8030_v15 = vld [vmem:[%s10938_s1 + $0x210] sm:$0xff]  ;;  %v9176_v21 = vrot.slane %v1714_v55, 5  ;;  %v2136_v55 = vpack.c.b16 %v2122_v22, %v2121_v28 }
 0x123   : > { %2227 = vmatmul.bf16.gmra.mxu1 %v2135_v4  ;;  %3180 = vmatpush.bf16.msra.mxu0 %v8030_v15  ;;  %v9183_v31 = vrot.slane %v2690_v2, 5  ;;  %v2696_v32 = vrot.slane %v2694_v3, 4  ;;  %v1729_v15 = vshrl.u32 %v7080_v17, 16 }
 0x124   : > { %2455 = vmatmul.bf16.gmra.mxu2 %v8006_v26  ;;  %v1828_v26 = vunpack.c.l.b16 %v1703_v57  ;;  %v1711_v40 = vor.u32 %v1710_v14, %v1707_v13  ;;  %v1721_v36 = vor.u32 %v1720_v24, %v9176_v21  ;;  %v1742_v24 = vshrl.u32 %v9193_v1, 16 }
 0x125   : > { %2909 = vmatmul.bf16.gmra.mxu3 %v2817_v27  ;;  %v2686_v27 = vrot.slane %v2684_v61, 5  ;;  %v2697_v56 = vor.u32 %v2696_v32, %v9183_v31  ;;  %v9213_v32 = vld [vmem:[%s8594_s30 + $0x70] sm:$0xf] }
 0x126   : > { %v1842_v53 = vpack.c.b16 %v1828_v26, %v1827_v59  ;;  %v1722_v3 = vrot.slane %v1721_v36, 4  ;;  %v2071_v59 = vrot.slane %v7079_v18, 5  ;;  %v7336_v18 = vld [vmem:[%s8594_s30 + $0x6c] sm:$0xf]  ;;  %v9217_v36 = vrot.slane %v1738_v16, 5 }
 0x127   : > { %v1262_v58 = vpop.f32.mrf.mxu2  ;;  %v830_v8 = vpop.f32.mrf.mxu0  ;;  %v2687_v44 = vor.u32 %v2686_v27, %v2683_v6  ;;  %v2698_v14 = vrot.slane %v2697_v56, 4  ;;  %v2718_v56 = vshrl.u32 %v9213_v32, 16 }
 0x128   : > { %v1490_v49 = vpop.f32.mrf.mxu3  ;;  %v1294_v5 = vadd.f32 %v1262_v58, %v996_v30  ;;  %v997_v9 = vpop.f32.mrf.mxu1  ;;  %v9181_v30 = vld [vmem:[%s8594_s30 + $0x68] sm:$0x1]  ;;  %v2818_v58 = vpack.c.b16 %v2804_v39, %v2803_v29  ;;  %v1727_v6 = vsel %vm8629_vm4, %v1722_v3, %v1726_v0 }
 0x129   : > { %v998_v4 = vadd.f32 %v997_v9, %v830_v8  ;;  %v2700_v46 = vshll.u32 %v9181_v30, 16  ;;  %v2070_v8 = vrot.slane %v2068_v42, 4  ;;  %v2688_v10 = vrot.slane %v2687_v44, 4 }
 0x12a   : > { %v9178_v25 = vadd.f32 %v1490_v49, %v1294_v5  ;;  %v1712_v49 = vrot.slane %v1711_v40, 4  ;;  %v7153_v5 = vrot.slane %v7143_v23, 9  ;;  %v1731_v40 = vrot.slane %v1729_v15, 4  ;;  %v9234_v15 = vld [vmem:[%s8594_s30 + $0x74] sm:$0x1] }
 0x12b   : > { %v2702_v13 = vrot.slane %v2700_v46, 5  ;;  %v2072_v28 = vsel %vm8636_vm5, %v2070_v8, %v2071_v59  ;;  %v2693_v22 = vsel %vm8629_vm4, %v2688_v10, %v9183_v31  ;;  %v9220_v46 = vld [vmem:[%s8594_s30 + $0x68] sm:$0x1] }
 0x12c   : > { %v1717_v26 = vsel %vm8629_vm4, %v1712_v49, %v9176_v21  ;;  %v2069_v27 = vsel %vm8636_vm5, %v7153_v5, %v2068_v42  ;;  %v8029_v49 = vld [vmem:[%s10938_s1 + $0x208] sm:$0xff]  ;;  %v2805_v0 = vunpack.c.l.b16 %v2693_v22  ;;  %v1748_v3 = vshll.u32 %v9220_v46, 16 }
 0x12d   : > { %v2703_v21 = vsel %vm8629_vm4, %v2698_v14, %v2702_v13  ;;  %3181 = vmatpush.bf16.msra.mxu0 %v8029_v49  ;;  %v2720_v13 = vrot.slane %v2718_v56, 4  ;;  %v7339_v56 = vld [vmem:[%s8594_s30 + $0x78] sm:$0xf] }
 0x12f   : > { %v1264_v47 = vpop.f32.mrf.mxu2  ;;  %v833_v63 = vpop.f32.mrf.mxu0 }
 0x130   : > { %v1492_v48 = vpop.f32.mrf.mxu3  ;;  %v1295_v57 = vadd.f32 %v1264_v47, %v998_v4  ;;  %v1000_v61 = vpop.f32.mrf.mxu1  ;;  %v1732_v4 = vshll.u32 %v7080_v17, 16  ;;  %v1744_v47 = vrot.slane %v1742_v24, 4  ;;  %v2806_v17 = vunpack.c.l.b16 %v2703_v21 }
 0x131   : > { %v1001_v2 = vadd.f32 %v1000_v61, %v833_v63  ;;  %v1830_v63 = vunpack.c.l.b16 %v1727_v6  ;;  %v2123_v61 = vunpack.c.l.b16 %v2069_v27  ;;  %v1750_v6 = vrot.slane %v1748_v3, 5  ;;  %v7144_v27 = vld [vmem:[%s8594_s30 + $0x60] sm:$0xe] }
 0x132   : > { %v9195_v9 = vadd.f32 %v1492_v48, %v1295_v57  ;;  %1938 = vmatmul.bf16.gmra.mxu0 %v1842_v53  ;;  %v1734_v41 = vrot.slane %v1732_v4, 5  ;;  %v2705_v48 = vshrl.u32 %v7336_v18, 16  ;;  %v2708_v53 = vshll.u32 %v7336_v18, 16 }
 0x133   : > { %2232 = vmatmul.bf16.gmra.mxu1 %v2136_v55  ;;  %v2714_v55 = vshll.u32 %v9213_v32, 16  ;;  %v1745_v5 = vor.u32 %v1744_v47, %v9217_v36  ;;  %v2724_v47 = vshll.u32 %v9234_v15, 16 }
 0x134   : > { %2460 = vmatmul.bf16.gmra.mxu2 %v8007_v54  ;;  %v1829_v54 = vunpack.c.l.b16 %v1717_v26  ;;  %v2707_v8 = vrot.slane %v2705_v48, 4  ;;  %v2710_v59 = vrot.slane %v2708_v53, 5  ;;  %v2819_v26 = vpack.c.b16 %v2806_v17, %v2805_v0  ;;  %v9255_v0 = vld [vmem:[%s8594_s30 + $0x7c] sm:$0xf] }
 0x135   : > { %2914 = vmatmul.bf16.gmra.mxu3 %v2818_v58  ;;  %v2124_v58 = vunpack.c.l.b16 %v2072_v28  ;;  %v9231_v10 = vrot.slane %v2714_v55, 5  ;;  %v1746_v21 = vrot.slane %v1745_v5, 4  ;;  %v7154_v53 = vrot.slane %v7144_v27, 9 }
 0x136   : > { %v1843_v14 = vpack.c.b16 %v1830_v63, %v1829_v54  ;;  %v9245_v54 = vld [vmem:[%s8594_s30 + $0x70] sm:$0xf] }
 0x137   : > { %v1267_v29 = vpop.f32.mrf.mxu2  ;;  %v835_v42 = vpop.f32.mrf.mxu0  ;;  %v2137_v24 = vpack.c.b16 %v2124_v58, %v2123_v61  ;;  %v1751_v63 = vsel %vm8629_vm4, %v1746_v21, %v1750_v6  ;;  %v2078_v58 = vrot.slane %v9220_v46, 5  ;;  %v1762_v3 = vshll.u32 %v9245_v54, 16 }
 0x138   : > { %v1495_v39 = vpop.f32.mrf.mxu3  ;;  %v1296_v23 = vadd.f32 %v1267_v29, %v1001_v2  ;;  %v1002_v44 = vpop.f32.mrf.mxu1  ;;  %v1735_v2 = vor.u32 %v1734_v41, %v1731_v40  ;;  %v2075_v40 = vrot.slane %v9193_v1, 5  ;;  %v2711_v41 = vor.u32 %v2710_v59, %v2707_v8 }
 0x139   : > { %v1003_v31 = vadd.f32 %v1002_v44, %v835_v42  ;;  %v2721_v44 = vor.u32 %v2720_v13, %v9231_v10  ;;  %v2729_v8 = vshrl.u32 %v7339_v56, 16  ;;  %v2732_v59 = vshll.u32 %v7339_v56, 16 }
 0x13a   : > { %v9224_v57 = vadd.f32 %v1495_v39, %v1296_v23  ;;  %v1736_v18 = vrot.slane %v1735_v2, 4  ;;  %v8008_v39 = vld [vmem:[%s8594_s30 + $0x60] sm:$0xff]  ;;  %v7083_v23 = vld [vmem:[%s8594_s30 + $0x6c] sm:$0xf]  ;;  %v2077_v61 = vrot.slane %v2075_v40, 4  ;;  %v2712_v49 = vrot.slane %v2711_v41, 4 }
 0x13b   : > { %v1753_v1 = vshrl.u32 %v7083_v23, 16  ;;  %v1756_v55 = vshll.u32 %v7083_v23, 16  ;;  %v2722_v17 = vrot.slane %v2721_v44, 4  ;;  %v2726_v2 = vrot.slane %v2724_v47, 5 }
 0x13c   : > { %v2076_v5 = vsel %vm8636_vm5, %v7154_v53, %v2075_v40  ;;  %v2738_v46 = vshll.u32 %v9255_v0, 16  ;;  %v1764_v21 = vrot.slane %v1762_v3, 5  ;;  %v2731_v44 = vrot.slane %v2729_v8, 4 }
 0x13d   : > { %v2125_v23 = vunpack.c.l.b16 %v2076_v5  ;;  %v2734_v47 = vrot.slane %v2732_v59, 5  ;;  %v7145_v59 = vld [vmem:[%s8594_s30 + $0x6c] sm:$0xe] }
 0x13f   : > { %v1269_v4 = vpop.f32.mrf.mxu2  ;;  %v838_v22 = vpop.f32.mrf.mxu0 }
 0x140   : > { %v1497_v16 = vpop.f32.mrf.mxu3  ;;  %v1297_v28 = vadd.f32 %v1269_v4, %v1003_v31  ;;  %v1005_v29 = vpop.f32.mrf.mxu1  ;;  %v1741_v31 = vsel %vm8629_vm4, %v1736_v18, %v9217_v36  ;;  %v1766_v36 = vshrl.u32 %v9245_v54, 16  ;;  %v1755_v4 = vrot.slane %v1753_v1, 4 }
 0x141   : > { %v1006_v42 = vadd.f32 %v1005_v29, %v838_v22  ;;  %v1831_v27 = vunpack.c.l.b16 %v1741_v31  ;;  %v2079_v22 = vsel %vm8636_vm5, %v2077_v61, %v2078_v58  ;;  %v2717_v29 = vsel %vm8629_vm4, %v2712_v49, %v9231_v10  ;;  %v9280_v10 = vld [vmem:[%s8594_s30 + $0x80] sm:$0x1] }
 0x142   : > { %v9242_v48 = vadd.f32 %v1497_v16, %v1297_v28  ;;  %1943 = vmatmul.bf16.gmra.mxu0 %v1843_v14  ;;  %v1758_v16 = vrot.slane %v1756_v55, 5  ;;  %v1832_v28 = vunpack.c.l.b16 %v1751_v63  ;;  %v1768_v40 = vrot.slane %v1766_v36, 4 }
 0x143   : > { %2237 = vmatmul.bf16.gmra.mxu1 %v2137_v24  ;;  %v2742_v24 = vshrl.u32 %v9255_v0, 16  ;;  %v2126_v53 = vunpack.c.l.b16 %v2079_v22  ;;  %v9277_v1 = vrot.slane %v2738_v46, 5  ;;  %v2807_v56 = vunpack.c.l.b16 %v2717_v29  ;;  %v8009_v46 = vld [vmem:[%s8594_s30 + $0x6c] sm:$0xff] }
 0x144   : > { %2465 = vmatmul.bf16.gmra.mxu2 %v8008_v39  ;;  %v2727_v39 = vsel %vm8629_vm4, %v2722_v17, %v2726_v2  ;;  %v1759_v31 = vor.u32 %v1758_v16, %v1755_v4  ;;  %v1769_v61 = vor.u32 %v1768_v40, %v1764_v21  ;;  %v1844_v49 = vpack.c.b16 %v1832_v28, %v1831_v27 }
 0x145   : > { %2919 = vmatmul.bf16.gmra.mxu3 %v2819_v26  ;;  %v2744_v55 = vrot.slane %v2742_v24, 4  ;;  %v2808_v63 = vunpack.c.l.b16 %v2727_v39  ;;  %v2082_v17 = vrot.slane %v9245_v54, 5  ;;  %v2735_v2 = vor.u32 %v2734_v47, %v2731_v44  ;;  %v8028_v54 = vld [vmem:[%s10938_s1 + $0x200] sm:$0xff] }
 0x146   : > { %v2138_v5 = vpack.c.b16 %v2126_v53, %v2125_v23  ;;  %v1760_v8 = vrot.slane %v1759_v31, 4  ;;  %v1770_v27 = vrot.slane %v1769_v61, 4  ;;  %v7155_v22 = vrot.slane %v7145_v59, 9  ;;  %3182 = vmatpush.bf16.msra.mxu0 %v8028_v54  ;;  %v7086_v53 = vld [vmem:[%s8594_s30 + $0x78] sm:$0xf] }
 0x147   : > { %v1272_v13 = vpop.f32.mrf.mxu2  ;;  %v9263_v18 = vpop.f32.mrf.mxu0  ;;  %v2820_v24 = vpack.c.b16 %v2808_v63, %v2807_v56  ;;  %v2084_v29 = vrot.slane %v2082_v17, 4  ;;  %v2736_v40 = vrot.slane %v2735_v2, 4  ;;  %v9298_v31 = vld [vmem:[%s8594_s30 + $0x7c] sm:$0xf]  ;;  %v8259_v63 = vld [vmem:[%s8594_s30 + $0x20] sm:$0x1] }
 0x148   : > { %v1500_v14 = vpop.f32.mrf.mxu3  ;;  %v1298_v26 = vadd.f32 %v1272_v13, %v1006_v42  ;;  %10971 = vst [vmem:[#allocation15_spill] sm:$0xff] %v9263_v18  ;;  %v9265_v6 = vpop.f32.mrf.mxu1  ;;  %v7085_v42 = vld [vmem:[%s8594_s30 + $0x74] sm:$0x1]  ;;  %v2745_v13 = vor.u32 %v2744_v55, %v9277_v1  ;;  %v1765_v23 = vsel %vm8629_vm4, %v1760_v8, %v1764_v21  ;;  %v8258_v55 = vld [vmem:[%s8594_s30 + $0x1c] sm:$0xf]  ;;  %v2083_v21 = vsel %vm8636_vm5, %v7155_v22, %v2082_v17 }
 0x149   : > { %10972 = vst [vmem:[#allocation16_spill] sm:$0xff] %v9265_v6  ;;  %v1772_v58 = vshll.u32 %v7085_v42, 16  ;;  %v2085_v39 = vrot.slane %v7085_v42, 5  ;;  %v3002_v56 = vrot.slane %v8258_v55, 5  ;;  %v3005_v42 = vrot.slane %v8259_v63, 5 }
 0x14a   : > { %v9274_v41 = vadd.f32 %v1500_v14, %v1298_v26  ;;  %v2748_v14 = vshll.u32 %v9280_v10, 16  ;;  %v2746_v44 = vrot.slane %v2745_v13, 4  ;;  %v9313_v8 = vld [vmem:[%s8594_s30 + $0x88] sm:$0xf] }
 0x14b   : > { %v1774_v28 = vrot.slane %v1772_v58, 5  ;;  %v7342_v58 = vld [vmem:[%s8594_s30 + $0x84] sm:$0xf]  ;;  %v2086_v2 = vsel %vm8636_vm5, %v2084_v29, %v2085_v39  ;;  %v2762_v29 = vshll.u32 %v9313_v8, 16  ;;  %v2766_v39 = vshrl.u32 %v9313_v8, 16 }
 0x14c   : > { %v2750_v47 = vrot.slane %v2748_v14, 5  ;;  %v2756_v22 = vshll.u32 %v7342_v58, 16 }
 0x14d   : > { %v1775_v61 = vsel %vm8629_vm4, %v1770_v27, %v1774_v28  ;;  %v1790_v27 = vshrl.u32 %v9298_v31, 16  ;;  %v2753_v28 = vshrl.u32 %v7342_v58, 16 }
 0x14e   : > { %v2751_v14 = vsel %vm8629_vm4, %v2746_v44, %v2750_v47  ;;  %v1834_v54 = vunpack.c.l.b16 %v1775_v61  ;;  %v7088_v61 = vld [vmem:[%s8594_s30 + $0x80] sm:$0x1]  ;;  %v2758_v58 = vrot.slane %v2756_v22, 5  ;;  %v2089_v22 = vrot.slane %v9298_v31, 5 }
 0x14f   : > { %v9283_v3 = vpop.f32.mrf.mxu2  ;;  %v843_v4 = vpop.f32.mrf.mxu0  ;;  %v2810_v47 = vunpack.c.l.b16 %v2751_v14  ;;  %v1796_v18 = vshll.u32 %v7088_v61, 16 }
 0x150   : > { %10973 = vst [vmem:[#allocation17_spill] sm:$0xff] %v9283_v3  ;;  %v9285_v36 = vpop.f32.mrf.mxu3  ;;  %v1010_v16 = vpop.f32.mrf.mxu1  ;;  %v2764_v3 = vrot.slane %v2762_v29, 5 }
 0x151   : > { %10974 = vst [vmem:[#allocation18_spill] sm:$0xff] %v9285_v36  ;;  %v1011_v26 = vadd.f32 %v1010_v16, %v843_v4  ;;  %v1777_v4 = vshrl.u32 %v7086_v53, 16  ;;  %v1780_v16 = vshll.u32 %v7086_v53, 16  ;;  %v2755_v36 = vrot.slane %v2753_v28, 4 }
 0x152   : > { %1948 = vmatmul.bf16.gmra.mxu0 %v1844_v49  ;;  %v1833_v49 = vunpack.c.l.b16 %v1765_v23  ;;  %v2128_v23 = vunpack.c.l.b16 %v2086_v2 }
 0x153   : > { %2242 = vmatmul.bf16.gmra.mxu1 %v2138_v5  ;;  %v2741_v5 = vsel %vm8629_vm4, %v2736_v40, %v9277_v1  ;;  %v2127_v1 = vunpack.c.l.b16 %v2083_v21  ;;  %v1779_v53 = vrot.slane %v1777_v4, 4  ;;  %v1782_v55 = vrot.slane %v1780_v16, 5  ;;  %v7393_v21 = vld [vmem:[%s8594_s30 + $0x18] sm:$0xe] }
 0x154   : > { %2470 = vmatmul.bf16.gmra.mxu2 %v8009_v46  ;;  %v1786_v46 = vshll.u32 %v9298_v31, 16  ;;  %v2809_v44 = vunpack.c.l.b16 %v2741_v5  ;;  %v7403_v6 = vrot.slane %v7393_v21, 9  ;;  %v9328_v5 = vld [vmem:[%s8594_s30 + $0x8c] sm:$0x1]  ;;  %v2091_v31 = vrot.slane %v2089_v22, 4 }
 0x155   : > { %2924 = vmatmul.bf16.gmra.mxu3 %v2820_v24  ;;  %v1783_v14 = vor.u32 %v1782_v55, %v1779_v53  ;;  %v2092_v53 = vrot.slane %v7088_v61, 5 }
 0x156   : > { %v1788_v63 = vrot.slane %v1786_v46, 5  ;;  %v2821_v2 = vpack.c.b16 %v2810_v47, %v2809_v44  ;;  %v3003_v4 = vsel %vm8636_vm5, %v7403_v6, %v3002_v56  ;;  %v2772_v44 = vshll.u32 %v9328_v5, 16 }
 0x157   : > { %v1277_v59 = vpop.f32.mrf.mxu2  ;;  %v9318_v17 = vpop.f32.mrf.mxu0  ;;  %v3087_v29 = vunpack.c.l.b16 %v3003_v4  ;;  %v1784_v6 = vrot.slane %v1783_v14, 4 }
 0x158   : > { %v1505_v13 = vpop.f32.mrf.mxu3  ;;  %v1300_v24 = vadd.f32 %v1277_v59, %v1011_v26  ;;  %10975 = vst [vmem:[#allocation19_spill] sm:$0xff] %v9318_v17  ;;  %v3004_v26 = vrot.slane %v3002_v56, 4  ;;  %v1792_v59 = vrot.slane %v1790_v27, 4  ;;  %v2768_v17 = vrot.slane %v2766_v39, 4  ;;  %v8010_v27 = vld [vmem:[%s8594_s30 + $0x78] sm:$0xff] }
 0x159   : > { %v1798_v56 = vrot.slane %v1796_v18, 5  ;;  %v2093_v18 = vsel %vm8636_vm5, %v2091_v31, %v2092_v53  ;;  %v8050_v31 = vld [vmem:[#allocation3 + $0x30] sm:$0xff] }
 0x15a   : > { %v9323_v40 = vadd.f32 %v1505_v13, %v1300_v24  ;;  %v1845_v13 = vpack.c.b16 %v1834_v54, %v1833_v49  ;;  %v2139_v24 = vpack.c.b16 %v2128_v23, %v2127_v1  ;;  %v3006_v16 = vsel %vm8636_vm5, %v3004_v26, %v3005_v42  ;;  %v7146_v54 = vld [vmem:[%s8594_s30 + $0x78] sm:$0xe]  ;;  %v8066_v53 = vld [vmem:[#allocation3 + $0xb0] sm:$0xff] }
 0x15b   : > { %v1793_v28 = vor.u32 %v1792_v59, %v1788_v63  ;;  %v3088_v39 = vunpack.c.l.b16 %v3006_v16  ;;  %v2759_v1 = vor.u32 %v2758_v58, %v2755_v36  ;;  %v2769_v23 = vor.u32 %v2768_v17, %v2764_v3  ;;  %v8051_v16 = vld [vmem:[#allocation3 + $0x38] sm:$0xff] }
 0x15c   : > { %v7156_v26 = vrot.slane %v7146_v54, 9  ;;  %v1789_v36 = vsel %vm8629_vm4, %v1784_v6, %v1788_v63  ;;  %v2130_v4 = vunpack.c.l.b16 %v2093_v18  ;;  %4216 = vmatpush.bf16.msra.mxu2 %v8051_v16  ;;  %v8067_v54 = vld [vmem:[#allocation3 + $0xb8] sm:$0xff]  ;;  %v8049_v16 = vld [vmem:[#allocation3 + $0x28] sm:$0xff] }
 0x15d   : > { %v3107_v47 = vpack.c.b16 %v3088_v39, %v3087_v29  ;;  %v1794_v42 = vrot.slane %v1793_v28, 4  ;;  %v2760_v55 = vrot.slane %v2759_v1, 4  ;;  %v2770_v59 = vrot.slane %v2769_v23, 4  ;;  %4442 = vmatpush.bf16.msra.mxu3 %v8067_v54  ;;  %v8059_v1 = vld [vmem:[#allocation3 + $0x78] sm:$0xff]  ;;  %v8057_v54 = vld [vmem:[#allocation3 + $0x68] sm:$0xff] }
 0x15e   : > { %v2090_v58 = vsel %vm8636_vm5, %v7156_v26, %v2089_v22  ;;  %v1835_v63 = vunpack.c.l.b16 %v1789_v36  ;;  %4071 = vmatpush.bf16.msra.mxu1 %v8059_v1  ;;  %v9389_v1 = vpop.f32.mrf.mxu1 }
 0x15f   : > { %v1914_v46 = vpop.f32.mrf.mxu0  ;;  %v1799_v17 = vsel %vm8629_vm4, %v1794_v42, %v1798_v56  ;;  %v2765_v61 = vsel %vm8629_vm4, %v2760_v55, %v2764_v3  ;;  %v2129_v14 = vunpack.c.l.b16 %v2090_v58  ;;  %v8260_v56 = vld [vmem:[%s8594_s30 + $0x28] sm:$0xf] }
 0x160   : > { %v9337_v49 = vadd.f32 %v1914_v46, %v8930_v50  ;;  %v2774_v50 = vrot.slane %v2772_v44, 5  ;;  %v2811_v46 = vunpack.c.l.b16 %v2765_v61  ;;  %v3009_v42 = vrot.slane %v8260_v56, 5  ;;  %v8058_v55 = vld [vmem:[#allocation3 + $0x70] sm:$0xff]  ;;  %4217 = vmatpush.bf16.msra.mxu2 %v8050_v31  ;;  %v9391_v56 = vpop.f32.mrf.mxu2  ;;  %v8264_v31 = vld [vmem:[%s8594_s30 + $0x40] sm:$0xf] }
 0x161   : > { %v2140_v22 = vpack.c.b16 %v2130_v4, %v2129_v14  ;;  %4443 = vmatpush.bf16.msra.mxu3 %v8066_v53  ;;  %v7395_v4 = vld [vmem:[%s8594_s30 + $0x30] sm:$0xe]  ;;  %v3023_v53 = vrot.slane %v8264_v31, 5 }
 0x162   : > { %1953 = vmatmul.bf16.gmra.mxu0 %v1845_v13  ;;  %4072 = vmatpush.bf16.msra.mxu1 %v8058_v55 }
 0x163   : > { %2247 = vmatmul.bf16.gmra.mxu1 %v2139_v24  ;;  %v2775_v24 = vsel %vm8629_vm4, %v2770_v59, %v2774_v50  ;;  %v3011_v50 = vrot.slane %v3009_v42, 4 }
 0x164   : > { %2475 = vmatmul.bf16.gmra.mxu2 %v8010_v27  ;;  %v2812_v27 = vunpack.c.l.b16 %v2775_v24 }
 0x165   : > { %2929 = vmatmul.bf16.gmra.mxu3 %v2821_v2  ;;  %v1836_v2 = vunpack.c.l.b16 %v1799_v17  ;;  %4218 = vmatpush.bf16.msra.mxu2 %v8049_v16  ;;  %v8056_v16 = vld [vmem:[#allocation3 + $0x60] sm:$0xff] }
 0x166   : > { %v2822_v39 = vpack.c.b16 %v2812_v27, %v2811_v46  ;;  %v7405_v46 = vrot.slane %v7395_v4, 9  ;;  %4073 = vmatpush.bf16.msra.mxu1 %v8057_v54  ;;  %v8064_v4 = vld [vmem:[#allocation3 + $0xa0] sm:$0xff] }
 0x167   : > { %v1916_v21 = vpop.f32.mrf.mxu0  ;;  %v1846_v28 = vpack.c.b16 %v1836_v2, %v1835_v63  ;;  %v8262_v63 = vld [vmem:[%s8594_s30 + $0x34] sm:$0xf] }
 0x168   : > { %v9350_v13 = vadd.f32 %v1916_v21, %v8942_v19  ;;  %v8011_v19 = vld [vmem:[%s8594_s30 + $0x84] sm:$0xff]  ;;  %v8261_v21 = vld [vmem:[%s8594_s30 + $0x2c] sm:$0x1]  ;;  %v3016_v2 = vrot.slane %v8262_v63, 5 }
 0x169   : > { %v3012_v36 = vrot.slane %v8261_v21, 5  ;;  %v3025_v21 = vrot.slane %v3023_v53, 4 }
 0x16a   : > { %v3018_v27 = vrot.slane %v3016_v2, 4  ;;  %4074 = vmatpush.bf16.msra.mxu1 %v8056_v16  ;;  %v8055_v16 = vld [vmem:[#allocation3 + $0x58] sm:$0xff] }
 0x16b   : > { %v3013_v17 = vsel %vm8636_vm5, %v3011_v50, %v3012_v36  ;;  %v8265_v36 = vld [vmem:[%s8594_s30 + $0x44] sm:$0x1] }
 0x16c   : > { %v3090_v18 = vunpack.c.l.b16 %v3013_v17  ;;  %v9403_v17 = vpop.f32.mrf.mxu3 }
 0x16e   : > { %4075 = vmatpush.bf16.msra.mxu1 %v8055_v16  ;;  %v3047_v16 = vrot.slane %v9181_v30, 5 }
 0x16f   : > { %v1919_v29 = vpop.f32.mrf.mxu0 }
 0x170   : > { %v9358_v3 = vadd.f32 %v1919_v29, %v8970_v62  ;;  %v7394_v62 = vld [vmem:[%s8594_s30 + $0x24] sm:$0xe]  ;;  %v3017_v29 = vsel %vm8636_vm5, %v7405_v46, %v3016_v2 }
 0x171   : > { %v7404_v59 = vrot.slane %v7394_v62, 9 }
 0x172   : > { %1958 = vmatmul.bf16.gmra.mxu0 %v1846_v28  ;;  %v8263_v28 = vld [vmem:[%s8594_s30 + $0x38] sm:$0x1] }
 0x173   : > { %2252 = vmatmul.bf16.gmra.mxu1 %v2140_v22  ;;  %v3019_v22 = vrot.slane %v8263_v28, 5 }
 0x174   : > { %2480 = vmatmul.bf16.gmra.mxu2 %v8011_v19 }
 0x175   : > { %2934 = vmatmul.bf16.gmra.mxu3 %v2822_v39  ;;  %v3020_v19 = vsel %vm8636_vm5, %v3018_v27, %v3019_v22  ;;  %v8065_v39 = vld [vmem:[#allocation3 + $0xa8] sm:$0xff] }
 0x176   : > { %4444 = vmatpush.bf16.msra.mxu3 %v8065_v39  ;;  %v9421_v39 = vpop.f32.mrf.mxu3 }
 0x177   : > { %v1921_v23 = vpop.f32.mrf.mxu0 }
 0x178   : > { %v9361_v44 = vadd.f32 %v1921_v23, %v8984_v34  ;;  %v3091_v23 = vunpack.c.l.b16 %v3017_v29 }
 0x17a   : > { %4445 = vmatpush.bf16.msra.mxu3 %v8064_v4 }
 0x17f   : > { %v1924_v6 = vpop.f32.mrf.mxu0 }
 0x180   : > { %v9365_v26 = vadd.f32 %v1924_v6, %v9009_v7  ;;  %v3010_v7 = vsel %vm8636_vm5, %v7404_v59, %v3009_v42  ;;  %v3092_v6 = vunpack.c.l.b16 %v3020_v19  ;;  %v7396_v59 = vld [vmem:[%s8594_s30 + $0x3c] sm:$0xe]  ;;  %v7397_v19 = vld [vmem:[%s8594_s30 + $0x48] sm:$0xe] }
 0x181   : > { %v3089_v58 = vunpack.c.l.b16 %v3010_v7  ;;  %v7406_v50 = vrot.slane %v7396_v59, 9  ;;  %v9401_v7 = vpop.f32.mrf.mxu2  ;;  %v7407_v54 = vrot.slane %v7397_v19, 9 }
 0x182   : > { %3183 = vmatmul.bf16.vlgmr.msra.gmra.mxu0 %v3107_v47  ;;  %v3109_v42 = vpack.c.b16 %v3092_v6, %v3091_v23  ;;  %v8267_v6 = vld [vmem:[%s8594_s30 + $0x50] sm:$0x1] }
 0x183   : > { %v3108_v61 = vpack.c.b16 %v3090_v18, %v3089_v58  ;;  %v3024_v18 = vsel %vm8636_vm5, %v7406_v50, %v3023_v53 }
 0x184   : > { %v3093_v63 = vunpack.c.l.b16 %v3024_v18 }
 0x187   : > { %v1926_v34 = vpop.f32.mrf.mxu0 }
 0x188   : > { %v9374_v47 = vadd.f32 %v1926_v34, %v9023_v45  ;;  %v3026_v34 = vrot.slane %v8265_v36, 5 }
 0x189   : > { %v9414_v28 = vpop.f32.mrf.mxu2 }
 0x18f   : > { %v1929_v24 = vpop.f32.mrf.mxu0 }
 0x190   : > { %v9378_v14 = vadd.f32 %v1929_v24, %v9048_v20  ;;  %v8048_v24 = vld [vmem:[#allocation3 + $0x20] sm:$0xff] }
 0x191   : > { %4219 = vmatpush.bf16.msra.mxu2 %v8048_v24  ;;  %v9433_v50 = vpop.f32.mrf.mxu2  ;;  %v3037_v24 = vrot.slane %v9119_v33, 5 }
 0x192   : > { %3188 = vmatmul.bf16.gmra.mxu0 %v3108_v61 }
 0x197   : > { %v1931_v45 = vpop.f32.mrf.mxu0 }
 0x198   : > { %v9387_v20 = vadd.f32 %v1931_v45, %v9065_v60  ;;  %v9398_v60 = vpop.f32.mrf.mxu1  ;;  %v8266_v45 = vld [vmem:[%s8594_s30 + $0x4c] sm:$0xf] }
 0x199   : > { %v3030_v29 = vrot.slane %v8266_v45, 5  ;;  %v3039_v45 = vrot.slane %v3037_v24, 4 }
 0x19b   : > { %v3032_v23 = vrot.slane %v3030_v29, 4  ;;  %v3031_v53 = vsel %vm8636_vm5, %v7407_v54, %v3030_v29  ;;  %v3040_v29 = vrot.slane %v9138_v11, 5 }
 0x19f   : > { %v1934_v62 = vpop.f32.mrf.mxu0 }
 0x1a0   : > { %v9395_v55 = vadd.f32 %v1934_v62, %v9088_v35  ;;  %v3027_v35 = vsel %vm8636_vm5, %v3025_v21, %v3026_v34  ;;  %v9412_v46 = vpop.f32.mrf.mxu1  ;;  %v3095_v21 = vunpack.c.l.b16 %v3031_v53  ;;  %v8047_v34 = vld [vmem:[#allocation3 + $0x18] sm:$0xff] }
 0x1a1   : > { %v3094_v2 = vunpack.c.l.b16 %v3027_v35  ;;  %4220 = vmatpush.bf16.msra.mxu2 %v8047_v34 }
 0x1a2   : > { %3193 = vmatmul.bf16.gmra.mxu0 %v3109_v42  ;;  %v3033_v42 = vrot.slane %v8267_v6, 5 }
 0x1a3   : > { %v3110_v27 = vpack.c.b16 %v3094_v2, %v3093_v63  ;;  %v8063_v63 = vld [vmem:[#allocation3 + $0x98] sm:$0xff] }
 0x1a4   : > { %v3034_v59 = vsel %vm8636_vm5, %v3032_v23, %v3033_v42  ;;  %4446 = vmatpush.bf16.msra.mxu3 %v8063_v63 }
 0x1a5   : > { %v3096_v36 = vunpack.c.l.b16 %v3034_v59 }
 0x1a7   : > { %v1936_v58 = vpop.f32.mrf.mxu0  ;;  %v3111_v18 = vpack.c.b16 %v3096_v36, %v3095_v21  ;;  %v3044_v36 = vrot.slane %v9155_v52, 5 }
 0x1a8   : > { %v9410_v61 = vadd.f32 %v1936_v58, %v9102_v12  ;;  %v9424_v62 = vpop.f32.mrf.mxu1  ;;  %v9435_v58 = vpop.f32.mrf.mxu3 }
 0x1af   : > { %v1939_v22 = vpop.f32.mrf.mxu0 }
 0x1b0   : > { %v9418_v12 = vadd.f32 %v1939_v22, %v9132_v51  ;;  %v9438_v2 = vpop.f32.mrf.mxu1  ;;  %v9447_v19 = vpop.f32.mrf.mxu3 }
 0x1b2   : > { %3198 = vmatmul.bf16.gmra.mxu0 %v3110_v27  ;;  %v9444_v27 = vpop.f32.mrf.mxu2 }
 0x1b7   : > { %v1941_v31 = vpop.f32.mrf.mxu0 }
 0x1b8   : > { %v9431_v51 = vadd.f32 %v1941_v31, %v9146_v38  ;;  %v7398_v38 = vld [vmem:[%s8594_s30 + $0x54] sm:$0xe]  ;;  %v9456_v6 = vpop.f32.mrf.mxu1  ;;  %v9460_v59 = vpop.f32.mrf.mxu3 }
 0x1b9   : > { %v7408_v22 = vrot.slane %v7398_v38, 9  ;;  %v3046_v38 = vrot.slane %v3044_v36, 4 }
 0x1ba   : > { %v9458_v53 = vpop.f32.mrf.mxu2 }
 0x1bb   : > { %v3038_v54 = vsel %vm8636_vm5, %v7408_v22, %v3037_v24  ;;  %v8054_v24 = vld [vmem:[#allocation3 + $0x50] sm:$0xff] }
 0x1bc   : > { %v3097_v42 = vunpack.c.l.b16 %v3038_v54  ;;  %4076 = vmatpush.bf16.msra.mxu1 %v8054_v24 }
 0x1bf   : > { %v1944_v35 = vpop.f32.mrf.mxu0 }
 0x1c0   : > { %v9441_v4 = vadd.f32 %v1944_v35, %v9178_v25  ;;  %v3041_v25 = vsel %vm8636_vm5, %v3039_v45, %v3040_v29  ;;  %v8046_v35 = vld [vmem:[#allocation3 + $0x10] sm:$0xff]  ;;  %v9468_v22 = vpop.f32.mrf.mxu1  ;;  %v3048_v29 = vsel %vm8636_vm5, %v3046_v38, %v3047_v16  ;;  %v9479_v54 = vpop.f32.mrf.mxu3 }
 0x1c1   : > { %v3098_v31 = vunpack.c.l.b16 %v3041_v25  ;;  %4221 = vmatpush.bf16.msra.mxu2 %v8046_v35  ;;  %v3100_v25 = vunpack.c.l.b16 %v3048_v29 }
 0x1c2   : > { %3203 = vmatmul.bf16.gmra.mxu0 %v3111_v18  ;;  %v7399_v18 = vld [vmem:[%s8594_s30 + $0x60] sm:$0xe]  ;;  %v9470_v45 = vpop.f32.mrf.mxu2 }
 0x1c3   : > { %v3112_v11 = vpack.c.b16 %v3098_v31, %v3097_v42  ;;  %v7409_v63 = vrot.slane %v7399_v18, 9 }
 0x1c7   : > { %v1946_v33 = vpop.f32.mrf.mxu0 }
 0x1c8   : > { %v9454_v23 = vadd.f32 %v1946_v33, %v9195_v9  ;;  %v8062_v9 = vld [vmem:[#allocation3 + $0x90] sm:$0xff]  ;;  %v9481_v42 = vpop.f32.mrf.mxu1 }
 0x1c9   : > { %4447 = vmatpush.bf16.msra.mxu3 %v8062_v9  ;;  %v9490_v9 = vpop.f32.mrf.mxu3 }
 0x1ca   : > { %10976 = vst [vmem:[#allocation20_spill] sm:$0xff] %v9454_v23  ;;  %v9488_v35 = vpop.f32.mrf.mxu2 }
 0x1cf   : > { %v1949_v21 = vpop.f32.mrf.mxu0 }
 0x1d0   : > { %v9464_v34 = vadd.f32 %v1949_v21, %v9224_v57  ;;  %v3045_v57 = vsel %vm8636_vm5, %v7409_v63, %v3044_v36  ;;  %v3051_v21 = vrot.slane %v9213_v32, 5  ;;  %v7400_v36 = vld [vmem:[%s8594_s30 + $0x6c] sm:$0xe]  ;;  %v3054_v63 = vrot.slane %v9234_v15, 5 }
 0x1d1   : > { %v3099_v30 = vunpack.c.l.b16 %v3045_v57 }
 0x1d2   : > { %10977 = vst [vmem:[#allocation21_spill] sm:$0xff] %v9464_v34  ;;  %3208 = vmatmul.bf16.gmra.mxu0 %v3112_v11  ;;  %v3053_v24 = vrot.slane %v3051_v21, 4 }
 0x1d3   : > { %v3113_v31 = vpack.c.b16 %v3100_v25, %v3099_v30  ;;  %v9508_v25 = vpop.f32.mrf.mxu2 }
 0x1d4   : > { %v3055_v32 = vsel %vm8636_vm5, %v3053_v24, %v3054_v63  ;;  %v7401_v63 = vld [vmem:[%s8594_s30 + $0x78] sm:$0xe] }
 0x1d5   : > { %v3102_v29 = vunpack.c.l.b16 %v3055_v32 }
 0x1d7   : > { %v1951_v52 = vpop.f32.mrf.mxu0 }
 0x1d8   : > { %v9477_v33 = vadd.f32 %v1951_v52, %v9242_v48  ;;  %v7410_v48 = vrot.slane %v7400_v36, 9  ;;  %v3386_v52 = vld [vmem:[#allocation2] sm:$0x1] }
 0x1d9   : > { %v3387_v30 = vsel %vm9502_vm8, 0, %v3386_v52 }
 0x1da   : > { %10978 = vst [vmem:[#allocation22_spill] sm:$0xff] %v9477_v33  ;;  %v3052_v16 = vsel %vm8636_vm5, %v7410_v48, %v3051_v21  ;;  %v3058_v48 = vrot.slane %v9255_v0, 5 }
 0x1db   : > { %v3101_v15 = vunpack.c.l.b16 %v3052_v16  ;;  %3388 = vst [vmem:[#allocation2] sm:$0x1] %v3387_v30  ;;  %v3418_v16 = vld [vmem:[#allocation2 + $0x8] sm:$0x1]  ;;  %v7411_v30 = vrot.slane %v7401_v63, 9  ;;  %v9527_v0 = vpop.f32.mrf.mxu2  ;;  %v2258_v63 = vadd.f32 %v9398_v60, %v9337_v49 }
 0x1dc   : > { %v3419_v32 = vsel %vm9513_vm10, 0, %v3418_v16  ;;  %v9549_v49 = vld [vmem:[%s10939_s2] ss:$0 sm:$0xff] }
 0x1dd   : > { %3420 = vst [vmem:[#allocation2 + $0x8] sm:$0x1] %v3419_v32  ;;  %v3059_v16 = vsel %vm8636_vm5, %v7411_v30, %v3058_v48  ;;  %v3389_v32 = vld [vmem:[#allocation2 + $0xc] sm:$0x1]  ;;  %v3065_v30 = vrot.slane %v9313_v8, 5 }
 0x1df   : > { %v1954_v11 = vpop.f32.mrf.mxu0 }
 0x1e0   : > { %v9485_v18 = vadd.f32 %v1954_v11, %v9274_v41  ;;  %v9499_v41 = vpop.f32.mrf.mxu1  ;;  %v3114_v11 = vpack.c.b16 %v3102_v29, %v3101_v15  ;;  %v8045_v15 = vld [vmem:[#allocation3 + $0x8] sm:$0xff] }
 0x1e1   : > { %v8061_v29 = vld [vmem:[#allocation3 + $0x88] sm:$0xff]  ;;  %4222 = vmatpush.bf16.msra.mxu2 %v8045_v15  ;;  %v2486_v15 = vadd.f32 %v9401_v7, %v2258_v63 }
 0x1e2   : > { %10979 = vst [vmem:[#allocation23_spill] sm:$0xff] %v9485_v18  ;;  %3213 = vmatmul.bf16.gmra.mxu0 %v3113_v31  ;;  %v9510_v31 = vpop.f32.mrf.mxu3  ;;  %v3061_v18 = vrot.slane %v9280_v10, 5  ;;  %4448 = vmatpush.bf16.msra.mxu3 %v8061_v29  ;;  %v3390_v10 = vsel %vm9502_vm8, 0, %v3389_v32  ;;  %v3103_v29 = vunpack.c.l.b16 %v3059_v16  ;;  %v8044_v16 = vld [vmem:[#allocation3] sm:$0xff]  ;;  %v7402_v63 = vld [vmem:[%s8594_s30 + $0x84] sm:$0xe] }
 0x1e3   : > { %3391 = vst [vmem:[#allocation2 + $0xc] sm:$0x1] %v3390_v10  ;;  %v3421_v32 = vld [vmem:[#allocation2 + $0x14] sm:$0x1] }
 0x1e4   : > { %v3422_v10 = vsel %vm9513_vm10, 0, %v3421_v32 }
 0x1e5   : > { %4223 = vmatpush.bf16.msra.mxu2 %v8044_v16  ;;  %3423 = vst [vmem:[#allocation2 + $0x14] sm:$0x1] %v3422_v10  ;;  %v8114_v10 = vld [vmem:[#allocation3 + $0x1b0] sm:$0xff] }
 0x1e7   : > { %v9493_v38 = vpop.f32.mrf.mxu0 }
 0x1e8   : > { %10980 = vst [vmem:[#allocation24_spill] sm:$0xff] %v9493_v38  ;;  %v9524_v52 = vpop.f32.mrf.mxu1  ;;  %v3060_v38 = vrot.slane %v3058_v48, 4  ;;  %v9553_v48 = vstv %s7461_s21  ;;  %s7929_s21 = sshll.u32 %s8386_s17, 5 }
 0x1e9   : > { %vm3333_vm11 = vcmp.ge.s32.totalorder %v9553_v48, 0  ;;  %vm3343_vm12 = vcmp.lt.s32.totalorder %v9553_v48, 16 }
 0x1ea   : > { %vm9574_vm13 = vmand %vm3333_vm11, %vm3343_vm12 }
 0x1ef   : > { %v1959_v36 = vpop.f32.mrf.mxu0 }
 0x1f0   : > { %v9519_v24 = vadd.f32 %v1959_v36, %v9323_v40  ;;  %v9529_v40 = vpop.f32.mrf.mxu3  ;;  %v9543_v33 = vpop.f32.mrf.mxu1 }
 0x1f2   : > { %10985 = vst [vmem:[#allocation25_spill] sm:$0xff] %v9519_v24  ;;  %3218 = vmatmul.bf16.gmra.mxu0 %v3114_v11  ;;  %v3062_v11 = vsel %vm8636_vm5, %v3060_v38, %v3061_v18  ;;  %v2940_v18 = vadd.f32 %v9421_v39, %v2486_v15  ;;  %v9551_v38 = vpop.f32.mrf.mxu2  ;;  %v9561_v39 = vld [vmem:[%s10940_s3] ss:$0 sm:$0xff] }
 0x1f3   : > { %v3104_v24 = vunpack.c.l.b16 %v3062_v11  ;;  %v2259_v11 = vadd.f32 %v9412_v46, %v9350_v13  ;;  %v7412_v13 = vrot.slane %v7402_v63, 9  ;;  %v3067_v46 = vrot.slane %v3065_v30, 4  ;;  %v8060_v63 = vld [vmem:[#allocation3 + $0x80] sm:$0xff] }
 0x1f4   : > { %4449 = vmatpush.bf16.msra.mxu3 %v8060_v63  ;;  %v10990_v63 = vld [vmem:[#allocation15_spill] sm:$0xff] }
 0x1f5   : > { %v3115_v60 = vpack.c.b16 %v3104_v24, %v3103_v29  ;;  %v2487_v8 = vadd.f32 %v9414_v28, %v2259_v11  ;;  %v3068_v29 = vrot.slane %v9328_v5, 5 }
 0x1f7   : > { %v9531_v36 = vpop.f32.mrf.mxu0  ;;  %v2941_v28 = vadd.f32 %v9435_v58, %v2487_v8  ;;  %v3069_v5 = vsel %vm8636_vm5, %v3067_v46, %v3068_v29  ;;  %v3392_v58 = vld [vmem:[#allocation2 + $0x18] sm:$0x1] }
 0x1f8   : > { %10986 = vst [vmem:[#allocation26_spill] sm:$0xff] %v9531_v36  ;;  %v8053_v36 = vld [vmem:[#allocation3 + $0x48] sm:$0xff]  ;;  %v9564_v24 = vpop.f32.mrf.mxu3  ;;  %v9579_v16 = vpop.f32.mrf.mxu1  ;;  %v3106_v23 = vunpack.c.l.b16 %v3069_v5  ;;  %v10236_v5 = vld [vmem:[%s10944_s7 + $0x30] sm:$0xff] }
 0x1f9   : > { %4077 = vmatpush.bf16.msra.mxu1 %v8053_v36 }
 0x1fa   : > { %v9589_v8 = vpop.f32.mrf.mxu2 }
 0x1ff   : > { %v3184_v7 = vpop.f32.mrf.mxu0 }
 0x200   : > { %v3234_v36 = vadd.f32 %v3184_v7, %v2940_v18  ;;  %v8115_v18 = vld [vmem:[#allocation3 + $0x1b8] sm:$0xff] }
 0x201   : > { %5460 = vmatpush.bf16.msrb.mxu0 %v8115_v18 }
 0x202   : > { %v3258_v15 = vmul.f32 %v9549_v49, %v3234_v36  ;;  %3223 = vmatmul.bf16.gmra.mxu0 %v3115_v60  ;;  %v3066_v60 = vsel %vm8636_vm5, %v7412_v13, %v3065_v30  ;;  %v3393_v30 = vsel %vm9502_vm8, 0, %v3392_v58  ;;  %v10992_v58 = vld [vmem:[#allocation19_spill] sm:$0xff]  ;;  %v9629_v32 = vpop.f32.mrf.mxu2 }
 0x203   : > { %v3105_v29 = vunpack.c.l.b16 %v3066_v60  ;;  %3394 = vst [vmem:[#allocation2 + $0x18] sm:$0x1] %v3393_v30 }
 0x204   : > { %v3282_v7 = vadd.f32 %v9561_v39, %v3258_v15  ;;  %v2260_v15 = vadd.f32 %v9424_v62, %v9358_v3  ;;  %v9595_v3 = vpop.f32.mrf.mxu3 }
 0x205   : > { %5461 = vmatpush.bf16.msrb.mxu0 %v8114_v10  ;;  %10989 = vst [vmem:[#allocation27_spill] sm:$0xff] %v9595_v3  ;;  %v1013_v10 = vadd.f32 %v9389_v1, %v10992_v58  ;;  %v2261_v1 = vadd.f32 %v9438_v2, %v9361_v44  ;;  %v10996_v58 = vld [vmem:[#allocation18_spill] sm:$0xff] }
 0x206   : > { %v3302_v11 = vmax.f32 %v3282_v7, 0.0  ;;  %v2488_v13 = vadd.f32 %v9433_v50, %v2260_v15  ;;  %v3672_v15 = vld [vmem:[#allocation2] sm:$0xf] }
 0x207   : > { %v3186_v36 = vpop.f32.mrf.mxu0 }
 0x208   : > { %v3363_v18 = vsel %vm9574_vm13, %v3302_v11, 0.0  ;;  %v3235_v34 = vadd.f32 %v3186_v36, %v2941_v28  ;;  %v8052_v28 = vld [vmem:[#allocation3 + $0x40] sm:$0xff]  ;;  %v8113_v11 = vld [vmem:[#allocation3 + $0x1a8] sm:$0xff]  ;;  %v2942_v60 = vadd.f32 %v9447_v19, %v2488_v13  ;;  %v1301_v19 = vadd.f32 %v9391_v56, %v1013_v10 }
 0x209   : > { %v3448_v7 = vpack.c.bf16 %v3363_v18, %v3363_v18  ;;  %v10991_v18 = vld [vmem:[#allocation16_spill] sm:$0xff]  ;;  %4078 = vmatpush.bf16.msra.mxu1 %v8052_v28  ;;  %5462 = vmatpush.bf16.msrb.mxu0 %v8113_v11  ;;  %v2262_v13 = vadd.f32 %v9456_v6, %v9365_v26  ;;  %v9618_v28 = vpop.f32.mrf.mxu1  ;;  %v8112_v6 = vld [vmem:[#allocation3 + $0x1a0] sm:$0xff] }
 0x20a   : > { %v3259_v46 = vmul.f32 %v9549_v49, %v3235_v34  ;;  %v1008_v37 = vadd.f32 %v10991_v18, %v10990_v63  ;;  %v3116_v63 = vpack.c.b16 %v3106_v23, %v3105_v29  ;;  %v10995_v18 = vld [vmem:[#allocation17_spill] sm:$0xff]  ;;  %v3424_v23 = vld [vmem:[#allocation2 + $0x20] sm:$0x1] }
 0x20b   : > { %v3471_v62 = vshrl.u32 %v3448_v7, 16  ;;  %v3474_v34 = vshll.u32 %v3448_v7, 16  ;;  %v3425_v29 = vsel %vm9513_vm10, 0, %v3424_v23  ;;  %v2490_v56 = vadd.f32 %v9458_v53, %v2262_v13  ;;  %v3395_v23 = vld [vmem:[#allocation2 + $0x24] sm:$0x1] }
 0x20c   : > { %v3283_v36 = vadd.f32 %v9561_v39, %v3259_v46  ;;  %v3324_v46 = vadd.s32 1, %v9553_v48  ;;  %v1299_v3 = vadd.f32 %v10995_v18, %v1008_v37  ;;  %v2489_v37 = vadd.f32 %v9444_v27, %v2261_v1  ;;  %3426 = vst [vmem:[#allocation2 + $0x20] sm:$0x1] %v3425_v29 }
 0x20d   : > { %v9602_v50 = vrot.slane %v3471_v62, 7  ;;  %5463 = vmatpush.bf16.msrb.mxu0 %v8112_v6  ;;  %v2267_v6 = vadd.f32 %v9543_v33, %v9410_v61 }
 0x20e   : > { %v3303_v30 = vmax.f32 %v3283_v36, 0.0  ;;  %vm3334_vm0 = vcmp.ge.s32.totalorder %v3324_v46, 0  ;;  %vm3344_vm1 = vcmp.lt.s32.totalorder %v3324_v46, 16  ;;  %v9632_v10 = vadd.f32 %v10996_v58, %v1299_v3  ;;  %v8111_v46 = vld [vmem:[#allocation3 + $0x198] sm:$0xff] }
 0x20f   : > { %v3476_v7 = vor.u32 %v3474_v34, %v9602_v50  ;;  %v3189_v62 = vpop.f32.mrf.mxu0  ;;  %v2263_v34 = vadd.f32 %v9468_v22, %v9374_v47  ;;  %vm9646_vm3 = vmand %vm3334_vm0, %vm3344_vm1  ;;  %v2943_v47 = vadd.f32 %v9460_v59, %v2489_v37  ;;  %v9652_v22 = vadd.f32 %v9479_v54, %v2490_v56  ;;  %v8091_v58 = vld [vmem:[#allocation3 + $0x138] sm:$0xff] }
 0x210   : > { %v3364_v11 = vsel %vm9574_vm13, %v3303_v30, 0.0  ;;  %v3236_v36 = vadd.f32 %v3189_v62, %v2942_v60  ;;  %v9638_v60 = vadd.f32 %v9403_v17, %v1301_v19  ;;  %v9642_v30 = vpop.f32.mrf.mxu3  ;;  %v3477_v62 = vrot.slane %v9602_v50, 4  ;;  %5015 = vmatpush.bf16.msrb.mxu2 %v8091_v58 }
 0x211   : > { %v3673_v44 = vsel %vm9606_vm15, %v3476_v7, %v3672_v15  ;;  %v3449_v2 = vpack.c.bf16 %v3364_v11, %v3364_v11  ;;  %v2264_v15 = vadd.f32 %v9481_v42, %v9378_v14  ;;  %v2491_v17 = vadd.f32 %v9470_v45, %v2263_v34  ;;  %v3676_v42 = vld [vmem:[#allocation2 + $0x8] sm:$0x1]  ;;  %5464 = vmatpush.bf16.msrb.mxu0 %v8111_v46 }
 0x212   : > { %3674 = vst [vmem:[#allocation2] sm:$0xf] %v3673_v44  ;;  %v3260_v26 = vmul.f32 %v9549_v49, %v3236_v36  ;;  %3228 = vmatmul.bf16.gmra.mxu0 %v3116_v63  ;;  %v2265_v54 = vadd.f32 %v9499_v41, %v9387_v20  ;;  %v2266_v45 = vadd.f32 %v9524_v52, %v9395_v55  ;;  %v3396_v44 = vsel %vm9502_vm8, 0, %v3395_v23  ;;  %v2238_v52 = vpop.f32.mrf.mxu1 }
 0x213   : > { %v3479_v27 = vshrl.u32 %v3449_v2, 16  ;;  %v3482_v18 = vshll.u32 %v3449_v2, 16  ;;  %v2492_v7 = vadd.f32 %v9488_v35, %v2264_v15  ;;  %v9679_v56 = vadd.f32 %v9490_v9, %v2491_v17  ;;  %3397 = vst [vmem:[#allocation2 + $0x24] sm:$0x1] %v3396_v44 }
 0x214   : > { %v3284_v53 = vadd.f32 %v9561_v39, %v3260_v26  ;;  %v2493_v41 = vadd.f32 %v9508_v25, %v2265_v54  ;;  %v2494_v55 = vadd.f32 %v9527_v0, %v2266_v45  ;;  %v8099_v25 = vld [vmem:[#allocation3 + $0x178] sm:$0xff]  ;;  %v3325_v34 = vadd.s32 2, %v9553_v48 }
 0x215   : > { %v3481_v63 = vrot.slane %v3479_v27, 7  ;;  %v9682_v26 = vadd.f32 %v9510_v31, %v2492_v7  ;;  %v2268_v9 = vadd.f32 %v9579_v16, %v9418_v12  ;;  %v2269_v31 = vadd.f32 %v9618_v28, %v9431_v51  ;;  %5265 = vmatpush.bf16.msrb.mxu3 %v8099_v25  ;;  %v8109_v16 = vld [vmem:[#allocation3 + $0x188] sm:$0xff] }
 0x216   : > { %v3304_v1 = vmax.f32 %v3284_v53, 0.0  ;;  %v9697_v17 = vadd.f32 %v9529_v40, %v2493_v41  ;;  %v9703_v51 = vadd.f32 %v9551_v38, %v2267_v6  ;;  %vm3335_vm7 = vcmp.ge.s32.totalorder %v3325_v34, 0  ;;  %v8108_v6 = vld [vmem:[#allocation3 + $0x180] sm:$0xff] }
 0x217   : > { %v3484_v19 = vor.u32 %v3482_v18, %v3481_v63  ;;  %v3486_v59 = vrot.slane %v3481_v63, 4  ;;  %v3191_v13 = vpop.f32.mrf.mxu0  ;;  %v8110_v63 = vld [vmem:[#allocation3 + $0x190] sm:$0xff]  ;;  %v9692_v18 = vpop.f32.mrf.mxu2  ;;  %v9706_v28 = vadd.f32 %v9589_v8, %v2268_v9  ;;  %v9709_v7 = vadd.f32 %v9629_v32, %v2269_v31 }
 0x218   : > { %v3365_v11 = vsel %vm9646_vm3, %v3304_v1, 0.0  ;;  %v3237_v36 = vadd.f32 %v3191_v13, %v2943_v47  ;;  %v3679_v47 = vld [vmem:[#allocation2 + $0xc] sm:$0xf]  ;;  %5465 = vmatpush.bf16.msrb.mxu0 %v8110_v63  ;;  %vm3345_vm9 = vcmp.lt.s32.totalorder %v3325_v34, 16 }
 0x219   : > { %v3485_v35 = vsel %vm9657_vm6, %v3477_v62, %v3484_v19  ;;  %v3677_v50 = vsel %vm9502_vm8, %v3486_v59, %v3676_v42  ;;  %v3450_v37 = vpack.c.bf16 %v3365_v11, %v3365_v11  ;;  %v3742_v20 = vld [vmem:[#allocation2] sm:$0xf]  ;;  %v9700_v42 = vadd.f32 %v9564_v24, %v2494_v55  ;;  %v9711_v62 = vpop.f32.mrf.mxu3  ;;  %vm9729_vm11 = vmand %vm3335_vm7, %vm3345_vm9 }
 0x21a   : > { %3675 = vst [vmem:[#allocation2 + $0x4] sm:$0xf] %v3485_v35  ;;  %v3261_v2 = vmul.f32 %v9549_v49, %v3237_v36  ;;  %v3783_v29 = vshrl.u32 %v3742_v20, 16  ;;  %v3786_v15 = vshll.u32 %v3742_v20, 16  ;;  %v4265_v46 = vld [vmem:[#allocation2] sm:$0xe]  ;;  %v2270_v11 = vadd.f32 %v2238_v52, %v9441_v4  ;;  %v9722_v20 = vpop.f32.mrf.mxu1 }
 0x21b   : > { %3678 = vst [vmem:[#allocation2 + $0x8] sm:$0x1] %v3677_v50  ;;  %v3488_v27 = vshrl.u32 %v3450_v37, 16  ;;  %v3491_v33 = vshll.u32 %v3450_v37, 16  ;;  %v7558_v45 = vrot.slane %v4265_v46, 9 }
 0x21c   : > { %v3285_v0 = vadd.f32 %v9561_v39, %v3261_v2  ;;  %v3785_v53 = vrot.slane %v3783_v29, 4  ;;  %v3788_v12 = vrot.slane %v3786_v15, 5  ;;  %5466 = vmatpush.bf16.msrb.mxu0 %v8109_v16  ;;  %v8083_v2 = vld [vmem:[#allocation3 + $0xf8] sm:$0xff]  ;;  %v3427_v29 = vld [vmem:[#allocation2 + $0x2c] sm:$0x1] }
 0x21d   : > { %v9694_v61 = vrot.slane %v3488_v27, 7  ;;  %v3683_v15 = vld [vmem:[#allocation2 + $0x14] sm:$0x1]  ;;  %4637 = vmatpush.bf16.msrb.mxu1 %v8083_v2 }
 0x21e   : > { %v3305_v1 = vmax.f32 %v3285_v0, 0.0  ;;  %v3789_v13 = vor.u32 %v3788_v12, %v3785_v53 }
 0x21f   : > { %v3493_v40 = vor.u32 %v3491_v33, %v9694_v61  ;;  %v3194_v24 = vpop.f32.mrf.mxu0  ;;  %v3494_v36 = vrot.slane %v9694_v61, 4  ;;  %v3428_v61 = vsel %vm9513_vm10, 0, %v3427_v29  ;;  %v9737_v33 = vpop.f32.mrf.mxu2 }
 0x220   : > { %v3366_v19 = vsel %vm9646_vm3, %v3305_v1, 0.0  ;;  %v3238_v59 = vadd.f32 %v3194_v24, %v9652_v22  ;;  %v3790_v37 = vrot.slane %v3789_v13, 4  ;;  %5467 = vmatpush.bf16.msrb.mxu0 %v8108_v6  ;;  %3429 = vst [vmem:[#allocation2 + $0x2c] sm:$0x1] %v3428_v61 }
 0x221   : > { %v3680_v38 = vsel %vm9606_vm15, %v3493_v40, %v3679_v47  ;;  %v3451_v8 = vpack.c.bf16 %v3366_v19, %v3366_v19  ;;  %v8036_v54 = vld [vmem:[#allocation2] sm:$0xff]  ;;  %v2920_v13 = vpop.f32.mrf.mxu3 }
 0x222   : > { %v3743_v32 = vld [vmem:[#allocation2 + $0x4] sm:$0xf]  ;;  %3681 = vst [vmem:[#allocation2 + $0xc] sm:$0xf] %v3680_v38  ;;  %v3262_v3 = vmul.f32 %v9549_v49, %v3238_v59  ;;  %v3774_v23 = vld [vmem:[#allocation2 + $0x8] sm:$0x1]  ;;  %4224 = vmatmul.bf16.vlgmr.msra.gmra.mxu2 %v8036_v54 }
 0x223   : > { %v4291_v35 = vrot.slane %v3743_v32, 5  ;;  %v3496_v22 = vshrl.u32 %v3451_v8, 16  ;;  %v4294_v50 = vrot.slane %v3774_v23, 5  ;;  %v3792_v44 = vshll.u32 %v3743_v32, 16 }
 0x224   : > { %v3286_v41 = vadd.f32 %v9561_v39, %v3262_v3  ;;  %v3796_v52 = vshrl.u32 %v3743_v32, 16  ;;  %v3499_v58 = vshll.u32 %v3451_v8, 16  ;;  %v3802_v53 = vshll.u32 %v3774_v23, 16 }
 0x225   : > { %v4292_v4 = vsel %vm8636_vm5, %v7558_v45, %v4291_v35  ;;  %v4293_v55 = vrot.slane %v4291_v35, 4  ;;  %v3498_v27 = vrot.slane %v3496_v22, 7  ;;  %v3794_v0 = vrot.slane %v3792_v44, 5  ;;  %v11004_v22 = vld [vmem:[#allocation27_spill] sm:$0xff] }
 0x226   : > { %v3306_v63 = vmax.f32 %v3286_v41, 0.0  ;;  %v3798_v31 = vrot.slane %v3796_v52, 4  ;;  %v4362_v46 = vunpack.c.l.b16 %v4292_v4  ;;  %v2498_v3 = vadd.f32 %v9692_v18, %v2270_v11  ;;  %v8090_v41 = vld [vmem:[#allocation3 + $0x130] sm:$0xff]  ;;  %v3398_v52 = vld [vmem:[#allocation2 + $0x30] sm:$0x1] }
 0x227   : > { %v4295_v9 = vsel %vm8636_vm5, %v4293_v55, %v4294_v50  ;;  %v3501_v34 = vor.u32 %v3499_v58, %v3498_v27  ;;  %v3503_v47 = vrot.slane %v3498_v27, 4  ;;  %v3196_v1 = vpop.f32.mrf.mxu0  ;;  %v3795_v19 = vsel %vm8629_vm4, %v3790_v37, %v3794_v0  ;;  %v8098_v4 = vld [vmem:[#allocation3 + $0x170] sm:$0xff]  ;;  %5016 = vmatpush.bf16.msrb.mxu2 %v8090_v41  ;;  %v3430_v41 = vld [vmem:[#allocation2 + $0x38] sm:$0x1] }
 0x228   : > { %v4363_v12 = vunpack.c.l.b16 %v4295_v9  ;;  %v3367_v16 = vsel %vm9729_vm11, %v3306_v63, 0.0  ;;  %v3239_v40 = vadd.f32 %v3196_v1, %v9679_v56  ;;  %v3799_v59 = vor.u32 %v3798_v31, %v3794_v0  ;;  %5266 = vmatpush.bf16.msrb.mxu3 %v8098_v4  ;;  %v3686_v63 = vld [vmem:[#allocation2 + $0x18] sm:$0xf] }
 0x229   : > { %v3502_v38 = vsel %vm9657_vm6, %v3494_v36, %v3501_v34  ;;  %v3684_v8 = vsel %vm9502_vm8, %v3503_v47, %v3683_v15  ;;  %v3452_v54 = vpack.c.bf16 %v3367_v16, %v3367_v16  ;;  %v3744_v45 = vld [vmem:[#allocation2 + $0xc] sm:$0xf]  ;;  %v3804_v35 = vrot.slane %v3802_v53, 5  ;;  %v2243_v15 = vpop.f32.mrf.mxu1 }
 0x22a   : > { %v4378_v32 = vpack.c.b16 %v4363_v12, %v4362_v46  ;;  %3682 = vst [vmem:[#allocation2 + $0x10] sm:$0xf] %v3502_v38  ;;  %v3263_v23 = vmul.f32 %v9549_v49, %v3239_v40  ;;  %v3800_v56 = vrot.slane %v3799_v59, 4  ;;  %v9752_v50 = vadd.f32 %v11004_v22, %v9703_v51  ;;  %v4266_v31 = vld [vmem:[#allocation2 + $0xc] sm:$0xe] }
 0x22b   : > { %3685 = vst [vmem:[#allocation2 + $0x14] sm:$0x1] %v3684_v8  ;;  %v3505_v37 = vshrl.u32 %v3452_v54, 16  ;;  %v3326_v36 = vadd.s32 3, %v9553_v48  ;;  %v3991_v44 = vunpack.c.l.b16 %v3795_v19  ;;  %v3508_v55 = vshll.u32 %v3452_v54, 16  ;;  %v11005_v12 = vld [vmem:[#allocation20_spill] sm:$0xff] }
 0x22c   : > { %4450 = vmatmul.bf16.vlgmr.msra.gmra.mxu3 %v4378_v32  ;;  %v3287_v18 = vadd.f32 %v9561_v39, %v3263_v23  ;;  %v3805_v11 = vsel %vm8629_vm4, %v3800_v56, %v3804_v35  ;;  %v3807_v2 = vshrl.u32 %v3744_v45, 16  ;;  %v3399_v6 = vsel %vm9502_vm8, 0, %v3398_v52  ;;  %v11006_v32 = vld [vmem:[#allocation21_spill] sm:$0xff]  ;;  %v8082_v35 = vld [vmem:[#allocation3 + $0xf0] sm:$0xff] }
 0x22d   : > { %v9758_v29 = vrot.slane %v3505_v37, 7  ;;  %v3992_v51 = vunpack.c.l.b16 %v3805_v11  ;;  %v3810_v27 = vshll.u32 %v3744_v45, 16  ;;  %v9764_v58 = vadd.f32 %v9642_v30, %v9706_v28  ;;  %3400 = vst [vmem:[#allocation2 + $0x30] sm:$0x1] %v3399_v6  ;;  %4638 = vmatpush.bf16.msrb.mxu1 %v8082_v35 }
 0x22e   : > { %v9768_v0 = vadd.f32 %v9711_v62, %v9709_v7  ;;  %v9770_v53 = vadd.f32 %v2920_v13, %v2498_v3  ;;  %v3307_v9 = vmax.f32 %v3287_v18, 0.0  ;;  %v3809_v1 = vrot.slane %v3807_v2, 4  ;;  %v2471_v62 = vpop.f32.mrf.mxu2  ;;  %v3690_v2 = vld [vmem:[#allocation2 + $0x20] sm:$0x1] }
 0x22f   : > { %v3510_v61 = vor.u32 %v3508_v55, %v9758_v29  ;;  %v3199_v34 = vpop.f32.mrf.mxu0  ;;  %v4007_v47 = vpack.c.b16 %v3992_v51, %v3991_v44  ;;  %v3812_v46 = vrot.slane %v3810_v27, 5  ;;  %v2271_v30 = vadd.f32 %v9722_v20, %v11005_v12 }
 0x230   : > { %v3368_v28 = vsel %vm9729_vm11, %v3307_v9, 0.0  ;;  %v3240_v7 = vadd.f32 %v3199_v34, %v9682_v26  ;;  %vm3336_vm12 = vcmp.ge.s32.totalorder %v3326_v36, 0  ;;  %vm3346_vm13 = vcmp.lt.s32.totalorder %v3326_v36, 16  ;;  %v2922_v26 = vpop.f32.mrf.mxu3 }
 0x231   : > { %v3687_v16 = vsel %vm9606_vm15, %v3510_v61, %v3686_v63  ;;  %v3453_v40 = vpack.c.bf16 %v3368_v28, %v3368_v28  ;;  %4079 = vmatmul.bf16.vlgmr.msra.gmra.mxu1 %v4007_v47  ;;  %v8037_v19 = vld [vmem:[#allocation2 + $0xc] sm:$0xff]  ;;  %v7559_v13 = vrot.slane %v4266_v31, 9  ;;  %v2499_v38 = vadd.f32 %v9737_v33, %v2271_v30  ;;  %vm9789_vm14 = vmand %vm3336_vm12, %vm3346_vm13  ;;  %v2245_v61 = vpop.f32.mrf.mxu1 }
 0x232   : > { %v3745_v59 = vld [vmem:[#allocation2 + $0x10] sm:$0xf]  ;;  %3688 = vst [vmem:[#allocation2 + $0x18] sm:$0xf] %v3687_v16  ;;  %v3264_v20 = vmul.f32 %v9549_v49, %v3240_v7  ;;  %v3775_v25 = vld [vmem:[#allocation2 + $0x14] sm:$0x1]  ;;  %v2272_v45 = vadd.f32 %v2243_v15, %v11006_v32  ;;  %4229 = vmatmul.bf16.gmra.mxu2 %v8037_v19  ;;  %v3813_v56 = vor.u32 %v3812_v46, %v3809_v1 }
 0x233   : > { %v4298_v8 = vrot.slane %v3745_v59, 5  ;;  %v3816_v54 = vshll.u32 %v3745_v59, 16  ;;  %v3511_v3 = vrot.slane %v9758_v29, 4  ;;  %v3513_v23 = vshrl.u32 %v3453_v40, 16  ;;  %v8097_v32 = vld [vmem:[#allocation3 + $0x168] sm:$0xff] }
 0x234   : > { %v3288_v22 = vadd.f32 %v9561_v39, %v3264_v20  ;;  %v4301_v44 = vrot.slane %v3775_v25, 5  ;;  %v3516_v55 = vshll.u32 %v3453_v40, 16  ;;  %v3820_v52 = vshrl.u32 %v3745_v59, 16  ;;  %v11009_v20 = vld [vmem:[#allocation22_spill] sm:$0xff]  ;;  %5267 = vmatpush.bf16.msrb.mxu3 %v8097_v32  ;;  %v3433_v32 = vld [vmem:[#allocation2 + $0x44] sm:$0x1] }
 0x235   : > { %v4299_v33 = vsel %vm8636_vm5, %v7559_v13, %v4298_v8  ;;  %v4300_v37 = vrot.slane %v4298_v8, 4  ;;  %v3515_v4 = vrot.slane %v3513_v23, 7  ;;  %v3818_v11 = vrot.slane %v3816_v54, 5 }
 0x236   : > { %v3308_v29 = vmax.f32 %v3288_v22, 0.0  ;;  %v4364_v6 = vunpack.c.l.b16 %v4299_v33  ;;  %v3431_v27 = vsel %vm9513_vm10, 0, %v3430_v41  ;;  %v3822_v31 = vrot.slane %v3820_v52, 4  ;;  %v2473_v8 = vpop.f32.mrf.mxu2  ;;  %v3401_v22 = vld [vmem:[#allocation2 + $0x3c] sm:$0x1] }
 0x237   : > { %v4302_v51 = vsel %vm8636_vm5, %v4300_v37, %v4301_v44  ;;  %v3518_v15 = vor.u32 %v3516_v55, %v3515_v4  ;;  %v3520_v63 = vrot.slane %v3515_v4, 4  ;;  %v3201_v9 = vpop.f32.mrf.mxu0  ;;  %3432 = vst [vmem:[#allocation2 + $0x38] sm:$0x1] %v3431_v27  ;;  %v3814_v1 = vrot.slane %v3813_v56, 4 }
 0x238   : > { %v4365_v36 = vunpack.c.l.b16 %v4302_v51  ;;  %v3369_v34 = vsel %vm9789_vm14, %v3308_v29, 0.0  ;;  %v3241_v47 = vadd.f32 %v3201_v9, %v9697_v17  ;;  %v3826_v46 = vshll.u32 %v3775_v25, 16  ;;  %v9816_v33 = vpop.f32.mrf.mxu3 }
 0x239   : > { %v3519_v12 = vsel %vm9657_vm6, %v3511_v3, %v3518_v15  ;;  %v3691_v30 = vsel %vm9502_vm8, %v3520_v63, %v3690_v2  ;;  %v3454_v28 = vpack.c.bf16 %v3369_v34, %v3369_v34  ;;  %v9804_v16 = vadd.f32 %v2922_v26, %v2499_v38  ;;  %v3746_v17 = vld [vmem:[#allocation2 + $0x18] sm:$0xf]  ;;  %v8089_v26 = vld [vmem:[#allocation3 + $0x128] sm:$0xff] }
 0x23a   : > { %v4379_v7 = vpack.c.b16 %v4365_v36, %v4364_v6  ;;  %3689 = vst [vmem:[#allocation2 + $0x1c] sm:$0xf] %v3519_v12  ;;  %v3265_v40 = vmul.f32 %v9549_v49, %v3241_v47  ;;  %v9808_v19 = vadd.s32 4, %v9553_v48  ;;  %v3823_v59 = vor.u32 %v3822_v31, %v3818_v11  ;;  %5017 = vmatpush.bf16.msrb.mxu2 %v8089_v26  ;;  %v4267_v52 = vld [vmem:[#allocation2 + $0x18] sm:$0xe] }
 0x23b   : > { %v9810_v13 = vadd.f32 %v2471_v62, %v2272_v45  ;;  %v2273_v25 = vadd.f32 %v2245_v61, %v11009_v20  ;;  %3692 = vst [vmem:[#allocation2 + $0x20] sm:$0x1] %v3691_v30  ;;  %v3522_v54 = vshrl.u32 %v3454_v28, 16  ;;  %v3819_v38 = vsel %vm8629_vm4, %v3814_v1, %v3818_v11  ;;  %v3693_v45 = vld [vmem:[#allocation2 + $0x24] sm:$0xf] }
 0x23c   : > { %4455 = vmatmul.bf16.gmra.mxu3 %v4379_v7  ;;  %v3525_v3 = vshll.u32 %v3454_v28, 16  ;;  %v3289_v23 = vadd.f32 %v9561_v39, %v3265_v40  ;;  %v3824_v56 = vrot.slane %v3823_v59, 4  ;;  %v3828_v35 = vrot.slane %v3826_v46, 5  ;;  %v5525_v14 = vld [vmem:[#allocation2 + $0x18] sm:$0xf] }
 0x23d   : > { %v9818_v62 = vrot.slane %v3522_v54, 7  ;;  %v3402_v37 = vsel %vm9502_vm8, 0, %v3401_v22  ;;  %v3831_v44 = vshrl.u32 %v3746_v17, 16  ;;  %v3834_v41 = vshll.u32 %v3746_v17, 16 }
 0x23e   : > { %v9822_v4 = vadd.f32 %v2473_v8, %v2273_v25  ;;  %v3309_v55 = vmax.f32 %v3289_v23, 0.0  ;;  %vm3337_vm0 = vcmp.ge.s32.totalorder %v9808_v19, 0  ;;  %v3829_v11 = vsel %vm8629_vm4, %v3824_v56, %v3828_v35  ;;  %3403 = vst [vmem:[#allocation2 + $0x3c] sm:$0x1] %v3402_v37  ;;  %v8081_v25 = vld [vmem:[#allocation3 + $0xe8] sm:$0xff] }
 0x23f   : > { %v3527_v2 = vor.u32 %v3525_v3, %v9818_v62  ;;  %v3204_v29 = vpop.f32.mrf.mxu0  ;;  %v3993_v51 = vunpack.c.l.b16 %v3819_v38  ;;  %v3994_v6 = vunpack.c.l.b16 %v3829_v11  ;;  %v3833_v27 = vrot.slane %v3831_v44, 4  ;;  %v2476_v3 = vpop.f32.mrf.mxu2  ;;  %4639 = vmatpush.bf16.msrb.mxu1 %v8081_v25 }
 0x240   : > { %v3370_v15 = vsel %vm9789_vm14, %v3309_v55, 0.0  ;;  %v3242_v63 = vadd.f32 %v3204_v29, %v9700_v42  ;;  %vm3347_vm1 = vcmp.lt.s32.totalorder %v9808_v19, 16  ;;  %v3836_v9 = vrot.slane %v3834_v41, 5  ;;  %v2248_v42 = vpop.f32.mrf.mxu1  ;;  %v2927_v11 = vpop.f32.mrf.mxu3 }
 0x241   : > { %v3694_v36 = vsel %vm9606_vm15, %v3527_v2, %v3693_v45  ;;  %v3455_v31 = vpack.c.bf16 %v3370_v15, %v3370_v15  ;;  %v4008_v61 = vpack.c.b16 %v3994_v6, %v3993_v51  ;;  %v8038_v34 = vld [vmem:[#allocation2 + $0x18] sm:$0xff]  ;;  %v7560_v46 = vrot.slane %v4267_v52, 9  ;;  %vm9843_vm2 = vmand %vm3337_vm0, %vm3347_vm1  ;;  %v3697_v45 = vld [vmem:[#allocation2 + $0x2c] sm:$0x1] }
 0x242   : > { %v8100_v47 = vld [vmem:[#allocation2 + $0x18] sm:$0xff]  ;;  %3695 = vst [vmem:[#allocation2 + $0x24] sm:$0xf] %v3694_v36  ;;  %v3266_v12 = vmul.f32 %v9549_v49, %v3242_v63  ;;  %v3776_v30 = vld [vmem:[#allocation2 + $0x20] sm:$0x1]  ;;  %v3837_v28 = vor.u32 %v3836_v9, %v3833_v27  ;;  %v3528_v40 = vrot.slane %v9818_v62, 4  ;;  %4234 = vmatmul.bf16.gmra.mxu2 %v8038_v34 }
 0x243   : > { %v3747_v1 = vld [vmem:[#allocation2 + $0x1c] sm:$0xf]  ;;  %v3530_v59 = vshrl.u32 %v3455_v31, 16  ;;  %v3533_v17 = vshll.u32 %v3455_v31, 16  ;;  %4084 = vmatmul.bf16.gmra.mxu1 %v4008_v61  ;;  %5468 = vmatmul.bf16.vlgmr.msrb.gmra.mxu0 %v8100_v47  ;;  %v4308_v26 = vrot.slane %v3776_v30, 5  ;;  %v3850_v41 = vshll.u32 %v3776_v30, 16 }
 0x244   : > { %v4305_v18 = vrot.slane %v3747_v1, 5  ;;  %v3840_v7 = vshll.u32 %v3747_v1, 16  ;;  %v3844_v20 = vshrl.u32 %v3747_v1, 16  ;;  %v3290_v8 = vadd.f32 %v9561_v39, %v3266_v12  ;;  %v11012_v47 = vld [vmem:[#allocation23_spill] sm:$0xff]  ;;  %v11013_v30 = vld [vmem:[#allocation24_spill] sm:$0xff] }
 0x245   : > { %v3532_v23 = vrot.slane %v3530_v59, 7  ;;  %v3838_v35 = vrot.slane %v3837_v28, 4  ;;  %v3434_v55 = vsel %vm9513_vm10, 0, %v3433_v32  ;;  %v2274_v1 = vadd.f32 %v2248_v42, %v11012_v47  ;;  %v8088_v59 = vld [vmem:[#allocation3 + $0x120] sm:$0xff] }
 0x246   : > { %v4306_v54 = vsel %vm8636_vm5, %v7560_v46, %v4305_v18  ;;  %v4307_v38 = vrot.slane %v4305_v18, 4  ;;  %v3842_v22 = vrot.slane %v3840_v7, 5  ;;  %v3846_v62 = vrot.slane %v3844_v20, 4  ;;  %3435 = vst [vmem:[#allocation2 + $0x44] sm:$0x1] %v3434_v55  ;;  %5018 = vmatpush.bf16.msrb.mxu2 %v8088_v59 }
 0x247   : > { %v3310_v37 = vmax.f32 %v3290_v8, 0.0  ;;  %v3535_v52 = vor.u32 %v3533_v17, %v3532_v23  ;;  %v3537_v19 = vrot.slane %v3532_v23, 4  ;;  %v3206_v2 = vpop.f32.mrf.mxu0  ;;  %v4366_v29 = vunpack.c.l.b16 %v4306_v54  ;;  %v8096_v17 = vld [vmem:[#allocation3 + $0x160] sm:$0xff]  ;;  %v3404_v8 = vld [vmem:[#allocation2 + $0x48] sm:$0x1] }
 0x248   : > { %v4309_v44 = vsel %vm8636_vm5, %v4307_v38, %v4308_v26  ;;  %v3243_v27 = vadd.f32 %v3206_v2, %v9752_v50  ;;  %v3843_v15 = vsel %vm8629_vm4, %v3838_v35, %v3842_v22  ;;  %v3847_v63 = vor.u32 %v3846_v62, %v3842_v22  ;;  %v2250_v38 = vpop.f32.mrf.mxu1  ;;  %5268 = vmatpush.bf16.msrb.mxu3 %v8096_v17 }
 0x249   : > { %v4367_v51 = vunpack.c.l.b16 %v4309_v44  ;;  %v3371_v6 = vsel %vm9843_vm2, %v3310_v37, 0.0  ;;  %v3536_v9 = vsel %vm9657_vm6, %v3528_v40, %v3535_v52  ;;  %v3698_v36 = vsel %vm9502_vm8, %v3537_v19, %v3697_v45  ;;  %v3748_v34 = vld [vmem:[#allocation2 + $0x24] sm:$0xf]  ;;  %v3700_v45 = vld [vmem:[#allocation2 + $0x30] sm:$0xf] }
 0x24a   : > { %v3456_v31 = vpack.c.bf16 %v3371_v6, %v3371_v6  ;;  %3696 = vst [vmem:[#allocation2 + $0x28] sm:$0xf] %v3536_v9  ;;  %v3267_v46 = vmul.f32 %v9549_v49, %v3243_v27  ;;  %v3848_v12 = vrot.slane %v3847_v63, 4  ;;  %v3852_v50 = vrot.slane %v3850_v41, 5  ;;  %v4268_v44 = vld [vmem:[#allocation2 + $0x24] sm:$0xe]  ;;  %v2478_v41 = vpop.f32.mrf.mxu2 }
 0x24b   : > { %v4380_v61 = vpack.c.b16 %v4367_v51, %v4366_v29  ;;  %v1981_v18 = vadd.f32 %v11013_v30, %v9632_v10  ;;  %3699 = vst [vmem:[#allocation2 + $0x2c] sm:$0x1] %v3698_v36  ;;  %v9865_v7 = vadd.s32 5, %v9553_v48  ;;  %v3995_v40 = vunpack.c.l.b16 %v3843_v15 }
 0x24c   : > { %v3539_v28 = vshrl.u32 %v3456_v31, 16  ;;  %v3542_v20 = vshll.u32 %v3456_v31, 16  ;;  %v3291_v42 = vadd.f32 %v9561_v39, %v3267_v46  ;;  %v3853_v25 = vsel %vm8629_vm4, %v3848_v12, %v3852_v50  ;;  %v8080_v46 = vld [vmem:[#allocation3 + $0xe0] sm:$0xff] }
 0x24d   : > { %4460 = vmatmul.bf16.gmra.mxu3 %v4380_v61  ;;  %v3855_v54 = vshrl.u32 %v3748_v34, 16  ;;  %v3996_v10 = vunpack.c.l.b16 %v3853_v25  ;;  %v3405_v32 = vsel %vm9502_vm8, 0, %v3404_v8  ;;  %v3858_v23 = vshll.u32 %v3748_v34, 16  ;;  %4640 = vmatpush.bf16.msrb.mxu1 %v8080_v46  ;;  %v3707_v46 = vld [vmem:[#allocation2 + $0x3c] sm:$0xf] }
 0x24e   : > { %v9870_v26 = vrot.slane %v3539_v28, 7  ;;  %v9876_v35 = vadd.f32 %v9816_v33, %v9810_v13  ;;  %v9879_v22 = vadd.f32 %v2927_v11, %v9822_v4  ;;  %v9881_v62 = vadd.f32 %v2476_v3, %v2274_v1  ;;  %3406 = vst [vmem:[#allocation2 + $0x48] sm:$0x1] %v3405_v32  ;;  %v9888_v4 = vld [vmem:[#allocation2 + $0xc] sm:$0xf]  ;;  %v2930_v3 = vpop.f32.mrf.mxu3 }
 0x24f   : > { %v3311_v37 = vmax.f32 %v3291_v42, 0.0  ;;  %v3209_v52 = vpop.f32.mrf.mxu0  ;;  %v4009_v19 = vpack.c.b16 %v3996_v10, %v3995_v40  ;;  %v3857_v2 = vrot.slane %v3855_v54, 4  ;;  %v3860_v29 = vrot.slane %v3858_v23, 5  ;;  %v3436_v28 = vld [vmem:[#allocation2 + $0x50] sm:$0x1] }
 0x250   : > { %v3544_v55 = vor.u32 %v3542_v20, %v9870_v26  ;;  %v2275_v51 = vadd.f32 %v2250_v38, %v1981_v18  ;;  %v3244_v33 = vadd.f32 %v3209_v52, %v9764_v58  ;;  %vm3338_vm3 = vcmp.ge.s32.totalorder %v9865_v7, 0 }
 0x251   : > { %v3372_v13 = vsel %vm9843_vm2, %v3311_v37, 0.0  ;;  %vm3348_vm7 = vcmp.lt.s32.totalorder %v9865_v7, 16  ;;  %v8039_v27 = vld [vmem:[#allocation2 + $0x24] sm:$0xff]  ;;  %v7561_v9 = vrot.slane %v4268_v44, 9  ;;  %v3545_v34 = vrot.slane %v9870_v26, 4 }
 0x252   : > { %v3701_v11 = vsel %vm9606_vm15, %v3544_v55, %v3700_v45  ;;  %v3457_v6 = vpack.c.bf16 %v3372_v13, %v3372_v13  ;;  %v8101_v15 = vld [vmem:[#allocation2 + $0x24] sm:$0xff]  ;;  %v9893_v36 = vadd.f32 %v2478_v41, %v2275_v51  ;;  %v3268_v58 = vmul.f32 %v9549_v49, %v3244_v33  ;;  %v3777_v56 = vld [vmem:[#allocation2 + $0x2c] sm:$0x1]  ;;  %4239 = vmatmul.bf16.gmra.mxu2 %v8039_v27  ;;  %vm9905_vm9 = vmand %vm3338_vm3, %vm3348_vm7 }
 0x253   : > { %v3749_v63 = vld [vmem:[#allocation2 + $0x28] sm:$0xf]  ;;  %3702 = vst [vmem:[#allocation2 + $0x30] sm:$0xf] %v3701_v11  ;;  %4089 = vmatmul.bf16.gmra.mxu1 %v4009_v19  ;;  %v3861_v1 = vor.u32 %v3860_v29, %v3857_v2  ;;  %v4727_v12 = vshrl.u32 %v9888_v4, 16  ;;  %5473 = vmatmul.bf16.gmra.mxu0 %v8101_v15  ;;  %v4315_v49 = vrot.slane %v3777_v56, 5 }
 0x254   : > { %v4312_v31 = vrot.slane %v3749_v63, 5  ;;  %v3864_v61 = vshll.u32 %v3749_v63, 16  ;;  %v3547_v47 = vshrl.u32 %v3457_v6, 16  ;;  %v3292_v50 = vadd.f32 %v9561_v39, %v3268_v58  ;;  %v3704_v39 = vld [vmem:[#allocation2 + $0x38] sm:$0x1]  ;;  %v8095_v58 = vld [vmem:[#allocation3 + $0x158] sm:$0xff] }
 0x255   : > { %v3550_v59 = vshll.u32 %v3457_v6, 16  ;;  %v3868_v42 = vshrl.u32 %v3749_v63, 16  ;;  %v3437_v38 = vsel %vm9513_vm10, 0, %v3436_v28  ;;  %v3862_v44 = vrot.slane %v3861_v1, 4  ;;  %v9923_v29 = vld [vmem:[%s10939_s2] ss:$0 sm:$0xff]  ;;  %5269 = vmatpush.bf16.msrb.mxu3 %v8095_v58 }
 0x256   : > { %v4313_v30 = vsel %vm8636_vm5, %v7561_v9, %v4312_v31  ;;  %v4314_v18 = vrot.slane %v4312_v31, 4  ;;  %v3549_v40 = vrot.slane %v3547_v47, 7  ;;  %v3866_v20 = vrot.slane %v3864_v61, 5  ;;  %3438 = vst [vmem:[#allocation2 + $0x50] sm:$0x1] %v3437_v38  ;;  %v2932_v27 = vpop.f32.mrf.mxu3  ;;  %v8087_v9 = vld [vmem:[#allocation3 + $0x118] sm:$0xff] }
 0x257   : > { %v3312_v25 = vmax.f32 %v3292_v50, 0.0  ;;  %v4368_v54 = vunpack.c.l.b16 %v4313_v30  ;;  %v3211_v32 = vpop.f32.mrf.mxu0  ;;  %v3870_v23 = vrot.slane %v3868_v42, 4  ;;  %v3874_v41 = vshll.u32 %v3777_v56, 16  ;;  %v9940_v61 = vld [vmem:[%s10940_s3] ss:$0 sm:$0xff]  ;;  %5019 = vmatpush.bf16.msrb.mxu2 %v8087_v9  ;;  %v2253_v9 = vpop.f32.mrf.mxu1 }
 0x258   : > { %v4316_v8 = vsel %vm8636_vm5, %v4314_v18, %v4315_v49  ;;  %v3552_v26 = vor.u32 %v3550_v59, %v3549_v40  ;;  %v3554_v10 = vrot.slane %v3549_v40, 4  ;;  %v3245_v37 = vadd.f32 %v3211_v32, %v9768_v0  ;;  %v3407_v47 = vld [vmem:[#allocation2 + $0x54] sm:$0x1] }
 0x259   : > { %v4369_v7 = vunpack.c.l.b16 %v4316_v8  ;;  %v3373_v45 = vsel %vm9905_vm9, %v3312_v25, 0.0  ;;  %v9927_v0 = vadd.s32 6, %v9553_v48  ;;  %v3871_v13 = vor.u32 %v3870_v23, %v3866_v20 }
 0x25a   : > { %v3553_v55 = vsel %vm9657_vm6, %v3545_v34, %v3552_v26  ;;  %v3705_v52 = vsel %vm9502_vm8, %v3554_v10, %v3704_v39  ;;  %v3458_v19 = vpack.c.bf16 %v3373_v45, %v3373_v45  ;;  %v3269_v51 = vmul.f32 %v9923_v29, %v3245_v37  ;;  %v3750_v33 = vld [vmem:[#allocation2 + $0x30] sm:$0xf] }
 0x25b   : > { %v4381_v2 = vpack.c.b16 %v4369_v7, %v4368_v54  ;;  %3703 = vst [vmem:[#allocation2 + $0x34] sm:$0xf] %v3553_v55  ;;  %v4730_v11 = vshll.u32 %v9888_v4, 16  ;;  %v9931_v6 = vadd.f32 %v2930_v3, %v9881_v62  ;;  %v3867_v63 = vsel %vm8629_vm4, %v3862_v44, %v3866_v20  ;;  %v4269_v40 = vld [vmem:[#allocation2 + $0x30] sm:$0xe] }
 0x25c   : > { %3706 = vst [vmem:[#allocation2 + $0x38] sm:$0x1] %v3705_v52  ;;  %v3556_v15 = vshrl.u32 %v3458_v19, 16  ;;  %v9935_v56 = vrot.slane %v4727_v12, 4  ;;  %v3559_v31 = vshll.u32 %v3458_v19, 16  ;;  %v3293_v62 = vadd.f32 %v9940_v61, %v3269_v51  ;;  %v8079_v51 = vld [vmem:[#allocation3 + $0xd8] sm:$0xff] }
 0x25d   : > { %4465 = vmatmul.bf16.gmra.mxu3 %v4381_v2  ;;  %v3872_v3 = vrot.slane %v3871_v13, 4  ;;  %v3876_v34 = vrot.slane %v3874_v41, 5  ;;  %v3408_v12 = vsel %vm9502_vm8, 0, %v3407_v47  ;;  %v3879_v50 = vshrl.u32 %v3750_v33, 16  ;;  %4641 = vmatpush.bf16.msrb.mxu1 %v8079_v51  ;;  %v3711_v47 = vld [vmem:[#allocation2 + $0x44] sm:$0x1] }
 0x25e   : > { %v9943_v1 = vrot.slane %v3556_v15, 7  ;;  %v3882_v30 = vshll.u32 %v3750_v33, 16  ;;  %v9948_v18 = vadd.f32 %v2932_v27, %v9893_v36  ;;  %v3313_v49 = vmax.f32 %v3293_v62, 0.0  ;;  %3409 = vst [vmem:[#allocation2 + $0x54] sm:$0x1] %v3408_v12 }
 0x25f   : > { %vm3339_vm11 = vcmp.ge.s32.totalorder %v9927_v0, 0  ;;  %v3877_v28 = vsel %vm8629_vm4, %v3872_v3, %v3876_v34  ;;  %v3214_v20 = vpop.f32.mrf.mxu0  ;;  %v3997_v42 = vunpack.c.l.b16 %v3867_v63  ;;  %v3881_v25 = vrot.slane %v3879_v50, 4  ;;  %v3439_v63 = vld [vmem:[#allocation2 + $0x5c] sm:$0x1]  ;;  %v3410_v51 = vld [vmem:[#allocation2 + $0x60] sm:$0x1] }
 0x260   : > { %v3561_v59 = vor.u32 %v3559_v31, %v9943_v1  ;;  %v3998_v39 = vunpack.c.l.b16 %v3877_v28  ;;  %v3374_v8 = vsel %vm9905_vm9, %v3313_v49, 0.0  ;;  %v3246_v36 = vadd.f32 %v3214_v20, %v9770_v53 }
 0x261   : > { %vm3349_vm12 = vcmp.lt.s32.totalorder %v9927_v0, 16  ;;  %v3884_v54 = vrot.slane %v3882_v30, 5  ;;  %v3459_v26 = vpack.c.bf16 %v3374_v8, %v3374_v8  ;;  %v7562_v45 = vrot.slane %v4269_v40, 9 }
 0x262   : > { %v3708_v38 = vsel %vm9606_vm15, %v3561_v59, %v3707_v46  ;;  %v4010_v10 = vpack.c.b16 %v3998_v39, %v3997_v42  ;;  %v8040_v32 = vld [vmem:[#allocation2 + $0x30] sm:$0xff]  ;;  %v3270_v37 = vmul.f32 %v9923_v29, %v3246_v36  ;;  %v3562_v53 = vrot.slane %v9943_v1, 4  ;;  %vm9969_vm13 = vmand %vm3339_vm11, %vm3349_vm12 }
 0x263   : > { %v8102_v7 = vld [vmem:[#allocation2 + $0x30] sm:$0xff]  ;;  %3709 = vst [vmem:[#allocation2 + $0x3c] sm:$0xf] %v3708_v38  ;;  %v3778_v44 = vld [vmem:[#allocation2 + $0x38] sm:$0x1]  ;;  %v3885_v41 = vor.u32 %v3884_v54, %v3881_v25  ;;  %v3564_v52 = vshrl.u32 %v3459_v26, 16  ;;  %4244 = vmatmul.bf16.gmra.mxu2 %v8040_v32 }
 0x264   : > { %v3751_v23 = vld [vmem:[#allocation2 + $0x34] sm:$0xf]  ;;  %v3567_v19 = vshll.u32 %v3459_v26, 16  ;;  %4094 = vmatmul.bf16.gmra.mxu1 %v4010_v10  ;;  %v3294_v13 = vadd.f32 %v9940_v61, %v3270_v37  ;;  %5478 = vmatmul.bf16.gmra.mxu0 %v8102_v7  ;;  %v4322_v15 = vrot.slane %v3778_v44, 5  ;;  %v3898_v12 = vshll.u32 %v3778_v44, 16  ;;  %v2481_v37 = vpop.f32.mrf.mxu2 }
 0x265   : > { %v4319_v17 = vrot.slane %v3751_v23, 5  ;;  %v3888_v55 = vshll.u32 %v3751_v23, 16  ;;  %v3892_v2 = vshrl.u32 %v3751_v23, 16  ;;  %v3566_v58 = vrot.slane %v3564_v52, 7  ;;  %v9977_v59 = vld [vmem:[#allocation2 + $0x10] sm:$0xf] }
 0x266   : > { %v3886_v62 = vrot.slane %v3885_v41, 4  ;;  %v3314_v1 = vmax.f32 %v3294_v13, 0.0  ;;  %v3440_v50 = vsel %vm9513_vm10, 0, %v3439_v63  ;;  %v3900_v7 = vrot.slane %v3898_v12, 5  ;;  %v11018_v23 = vld [vmem:[#allocation25_spill] sm:$0xff]  ;;  %v2255_v12 = vpop.f32.mrf.mxu1 }
 0x267   : > { %v4320_v33 = vsel %vm8636_vm5, %v7562_v45, %v4319_v17  ;;  %v4321_v27 = vrot.slane %v4319_v17, 4  ;;  %v3890_v3 = vrot.slane %v3888_v55, 5  ;;  %v3894_v34 = vrot.slane %v3892_v2, 4  ;;  %v3216_v0 = vpop.f32.mrf.mxu0  ;;  %3441 = vst [vmem:[#allocation2 + $0x5c] sm:$0x1] %v3440_v50  ;;  %v8086_v55 = vld [vmem:[#allocation3 + $0x110] sm:$0xff] }
 0x268   : > { %v3569_v30 = vor.u32 %v3567_v19, %v3566_v58  ;;  %v3571_v49 = vrot.slane %v3566_v58, 4  ;;  %v4370_v28 = vunpack.c.l.b16 %v4320_v33  ;;  %v3375_v20 = vsel %vm9969_vm13, %v3314_v1, 0.0  ;;  %v9997_v33 = vld [vmem:[#allocation3 + $0x1f8] sm:$0xff]  ;;  %5020 = vmatpush.bf16.msrb.mxu2 %v8086_v55  ;;  %v3442_v55 = vld [vmem:[#allocation2 + $0x68] sm:$0x1] }
 0x269   : > { %v4323_v46 = vsel %vm8636_vm5, %v4321_v27, %v4322_v15  ;;  %v3247_v42 = vadd.f32 %v3216_v0, %v9804_v16  ;;  %v3891_v39 = vsel %vm8629_vm4, %v3886_v62, %v3890_v3  ;;  %v3895_v25 = vor.u32 %v3894_v34, %v3890_v3  ;;  %v11019_v62 = vld [vmem:[#allocation26_spill] sm:$0xff]  ;;  %v3714_v34 = vld [vmem:[#allocation2 + $0x48] sm:$0xf]  ;;  %5838 = vmatpush.bf16.msra.mxu0 %v9997_v33 }
 0x26a   : > { %v4371_v40 = vunpack.c.l.b16 %v4323_v46  ;;  %v3570_v8 = vsel %vm9657_vm6, %v3562_v53, %v3569_v30  ;;  %v3712_v36 = vsel %vm9502_vm8, %v3571_v49, %v3711_v47  ;;  %v3460_v54 = vpack.c.bf16 %v3375_v20, %v3375_v20  ;;  %v3752_v26 = vld [vmem:[#allocation2 + $0x3c] sm:$0xf]  ;;  %v8094_v53 = vld [vmem:[#allocation3 + $0x150] sm:$0xff] }
 0x26b   : > { %3710 = vst [vmem:[#allocation2 + $0x40] sm:$0xf] %v3570_v8  ;;  %v3271_v10 = vmul.f32 %v9923_v29, %v3247_v42  ;;  %v3896_v32 = vrot.slane %v3895_v25, 4  ;;  %v4736_v16 = vshll.u32 %v9977_v59, 16  ;;  %v2276_v45 = vadd.f32 %v2253_v9, %v11018_v23  ;;  %5270 = vmatpush.bf16.msrb.mxu3 %v8094_v53  ;;  %v4270_v1 = vld [vmem:[#allocation2 + $0x3c] sm:$0xe] }
 0x26c   : > { %v4382_v38 = vpack.c.b16 %v4371_v40, %v4370_v28  ;;  %3713 = vst [vmem:[#allocation2 + $0x44] sm:$0x1] %v3712_v36  ;;  %v3573_v44 = vshrl.u32 %v3460_v54, 16  ;;  %v9992_v17 = vadd.s32 7, %v9553_v48  ;;  %v3999_v41 = vunpack.c.l.b16 %v3891_v39  ;;  %v10017_v20 = vld [vmem:[#allocation3 + $0x1f0] sm:$0xff]  ;;  %v10034_v53 = vld [vmem:[#allocation3 + $0x1e8] sm:$0xff] }
 0x26d   : > { %v3576_v52 = vshll.u32 %v3460_v54, 16  ;;  %v3295_v19 = vadd.f32 %v9940_v61, %v3271_v10  ;;  %v3901_v2 = vsel %vm8629_vm4, %v3896_v32, %v3900_v7  ;;  %v3903_v13 = vshrl.u32 %v3752_v26, 16  ;;  %5839 = vmatpush.bf16.msra.mxu0 %v10017_v20 }
 0x26e   : > { %4470 = vmatmul.bf16.gmra.mxu3 %v4382_v38  ;;  %v9999_v27 = vrot.slane %v3573_v44, 7  ;;  %v4000_v15 = vunpack.c.l.b16 %v3901_v2  ;;  %v3411_v63 = vsel %vm9502_vm8, 0, %v3410_v51  ;;  %v3906_v9 = vshll.u32 %v3752_v26, 16 }
 0x26f   : > { %v10003_v58 = vadd.f32 %v2481_v37, %v2276_v45  ;;  %v1983_v3 = vadd.f32 %v11019_v62, %v9638_v60  ;;  %v3315_v47 = vmax.f32 %v3295_v19, 0.0  ;;  %v10010_v46 = vrot.slane %v4730_v11, 5  ;;  %v3219_v30 = vpop.f32.mrf.mxu0  ;;  %3412 = vst [vmem:[#allocation2 + $0x60] sm:$0x1] %v3411_v63 }
 0x270   : > { %v3578_v50 = vor.u32 %v3576_v52, %v9999_v27  ;;  %v4011_v49 = vpack.c.b16 %v4000_v15, %v3999_v41  ;;  %v3905_v0 = vrot.slane %v3903_v13, 4  ;;  %v3908_v28 = vrot.slane %v3906_v9, 5 }
 0x271   : > { %v3376_v60 = vsel %vm9969_vm13, %v3315_v47, 0.0  ;;  %v3248_v40 = vadd.f32 %v3219_v30, %v9876_v35  ;;  %vm3340_vm14 = vcmp.ge.s32.totalorder %v9992_v17, 0  ;;  %v10019_v4 = vrot.slane %v4736_v16, 5  ;;  %v8078_v16 = vld [vmem:[#allocation3 + $0xd0] sm:$0xff]  ;;  %5840 = vmatpush.bf16.msra.mxu0 %v10034_v53 }
 0x272   : > { %v3715_v11 = vsel %vm9606_vm15, %v3578_v50, %v3714_v34  ;;  %v3461_v42 = vpack.c.bf16 %v3376_v60, %v3376_v60  ;;  %vm3350_vm0 = vcmp.lt.s32.totalorder %v9992_v17, 16  ;;  %v8041_v39 = vld [vmem:[#allocation2 + $0x3c] sm:$0xff]  ;;  %v7563_v36 = vrot.slane %v4270_v1, 9  ;;  %4642 = vmatpush.bf16.msrb.mxu1 %v8078_v16 }
 0x273   : > { %v8103_v25 = vld [vmem:[#allocation2 + $0x3c] sm:$0xff]  ;;  %v2277_v31 = vadd.f32 %v2255_v12, %v1983_v3  ;;  %3716 = vst [vmem:[#allocation2 + $0x48] sm:$0xf] %v3715_v11  ;;  %v3272_v35 = vmul.f32 %v9923_v29, %v3248_v40  ;;  %v10025_v54 = vld [vmem:[#allocation2 + $0x44] sm:$0x1]  ;;  %v3579_v10 = vrot.slane %v9999_v27, 4  ;;  %4249 = vmatmul.bf16.gmra.mxu2 %v8041_v39  ;;  %v3909_v7 = vor.u32 %v3908_v28, %v3905_v0  ;;  %vm10040_vm1 = vmand %vm3340_vm14, %vm3350_vm0  ;;  %v2483_v12 = vpop.f32.mrf.mxu2 }
 0x274   : > { %v3753_v8 = vld [vmem:[#allocation2 + $0x40] sm:$0xf]  ;;  %v3581_v32 = vshrl.u32 %v3461_v42, 16  ;;  %4099 = vmatmul.bf16.gmra.mxu1 %v4011_v49  ;;  %v4740_v23 = vshrl.u32 %v9977_v59, 16  ;;  %5483 = vmatmul.bf16.gmra.mxu0 %v8103_v25  ;;  %v4329_v41 = vrot.slane %v10025_v54, 5  ;;  %v3584_v19 = vshll.u32 %v3461_v42, 16 }
 0x275   : > { %v4326_v38 = vrot.slane %v3753_v8, 5  ;;  %v3912_v26 = vshll.u32 %v3753_v8, 16  ;;  %v3296_v45 = vadd.f32 %v9940_v61, %v3272_v35  ;;  %v3916_v13 = vshrl.u32 %v3753_v8, 16  ;;  %v3718_v27 = vld [vmem:[#allocation2 + $0x50] sm:$0x1]  ;;  %v10053_v28 = vld [vmem:[#allocation3 + $0x1e0] sm:$0xff] }
 0x276   : > { %v3583_v52 = vrot.slane %v3581_v32, 7  ;;  %v3443_v62 = vsel %vm9513_vm10, 0, %v3442_v55  ;;  %v3910_v49 = vrot.slane %v3909_v7, 4  ;;  %v3922_v0 = vshll.u32 %v10025_v54, 16  ;;  %5841 = vmatpush.bf16.msra.mxu0 %v10053_v28 }
 0x277   : > { %v4327_v37 = vsel %vm8636_vm5, %v7563_v36, %v4326_v38  ;;  %v4328_v44 = vrot.slane %v4326_v38, 4  ;;  %v3914_v51 = vrot.slane %v3912_v26, 5  ;;  %v3316_v15 = vmax.f32 %v3296_v45, 0.0  ;;  %v3221_v34 = vpop.f32.mrf.mxu0  ;;  %3444 = vst [vmem:[#allocation2 + $0x68] sm:$0x1] %v3443_v62  ;;  %v8085_v26 = vld [vmem:[#allocation3 + $0x108] sm:$0xff] }
 0x278   : > { %v4372_v9 = vunpack.c.l.b16 %v4327_v37  ;;  %v3586_v3 = vor.u32 %v3584_v19, %v3583_v52  ;;  %v3588_v17 = vrot.slane %v3583_v52, 4  ;;  %v3918_v1 = vrot.slane %v3916_v13, 4  ;;  %5021 = vmatpush.bf16.msrb.mxu2 %v8085_v26 }
 0x279   : > { %v4330_v63 = vsel %vm8636_vm5, %v4328_v44, %v4329_v41  ;;  %v3377_v50 = vsel %vm10040_vm1, %v3316_v15, 0.0  ;;  %v3249_v30 = vadd.f32 %v3221_v34, %v9879_v22  ;;  %v10061_v25 = vadd.s32 8, %v9553_v48  ;;  %v10073_v44 = vld [vmem:[#allocation3 + $0x1d8] sm:$0xff] }
 0x27a   : > { %v4373_v47 = vunpack.c.l.b16 %v4330_v63  ;;  %v3587_v60 = vsel %vm9657_vm6, %v3579_v10, %v3586_v3  ;;  %v3719_v40 = vsel %vm9502_vm8, %v3588_v17, %v3718_v27  ;;  %v3462_v11 = vpack.c.bf16 %v3377_v50, %v3377_v50  ;;  %v3754_v8 = vld [vmem:[#allocation2 + $0x48] sm:$0xf]  ;;  %v8093_v10 = vld [vmem:[#allocation3 + $0x148] sm:$0xff]  ;;  %v3721_v41 = vld [vmem:[#allocation2 + $0x54] sm:$0xf]  ;;  %5842 = vmatpush.bf16.msra.mxu0 %v10073_v44  ;;  %v10092_v50 = vpop.f32.mrf.mxu3 }
 0x27b   : > { %3717 = vst [vmem:[#allocation2 + $0x4c] sm:$0xf] %v3587_v60  ;;  %v3273_v39 = vmul.f32 %v9923_v29, %v3249_v30  ;;  %v3919_v22 = vor.u32 %v3918_v1, %v3914_v51  ;;  %v10064_v36 = vrot.slane %v4740_v23, 4  ;;  %v10066_v35 = vadd.f32 %v2483_v12, %v2277_v31  ;;  %v3413_v23 = vld [vmem:[#allocation2 + $0x6c] sm:$0x1]  ;;  %5271 = vmatpush.bf16.msrb.mxu3 %v8093_v10 }
 0x27c   : > { %v4383_v42 = vpack.c.b16 %v4373_v47, %v4372_v9  ;;  %3720 = vst [vmem:[#allocation2 + $0x50] sm:$0x1] %v3719_v40  ;;  %v3590_v54 = vshrl.u32 %v3462_v11, 16  ;;  %v3915_v38 = vsel %vm8629_vm4, %v3910_v49, %v3914_v51  ;;  %v4733_v32 = vor.u32 %v10010_v46, %v9935_v56  ;;  %v4271_v27 = vld [vmem:[#allocation2 + $0x48] sm:$0xe] }
 0x27d   : > { %v3593_v7 = vshll.u32 %v3462_v11, 16  ;;  %v3297_v16 = vadd.f32 %v9940_v61, %v3273_v39  ;;  %v3920_v45 = vrot.slane %v3919_v22, 4  ;;  %v3924_v37 = vrot.slane %v3922_v0, 5  ;;  %v10090_v12 = vld [vmem:[#allocation3 + $0x1d0] sm:$0xff] }
 0x27e   : > { %4475 = vmatmul.bf16.gmra.mxu3 %v4383_v42  ;;  %v10075_v31 = vrot.slane %v3590_v54, 7  ;;  %v3414_v55 = vsel %vm9502_vm8, 0, %v3413_v23  ;;  %v3927_v52 = vshrl.u32 %v3754_v8, 16  ;;  %v3930_v19 = vshll.u32 %v3754_v8, 16  ;;  %5843 = vmatpush.bf16.msra.mxu0 %v10090_v12  ;;  %v8130_v56 = vld [vmem:[#allocation3 + $0x230] sm:$0xff] }
 0x27f   : > { %v3317_v51 = vmax.f32 %v3297_v16, 0.0  ;;  %vm3341_vm2 = vcmp.ge.s32.totalorder %v10061_v25, 0  ;;  %v3925_v13 = vsel %vm8629_vm4, %v3920_v45, %v3924_v37  ;;  %3415 = vst [vmem:[#allocation2 + $0x6c] sm:$0x1] %v3414_v55  ;;  %v4743_v15 = vor.u32 %v10064_v36, %v10019_v4  ;;  %v3224_v9 = vpop.f32.mrf.mxu0  ;;  %v8084_v16 = vld [vmem:[#allocation3 + $0x100] sm:$0xff] }
 0x280   : > { %v3595_v63 = vor.u32 %v3593_v7, %v10075_v31  ;;  %v4001_v62 = vunpack.c.l.b16 %v3915_v38  ;;  %v4002_v3 = vunpack.c.l.b16 %v3925_v13  ;;  %v3929_v17 = vrot.slane %v3927_v52, 4  ;;  %v8077_v7 = vld [vmem:[#allocation3 + $0xc8] sm:$0xff]  ;;  %v3445_v55 = vld [vmem:[#allocation2 + $0x74] sm:$0x1]  ;;  %5022 = vmatpush.bf16.msrb.mxu2 %v8084_v16  ;;  %v10162_v36 = vld [vmem:[%s10944_s7 + $0x38] sm:$0xff] }
 0x281   : > { %v3378_v34 = vsel %vm10040_vm1, %v3317_v51, 0.0  ;;  %v3250_v47 = vadd.f32 %v3224_v9, %v9931_v6  ;;  %vm3351_vm3 = vcmp.lt.s32.totalorder %v10061_v25, 16  ;;  %v3932_v1 = vrot.slane %v3930_v19, 5  ;;  %v10102_v52 = vld [vmem:[#allocation3 + $0x1c8] sm:$0xff]  ;;  %4643 = vmatpush.bf16.msrb.mxu1 %v8077_v7 }
 0x282   : > { %v3722_v30 = vsel %vm9606_vm15, %v3595_v63, %v3721_v41  ;;  %v3463_v49 = vpack.c.bf16 %v3378_v34, %v3378_v34  ;;  %v4012_v0 = vpack.c.b16 %v4002_v3, %v4001_v62  ;;  %v8042_v60 = vld [vmem:[#allocation2 + $0x48] sm:$0xff]  ;;  %v7564_v42 = vrot.slane %v4271_v27, 9  ;;  %vm10108_vm7 = vmand %vm3341_vm2, %vm3351_vm3  ;;  %v3725_v63 = vld [vmem:[#allocation2 + $0x5c] sm:$0x1]  ;;  %5844 = vmatpush.bf16.msra.mxu0 %v10102_v52 }
 0x283   : > { %v8104_v40 = vld [vmem:[#allocation2 + $0x48] sm:$0xff]  ;;  %3723 = vst [vmem:[#allocation2 + $0x54] sm:$0xf] %v3722_v30  ;;  %v3274_v2 = vmul.f32 %v9923_v29, %v3250_v47  ;;  %v3780_v6 = vld [vmem:[#allocation2 + $0x50] sm:$0x1]  ;;  %v3933_v22 = vor.u32 %v3932_v1, %v3929_v17  ;;  %v3596_v54 = vrot.slane %v10075_v31, 4  ;;  %4254 = vmatmul.bf16.gmra.mxu2 %v8042_v60 }
 0x284   : > { %v3755_v11 = vld [vmem:[#allocation2 + $0x4c] sm:$0xf]  ;;  %v3598_v38 = vshrl.u32 %v3463_v49, 16  ;;  %v3601_v26 = vshll.u32 %v3463_v49, 16  ;;  %4104 = vmatmul.bf16.gmra.mxu1 %v4012_v0  ;;  %5488 = vmatmul.bf16.gmra.mxu0 %v8104_v40  ;;  %v4336_v41 = vrot.slane %v3780_v6, 5  ;;  %v3946_v3 = vshll.u32 %v3780_v6, 16 }
 0x285   : > { %v4333_v39 = vrot.slane %v3755_v11, 5  ;;  %v3936_v8 = vshll.u32 %v3755_v11, 16  ;;  %v3940_v10 = vshrl.u32 %v3755_v11, 16  ;;  %v3298_v45 = vadd.f32 %v9940_v61, %v3274_v2  ;;  %v10117_v49 = vld [vmem:[#allocation2 + $0x14] sm:$0x1] }
 0x286   : > { %v3600_v19 = vrot.slane %v3598_v38, 7  ;;  %v3934_v51 = vrot.slane %v3933_v22, 4  ;;  %v3446_v17 = vsel %vm9513_vm10, 0, %v3445_v55  ;;  %v3948_v38 = vrot.slane %v3946_v3, 5 }
 0x287   : > { %v4334_v37 = vsel %vm8636_vm5, %v7564_v42, %v4333_v39  ;;  %v4335_v23 = vrot.slane %v4333_v39, 4  ;;  %v3938_v13 = vrot.slane %v3936_v8, 5  ;;  %v3942_v27 = vrot.slane %v3940_v10, 4  ;;  %v3226_v47 = vpop.f32.mrf.mxu0  ;;  %3447 = vst [vmem:[#allocation2 + $0x74] sm:$0x1] %v3446_v17  ;;  %v2937_v10 = vpop.f32.mrf.mxu3 }
 0x288   : > { %v3318_v9 = vmax.f32 %v3298_v45, 0.0  ;;  %v3603_v25 = vor.u32 %v3601_v26, %v3600_v19  ;;  %v3605_v34 = vrot.slane %v3600_v19, 4  ;;  %v4374_v1 = vunpack.c.l.b16 %v4334_v37  ;;  %v8092_v26 = vld [vmem:[#allocation3 + $0x140] sm:$0xff]  ;;  %v3728_v17 = vld [vmem:[#allocation2 + $0x60] sm:$0xf] }
 0x289   : > { %v4337_v62 = vsel %vm8636_vm5, %v4335_v23, %v4336_v41  ;;  %v3251_v60 = vadd.f32 %v3226_v47, %v9948_v18  ;;  %v3939_v40 = vsel %vm8629_vm4, %v3934_v51, %v3938_v13  ;;  %v3943_v21 = vor.u32 %v3942_v27, %v3938_v13  ;;  %5272 = vmatpush.bf16.msrb.mxu3 %v8092_v26  ;;  %v8076_v19 = vld [vmem:[#allocation3 + $0xc0] sm:$0xff]  ;;  %v8131_v13 = vld [vmem:[#allocation3 + $0x238] sm:$0xff] }
 0x28a   : > { %v4375_v30 = vunpack.c.l.b16 %v4337_v62  ;;  %v3379_v0 = vsel %vm10108_vm7, %v3318_v9, 0.0  ;;  %v3604_v11 = vsel %vm9657_vm6, %v3596_v54, %v3603_v25  ;;  %v3726_v42 = vsel %vm9502_vm8, %v3605_v34, %v3725_v63  ;;  %v3756_v39 = vld [vmem:[#allocation2 + $0x54] sm:$0xf]  ;;  %v10136_v51 = vld [vmem:[#allocation3 + $0x1c0] sm:$0xff]  ;;  %4644 = vmatpush.bf16.msrb.mxu1 %v8076_v19  ;;  %8149 = vmatpush.bf16.msra.mxu2 %v8131_v13  ;;  %v8129_v19 = vld [vmem:[#allocation3 + $0x228] sm:$0xff] }
 0x28b   : > { %v3464_v2 = vpack.c.bf16 %v3379_v0, %v3379_v0  ;;  %3724 = vst [vmem:[#allocation2 + $0x58] sm:$0xf] %v3604_v11  ;;  %v3275_v22 = vmul.f32 %v9923_v29, %v3251_v60  ;;  %v3944_v8 = vrot.slane %v3943_v21, 4  ;;  %v4746_v18 = vshll.u32 %v10117_v49, 16  ;;  %v4272_v34 = vld [vmem:[#allocation2 + $0x54] sm:$0xe]  ;;  %5845 = vmatpush.bf16.msra.mxu0 %v10136_v51 }
 0x28c   : > { %v4384_v6 = vpack.c.b16 %v4375_v30, %v4374_v1  ;;  %3727 = vst [vmem:[#allocation2 + $0x5c] sm:$0x1] %v3726_v42  ;;  %v10131_v54 = vadd.s32 9, %v9553_v48  ;;  %v3951_v16 = vshrl.u32 %v3756_v39, 16  ;;  %v3954_v45 = vshll.u32 %v3756_v39, 16 }
 0x28d   : > { %v3607_v7 = vshrl.u32 %v3464_v2, 16  ;;  %v3610_v37 = vshll.u32 %v3464_v2, 16  ;;  %v3299_v23 = vadd.f32 %v9940_v61, %v3275_v22  ;;  %v3949_v41 = vsel %vm8629_vm4, %v3944_v8, %v3948_v38  ;;  %8157 = vmatpush.bf16.msra.mxu3 %v10162_v36 }
 0x28e   : > { %4480 = vmatmul.bf16.gmra.mxu3 %v4384_v6  ;;  %v4003_v55 = vunpack.c.l.b16 %v3939_v40  ;;  %v4004_v63 = vunpack.c.l.b16 %v3949_v41  ;;  %v3953_v9 = vrot.slane %v3951_v16, 4  ;;  %v3956_v48 = vrot.slane %v3954_v45, 5  ;;  %8141 = vmatpush.bf16.msra.mxu1 %v9997_v33 }
 0x28f   : > { %v10138_v27 = vrot.slane %v3607_v7, 7  ;;  %v2958_v62 = vadd.f32 %v10092_v50, %v10003_v58  ;;  %v10143_v3 = vadd.f32 %v2937_v10, %v10066_v35  ;;  %v3319_v25 = vmax.f32 %v3299_v23, 0.0  ;;  %v3229_v30 = vpop.f32.mrf.mxu0  ;;  %6088 = vmatpush.bf16.msrb.mxu0 %v8131_v13  ;;  %8150 = vmatpush.bf16.msra.mxu2 %v8130_v56  ;;  %v3732_v13 = vld [vmem:[#allocation2 + $0x68] sm:$0x1] }
 0x290   : > { %v10148_v47 = vrot.slane %v4743_v15, 4  ;;  %v4013_v0 = vpack.c.b16 %v4004_v63, %v4003_v55  ;;  %v10155_v58 = vrot.slane %v4733_v32, 4  ;;  %v10157_v35 = vrot.slane %v4746_v18, 5 }
 0x291   : > { %v3612_v1 = vor.u32 %v3610_v37, %v10138_v27  ;;  %v3380_v15 = vsel %vm10108_vm7, %v3319_v25, 0.0  ;;  %v3252_v50 = vadd.f32 %v3229_v30, %v2958_v62  ;;  %vm3342_vm10 = vcmp.ge.s32.totalorder %v10131_v54, 0  ;;  %8158 = vmatpush.bf16.msra.mxu3 %v10236_v5 }
 0x292   : > { %vm3352_vm9 = vcmp.lt.s32.totalorder %v10131_v54, 16  ;;  %v3465_v32 = vpack.c.bf16 %v3380_v15, %v3380_v15  ;;  %v8043_v60 = vld [vmem:[#allocation2 + $0x54] sm:$0xff]  ;;  %v7565_v11 = vrot.slane %v4272_v34, 9  ;;  %v3957_v42 = vor.u32 %v3956_v48, %v3953_v9  ;;  %8142 = vmatpush.bf16.msra.mxu1 %v10017_v20 }
 0x293   : > { %v3729_v46 = vsel %vm9606_vm15, %v3612_v1, %v3728_v17  ;;  %v8105_v40 = vld [vmem:[#allocation2 + $0x54] sm:$0xff]  ;;  %v3276_v31 = vmul.f32 %v9923_v29, %v3252_v50  ;;  %v3781_v2 = vld [vmem:[#allocation2 + $0x5c] sm:$0x1]  ;;  %v4749_v33 = vsel %vm8629_vm4, %v10148_v47, %v10157_v35  ;;  %v3613_v22 = vrot.slane %v10138_v27, 4  ;;  %4259 = vmatmul.bf16.gmra.mxu2 %v8043_v60  ;;  %vm10185_vm11 = vmand %vm3342_vm10, %vm3352_vm9  ;;  %6089 = vmatpush.bf16.msrb.mxu0 %v8130_v56 }
 0x294   : > { %v3757_v21 = vld [vmem:[#allocation2 + $0x58] sm:$0xf]  ;;  %3730 = vst [vmem:[#allocation2 + $0x60] sm:$0xf] %v3729_v46  ;;  %v3615_v8 = vshrl.u32 %v3465_v32, 16  ;;  %4109 = vmatmul.bf16.gmra.mxu1 %v4013_v0  ;;  %v4343_v38 = vrot.slane %v3781_v2, 5  ;;  %5493 = vmatmul.bf16.gmra.mxu0 %v8105_v40 }
 0x295   : > { %v4340_v6 = vrot.slane %v3757_v21, 5  ;;  %v3960_v39 = vshll.u32 %v3757_v21, 16  ;;  %v3964_v26 = vshrl.u32 %v3757_v21, 16  ;;  %v3300_v18 = vadd.f32 %v9940_v61, %v3276_v31  ;;  %v10192_v47 = vld [vmem:[#allocation2 + $0x1c] sm:$0xf]  ;;  %8151 = vmatpush.bf16.msra.mxu2 %v8129_v19 }
 0x296   : > { %v3617_v45 = vrot.slane %v3615_v8, 7  ;;  %v3618_v37 = vshll.u32 %v3465_v32, 16  ;;  %v3958_v41 = vrot.slane %v3957_v42, 4  ;;  %v3970_v48 = vshll.u32 %v3781_v2, 16  ;;  %v4705_v46 = vld [vmem:[#allocation2 + $0x18] sm:$0xf]  ;;  %8143 = vmatpush.bf16.msra.mxu1 %v10034_v53 }
 0x297   : > { %v4341_v10 = vsel %vm8636_vm5, %v7565_v11, %v4340_v6  ;;  %v4342_v7 = vrot.slane %v4340_v6, 4  ;;  %v3962_v16 = vrot.slane %v3960_v39, 5  ;;  %v3966_v55 = vrot.slane %v3964_v26, 4  ;;  %v3231_v54 = vpop.f32.mrf.mxu0  ;;  %6090 = vmatpush.bf16.msrb.mxu0 %v8129_v19  ;;  %v8128_v32 = vld [vmem:[#allocation3 + $0x220] sm:$0xff] }
 0x298   : > { %v3320_v27 = vmax.f32 %v3300_v18, 0.0  ;;  %v4376_v9 = vunpack.c.l.b16 %v4341_v10  ;;  %v3620_v62 = vor.u32 %v3618_v37, %v3617_v45  ;;  %v3622_v17 = vrot.slane %v3617_v45, 4  ;;  %v5080_v18 = vld [vmem:[#allocation2 + $0xc] sm:$0xe] }
 0x299   : > { %v4344_v63 = vsel %vm8636_vm5, %v4342_v7, %v4343_v38  ;;  %v3967_v34 = vor.u32 %v3966_v55, %v3962_v16  ;;  %v3253_v30 = vadd.f32 %v3231_v54, %v10143_v3  ;;  %v3963_v20 = vsel %vm8629_vm4, %v3958_v41, %v3962_v16  ;;  %8152 = vmatpush.bf16.msra.mxu2 %v8128_v32 }
 0x29a   : > { %v4377_v25 = vunpack.c.l.b16 %v4344_v63  ;;  %v3381_v1 = vsel %vm10185_vm11, %v3320_v27, 0.0  ;;  %v5114_v0 = vrot.slane %v9977_v59, 5  ;;  %v3621_v35 = vsel %vm9657_vm6, %v3613_v22, %v3620_v62  ;;  %8144 = vmatpush.bf16.msra.mxu1 %v10053_v28  ;;  %v8126_v28 = vld [vmem:[#allocation3 + $0x210] sm:$0xff] }
 0x29b   : > { %v3733_v15 = vsel %vm9502_vm8, %v3622_v17, %v3732_v13  ;;  %v3466_v50 = vpack.c.bf16 %v3381_v1, %v3381_v1  ;;  %3731 = vst [vmem:[#allocation2 + $0x64] sm:$0xf] %v3621_v35  ;;  %v3277_v3 = vmul.f32 %v9923_v29, %v3253_v30  ;;  %v3968_v60 = vrot.slane %v3967_v34, 4  ;;  %6091 = vmatpush.bf16.msrb.mxu0 %v8128_v32  ;;  %v8125_v35 = vld [vmem:[#allocation3 + $0x208] sm:$0xff] }
 0x29c   : > { %v4385_v56 = vpack.c.b16 %v4377_v25, %v4376_v9  ;;  %v3972_v40 = vrot.slane %v3970_v48, 5  ;;  %v4760_v21 = vshll.u32 %v10192_v47, 16  ;;  %3734 = vst [vmem:[#allocation2 + $0x68] sm:$0x1] %v3733_v15  ;;  %v4739_v42 = vsel %vm8629_vm4, %v10155_v58, %v10019_v4  ;;  %v8127_v4 = vld [vmem:[#allocation3 + $0x218] sm:$0xff] }
 0x29d   : > { %v3624_v11 = vshrl.u32 %v3466_v50, 16  ;;  %v4936_v31 = vunpack.c.l.b16 %v4749_v33  ;;  %v4764_v2 = vshrl.u32 %v10192_v47, 16  ;;  %v3301_v6 = vadd.f32 %v9940_v61, %v3277_v3  ;;  %v3735_v58 = vld [vmem:[#allocation2 + $0x6c] sm:$0xf]  ;;  %8153 = vmatpush.bf16.msra.mxu2 %v8127_v4  ;;  %v10228_v48 = vld [vmem:[#allocation2 + $0x20] sm:$0x1] }
 0x29e   : > { %4485 = vmatmul.bf16.gmra.mxu3 %v4385_v56  ;;  %v3973_v29 = vsel %vm8629_vm4, %v3968_v60, %v3972_v40  ;;  %v5116_v39 = vrot.slane %v5114_v0, 4  ;;  %v4751_v53 = vshrl.u32 %v4705_v46, 16  ;;  %v3627_v8 = vshll.u32 %v3466_v50, 16  ;;  %8145 = vmatpush.bf16.msra.mxu1 %v10073_v44  ;;  %v10245_v15 = vld [vmem:[#allocation2 + $0x28] sm:$0xf] }
 0x29f   : > { %v10217_v22 = vrot.slane %v3624_v11, 7  ;;  %v4005_v38 = vunpack.c.l.b16 %v3963_v20  ;;  %v4006_v26 = vunpack.c.l.b16 %v3973_v29  ;;  %v3321_v33 = vmax.f32 %v3301_v6, 0.0  ;;  %6092 = vmatpush.bf16.msrb.mxu0 %v8127_v4  ;;  %v3739_v44 = vld [vmem:[#allocation2 + $0x74] sm:$0x1]  ;;  %v10251_v11 = vld [vmem:[#allocation2 + $0x1c] sm:$0xf] }
 0x2a0   : > { %v4754_v10 = vshll.u32 %v4705_v46, 16  ;;  %v10219_v61 = vrot.slane %v4760_v21, 5  ;;  %v4766_v7 = vrot.slane %v4764_v2, 4  ;;  %v4935_v37 = vunpack.c.l.b16 %v4739_v42  ;;  %v8124_v6 = vld [vmem:[#allocation3 + $0x200] sm:$0xff] }
 0x2a1   : > { %v3629_v16 = vor.u32 %v3627_v8, %v10217_v22  ;;  %v4014_v45 = vpack.c.b16 %v4006_v26, %v4005_v38  ;;  %v3382_v41 = vsel %vm10185_vm11, %v3321_v33, 0.0  ;;  %v5117_v55 = vrot.slane %v10117_v49, 5  ;;  %8154 = vmatpush.bf16.msra.mxu2 %v8126_v28 }
 0x2a2   : > { %v3467_v13 = vpack.c.bf16 %v3382_v41, %v3382_v41  ;;  %v4951_v27 = vpack.c.b16 %v4936_v31, %v4935_v37  ;;  %v8106_v63 = vld [vmem:[#allocation2 + $0x60] sm:$0xff]  ;;  %v7694_v9 = vrot.slane %v5080_v18, 9  ;;  %v4753_v23 = vrot.slane %v4751_v53, 4  ;;  %8146 = vmatpush.bf16.msra.mxu1 %v10090_v12  ;;  %v5081_v18 = vld [vmem:[#allocation2 + $0x18] sm:$0xe] }
 0x2a3   : > { %v3736_v19 = vsel %vm9606_vm15, %v3629_v16, %v3735_v58  ;;  %v5118_v62 = vsel %vm8636_vm5, %v5116_v39, %v5117_v55  ;;  %v4756_v17 = vrot.slane %v4754_v10, 5  ;;  %v4767_v49 = vor.u32 %v4766_v7, %v10219_v61  ;;  %6093 = vmatpush.bf16.msrb.mxu0 %v8126_v28  ;;  %v4708_v53 = vld [vmem:[#allocation2 + $0x24] sm:$0xf]  ;;  %v10270_v55 = vld [vmem:[#allocation2 + $0x2c] sm:$0x1] }
 0x2a4   : > { %3737 = vst [vmem:[#allocation2 + $0x6c] sm:$0xf] %v3736_v19  ;;  %v3632_v54 = vshrl.u32 %v3467_v13, 16  ;;  %4114 = vmatmul.bf16.gmra.mxu1 %v4014_v45  ;;  %5023 = vmatmul.bf16.vlgmr.msrb.gmra.mxu2 %v4951_v27  ;;  %v5115_v25 = vsel %vm8636_vm5, %v7694_v9, %v5114_v0  ;;  %v4770_v34 = vshll.u32 %v10228_v48, 16  ;;  %v3635_v30 = vshll.u32 %v3467_v13, 16  ;;  %v8068_v28 = vld [vmem:[#allocation2 + $0xc] sm:$0xff] }
 0x2a5   : > { %5498 = vmatmul.bf16.gmra.mxu0 %v8106_v63  ;;  %v5186_v20 = vunpack.c.l.b16 %v5118_v62  ;;  %v4225_v50 = vpop.f32.mrf.mxu2  ;;  %v4757_v56 = vor.u32 %v4756_v17, %v4753_v23  ;;  %v4768_v46 = vrot.slane %v4767_v49, 4  ;;  %v3630_v59 = vrot.slane %v10217_v22, 4  ;;  %8155 = vmatpush.bf16.msra.mxu2 %v8125_v35  ;;  %v10279_v17 = vld [vmem:[#allocation2 + $0x20] sm:$0x1] }
 0x2a6   : > { %v3634_v1 = vrot.slane %v3632_v54, 7  ;;  %v5185_v3 = vunpack.c.l.b16 %v5115_v25  ;;  %v4772_v60 = vrot.slane %v4770_v34, 5  ;;  %v4784_v40 = vshll.u32 %v10245_v15, 16  ;;  %8147 = vmatpush.bf16.msra.mxu1 %v10102_v52 }
 0x2a7   : > { %v4788_v21 = vshrl.u32 %v10245_v15, 16  ;;  %v5121_v12 = vrot.slane %v10192_v47, 5  ;;  %6094 = vmatpush.bf16.msrb.mxu0 %v8125_v35  ;;  %v4758_v29 = vrot.slane %v4757_v56, 4  ;;  %v5559_v57 = vshll.u32 %v10251_v11, 16  ;;  %v4711_v56 = vld [vmem:[#allocation2 + $0x30] sm:$0xf] }
 0x2a8   : > { %v3637_v0 = vor.u32 %v3635_v30, %v3634_v1  ;;  %v3639_v32 = vrot.slane %v3634_v1, 4  ;;  %v5201_v2 = vpack.c.b16 %v5186_v20, %v5185_v3  ;;  %v4773_v39 = vsel %vm8629_vm4, %v4768_v46, %v4772_v60  ;;  %v10285_v1 = vld [vmem:[%s10944_s7 + $0x28] sm:$0xff] }
 0x2a9   : > { %v5563_v22 = vshrl.u32 %v10251_v11, 16  ;;  %v4763_v47 = vsel %vm8629_vm4, %v4758_v29, %v10219_v61  ;;  %v10266_v8 = vrot.slane %v4784_v40, 5  ;;  %v4790_v38 = vrot.slane %v4788_v21, 4  ;;  %8156 = vmatpush.bf16.msra.mxu2 %v8124_v6  ;;  %8159 = vmatpush.bf16.msra.mxu3 %v10285_v1  ;;  %v10295_v40 = vld [vmem:[%s10944_s7 + $0x20] sm:$0xff]  ;;  %v10297_v21 = vld [vmem:[#allocation2 + $0x34] sm:$0xf] }
 0x2aa   : > { %v3638_v42 = vsel %vm9657_vm6, %v3630_v59, %v3637_v0  ;;  %v3740_v31 = vsel %vm9502_vm8, %v3639_v32, %v3739_v44  ;;  %v4938_v26 = vunpack.c.l.b16 %v4773_v39  ;;  %v5123_v4 = vrot.slane %v5121_v12, 4  ;;  %8148 = vmatpush.bf16.msra.mxu1 %v10136_v51 }
 0x2ab   : > { %3738 = vst [vmem:[#allocation2 + $0x70] sm:$0xf] %v3638_v42  ;;  %v4775_v58 = vshrl.u32 %v4708_v53, 16  ;;  %6095 = vmatpush.bf16.msrb.mxu0 %v8124_v6  ;;  %v5124_v10 = vrot.slane %v10228_v48, 5  ;;  %v4778_v7 = vshll.u32 %v4708_v53, 16  ;;  %v5550_v16 = vshrl.u32 %v5525_v14, 16 }
 0x2ac   : > { %3741 = vst [vmem:[#allocation2 + $0x74] sm:$0x1] %v3740_v31  ;;  %v5553_v45 = vshll.u32 %v5525_v14, 16  ;;  %v4937_v41 = vunpack.c.l.b16 %v4763_v47  ;;  %v10272_v19 = vrot.slane %v5559_v57, 5  ;;  %v5565_v13 = vrot.slane %v5563_v22, 4 }
 0x2ad   : > { %v4227_v61 = vpop.f32.mrf.mxu2  ;;  %v7695_v27 = vrot.slane %v5081_v18, 9  ;;  %v4791_v63 = vor.u32 %v4790_v38, %v10266_v8  ;;  %v5125_v23 = vsel %vm8636_vm5, %v5123_v4, %v5124_v10  ;;  %v4777_v51 = vrot.slane %v4775_v58, 4  ;;  %8160 = vmatpush.bf16.msra.mxu3 %v10295_v40  ;;  %v10310_v18 = vld [vmem:[%s10944_s7 + $0x18] sm:$0xff] }
 0x2ae   : > { %5273 = vmatmul.bf16.vlgmr.msrb.gmra.mxu3 %v5201_v2  ;;  %v4080_v52 = vpop.f32.mrf.mxu1  ;;  %v4952_v48 = vpack.c.b16 %v4938_v26, %v4937_v41  ;;  %v4780_v49 = vrot.slane %v4778_v7, 5  ;;  %v4794_v54 = vshll.u32 %v10270_v55, 16  ;;  %v5552_v25 = vrot.slane %v5550_v16, 4  ;;  %v10324_v41 = vld [vmem:[%s10944_s7 + $0x10] sm:$0xff] }
 0x2af   : > { %v4451_v33 = vpop.f32.mrf.mxu3  ;;  %v4226_v37 = vadd.f32 %v4225_v50, %v4080_v52  ;;  %v5555_v34 = vrot.slane %v5553_v45, 5  ;;  %v5122_v30 = vsel %vm8636_vm5, %v7695_v27, %v5121_v12  ;;  %v5566_v20 = vor.u32 %v5565_v13, %v10272_v19  ;;  %v5082_v27 = vld [vmem:[#allocation2 + $0x24] sm:$0xe] }
 0x2b0   : > { %v5188_v35 = vunpack.c.l.b16 %v5125_v23  ;;  %v4792_v44 = vrot.slane %v4791_v63, 4  ;;  %v5569_v50 = vshll.u32 %v10279_v17, 16  ;;  %v5187_v0 = vunpack.c.l.b16 %v5122_v30 }
 0x2b1   : > { %v10275_v9 = vadd.f32 %v4451_v33, %v4226_v37  ;;  %v4781_v32 = vor.u32 %v4780_v49, %v4777_v51  ;;  %v4796_v3 = vrot.slane %v4794_v54, 5  ;;  %v5556_v60 = vor.u32 %v5555_v34, %v5552_v25  ;;  %8161 = vmatpush.bf16.msra.mxu3 %v10310_v18  ;;  %v8069_v51 = vld [vmem:[#allocation2 + $0x18] sm:$0xff] }
 0x2b2   : > { %v8107_v62 = vld [vmem:[#allocation2 + $0x6c] sm:$0xff]  ;;  %v5567_v2 = vrot.slane %v5566_v20, 4  ;;  %v5202_v12 = vpack.c.b16 %v5188_v35, %v5187_v0  ;;  %v5571_v29 = vrot.slane %v5569_v50, 5  ;;  %v4799_v39 = vshrl.u32 %v4711_v56, 16 }
 0x2b3   : > { %v4797_v6 = vsel %vm8629_vm4, %v4792_v44, %v4796_v3  ;;  %v4802_v14 = vshll.u32 %v4711_v56, 16  ;;  %v4808_v57 = vshll.u32 %v10297_v21, 16  ;;  %v4812_v22 = vshrl.u32 %v10297_v21, 16 }
 0x2b4   : > { %4645 = vmatmul.bf16.vlgmr.msrb.gmra.mxu1 %v8068_v28  ;;  %5028 = vmatmul.bf16.gmra.mxu2 %v4952_v48  ;;  %v4782_v47 = vrot.slane %v4781_v32, 4  ;;  %v5557_v38 = vrot.slane %v5556_v60, 4  ;;  %v5128_v26 = vrot.slane %v10245_v15, 5  ;;  %v5572_v4 = vsel %vm8629_vm4, %v5567_v2, %v5571_v29  ;;  %v10327_v48 = vld [vmem:[#allocation2 + $0x38] sm:$0x1] }
 0x2b5   : > { %5503 = vmatmul.bf16.gmra.mxu0 %v8107_v62  ;;  %v4230_v31 = vpop.f32.mrf.mxu2  ;;  %v4940_v52 = vunpack.c.l.b16 %v4797_v6  ;;  %v4801_v15 = vrot.slane %v4799_v39, 4  ;;  %v4804_v10 = vrot.slane %v4802_v14, 5  ;;  %v4810_v7 = vrot.slane %v4808_v57, 5  ;;  %8162 = vmatpush.bf16.msra.mxu3 %v10324_v41  ;;  %v5903_v32 = vld [vmem:[#allocation2 + $0x18] sm:$0xe] }
 0x2b6   : > { %v4082_v46 = vpop.f32.mrf.mxu1  ;;  %v4787_v58 = vsel %vm8629_vm4, %v4782_v47, %v10266_v8  ;;  %v5562_v33 = vsel %vm8629_vm4, %v5557_v38, %v10272_v19  ;;  %v4814_v16 = vrot.slane %v4812_v22, 4  ;;  %v5759_v37 = vunpack.c.l.b16 %v5572_v4  ;;  %v10364_v38 = vld [vmem:[#allocation2 + $0x40] sm:$0xf] }
 0x2b7   : > { %v4453_v59 = vpop.f32.mrf.mxu3  ;;  %v4228_v42 = vadd.f32 %v4227_v61, %v4082_v46  ;;  %v5130_v61 = vrot.slane %v5128_v26, 4  ;;  %v4939_v13 = vunpack.c.l.b16 %v4787_v58  ;;  %v5758_v28 = vunpack.c.l.b16 %v5562_v33  ;;  %v4714_v58 = vld [vmem:[#allocation2 + $0x3c] sm:$0xf]  ;;  %v7870_v33 = vld [vmem:[%s8594_s30 + $0x18] sm:$0xf] }
 0x2b8   : > { %v5131_v19 = vrot.slane %v10270_v55, 5  ;;  %v5937_v62 = vrot.slane %v10251_v11, 5  ;;  %v4805_v25 = vor.u32 %v4804_v10, %v4801_v15  ;;  %v4815_v34 = vor.u32 %v4814_v16, %v4810_v7  ;;  %v10338_v55 = vld [vmem:[%s10944_s7 + $0x8] sm:$0xff]  ;;  %v7871_v10 = vld [vmem:[%s8594_s30 + $0x1c] sm:$0xf] }
 0x2b9   : > { %v10302_v53 = vadd.f32 %v4453_v59, %v4228_v42  ;;  %v4953_v54 = vpack.c.b16 %v4940_v52, %v4939_v13  ;;  %v5774_v30 = vpack.c.b16 %v5759_v37, %v5758_v28  ;;  %v7696_v20 = vrot.slane %v5082_v27, 9  ;;  %8163 = vmatpush.bf16.msra.mxu3 %v10338_v55  ;;  %v10351_v42 = vld [vmem:[%s10944_s7] sm:$0xff]  ;;  %v5083_v13 = vld [vmem:[#allocation2 + $0x30] sm:$0xe] }
 0x2ba   : > { %v5132_v35 = vsel %vm8636_vm5, %v5130_v61, %v5131_v19  ;;  %v4818_v44 = vshll.u32 %v10327_v48, 16  ;;  %v5939_v56 = vrot.slane %v5937_v62, 4  ;;  %v4806_v59 = vrot.slane %v4805_v25, 4  ;;  %v7872_v25 = vld [vmem:[%s8594_s30 + $0x20] sm:$0x1] }
 0x2bb   : > { %v5129_v50 = vsel %vm8636_vm5, %v7696_v20, %v5128_v26  ;;  %v5190_v46 = vunpack.c.l.b16 %v5132_v35  ;;  %v4816_v0 = vrot.slane %v4815_v34, 4  ;;  %v5940_v60 = vrot.slane %v10279_v17, 5 }
 0x2bc   : > { %v5189_v2 = vunpack.c.l.b16 %v5129_v50  ;;  %v4820_v6 = vrot.slane %v4818_v44, 5  ;;  %v5135_v14 = vrot.slane %v10297_v21, 5  ;;  %v4832_v21 = vshll.u32 %v10364_v38, 16 }
 0x2bd   : > { %v4232_v8 = vpop.f32.mrf.mxu2  ;;  %v5941_v39 = vsel %vm8636_vm5, %v5939_v56, %v5940_v60  ;;  %8164 = vmatpush.bf16.msra.mxu3 %v10351_v42  ;;  %v4836_v52 = vshrl.u32 %v10364_v38, 16  ;;  %v6221_v16 = vshll.u32 %v7870_v33, 16  ;;  %v5138_v61 = vrot.slane %v10327_v48, 5 }
 0x2be   : > { %5278 = vmatmul.bf16.gmra.mxu3 %v5202_v12  ;;  %v4811_v12 = vsel %vm8629_vm4, %v4806_v59, %v4810_v7  ;;  %v5203_v22 = vpack.c.b16 %v5190_v46, %v5189_v2  ;;  %v4821_v47 = vsel %vm8629_vm4, %v4816_v0, %v4820_v6  ;;  %v6218_v7 = vshrl.u32 %v7870_v33, 16  ;;  %v8070_v46 = vld [vmem:[#allocation2 + $0x24] sm:$0xff] }
 0x2bf   : > { %v4456_v45 = vpop.f32.mrf.mxu3  ;;  %v4941_v26 = vunpack.c.l.b16 %v4811_v12  ;;  %v5137_v37 = vrot.slane %v5135_v14, 4  ;;  %v4823_v27 = vshrl.u32 %v4714_v58, 16  ;;  %v6223_v28 = vrot.slane %v6221_v16, 5  ;;  %v10384_v0 = vld [vmem:[#allocation2 + $0x44] sm:$0x1] }
 0x2c0   : > { %v4085_v63 = vpop.f32.mrf.mxu1  ;;  %v10331_v49 = vpop.f32.mrf.mxu0  ;;  %v6231_v19 = vshrl.u32 %v7871_v10, 16  ;;  %v7697_v50 = vrot.slane %v5083_v13, 9  ;;  %v6237_v60 = vshll.u32 %v7872_v25, 16  ;;  %v5084_v25 = vld [vmem:[#allocation2 + $0x3c] sm:$0xe] }
 0x2c1   : > { %v4231_v23 = vadd.f32 %v4230_v31, %v4085_v63  ;;  %v6220_v63 = vrot.slane %v6218_v7, 4  ;;  %v4825_v12 = vrot.slane %v4823_v27, 4 }
 0x2c2   : > { %v6233_v20 = vrot.slane %v6231_v19, 4 }
 0x2c3   : > { %v10340_v11 = vadd.f32 %v4456_v45, %v4231_v23  ;;  %v4942_v45 = vunpack.c.l.b16 %v4821_v47  ;;  %v4826_v23 = vshll.u32 %v4714_v58, 16  ;;  %v6239_v47 = vrot.slane %v6237_v60, 5  ;;  %v4719_v60 = vld [vmem:[#allocation2 + $0x50] sm:$0x1] }
 0x2c4   : > { %4650 = vmatmul.bf16.gmra.mxu1 %v8069_v51  ;;  %5033 = vmatmul.bf16.gmra.mxu2 %v4953_v54  ;;  %v10376_v51 = vrot.slane %v4832_v21, 5  ;;  %v4838_v54 = vrot.slane %v4836_v52, 4 }
 0x2c5   : > { %5846 = vmatmul.bf16.vlgmr.msra.gmra.mxu0 %v5774_v30  ;;  %v4235_v31 = vpop.f32.mrf.mxu2  ;;  %v4954_v44 = vpack.c.b16 %v4942_v45, %v4941_v26  ;;  %v4828_v6 = vrot.slane %v4826_v23, 5  ;;  %v5142_v45 = vrot.slane %v10364_v38, 5 }
 0x2c6   : > { %6505 = vmatpush.bf16.msra.mxu0 %v10162_v36  ;;  %v7830_v36 = vrot.slane %v5903_v32, 9  ;;  %v6224_v32 = vor.u32 %v6223_v28, %v6220_v63 }
 0x2c7   : > { %v4458_v3 = vpop.f32.mrf.mxu3  ;;  %v4829_v58 = vor.u32 %v4828_v6, %v4825_v12  ;;  %v5144_v23 = vrot.slane %v5142_v45, 4 }
 0x2c8   : > { %v4087_v29 = vpop.f32.mrf.mxu1  ;;  %v10359_v57 = vpop.f32.mrf.mxu0  ;;  %v5938_v4 = vsel %vm8636_vm5, %v7830_v36, %v5937_v62 }
 0x2c9   : > { %v4233_v17 = vadd.f32 %v4232_v8, %v4087_v29  ;;  %v6227_v8 = vshll.u32 %v7871_v10, 16  ;;  %v6008_v48 = vunpack.c.l.b16 %v5938_v4  ;;  %v4839_v29 = vor.u32 %v4838_v54, %v10376_v51 }
 0x2ca   : > { %6506 = vmatpush.bf16.msra.mxu0 %v10236_v5  ;;  %v6009_v5 = vunpack.c.l.b16 %v5941_v39 }
 0x2cb   : > { %v10371_v15 = vadd.f32 %v4458_v3, %v4233_v17  ;;  %v6229_v34 = vrot.slane %v6227_v8, 5  ;;  %v6225_v17 = vrot.slane %v6224_v32, 4  ;;  %v4840_v21 = vrot.slane %v4839_v29, 4 }
 0x2cc   : > { %v6024_v2 = vpack.c.b16 %v6009_v5, %v6008_v48 }
 0x2cd   : > { %v4237_v30 = vpop.f32.mrf.mxu2  ;;  %v6234_v3 = vor.u32 %v6233_v20, %v6229_v34 }
 0x2ce   : > { %5283 = vmatmul.bf16.gmra.mxu3 %v5203_v22  ;;  %6507 = vmatpush.bf16.msra.mxu0 %v10285_v1  ;;  %v5139_v1 = vsel %vm8636_vm5, %v5137_v37, %v5138_v61  ;;  %v10401_v37 = vld [vmem:[#allocation2 + $0x4c] sm:$0xf]  ;;  %v4830_v61 = vrot.slane %v4829_v58, 4 }
 0x2cf   : > { %v5192_v39 = vunpack.c.l.b16 %v5139_v1  ;;  %v6235_v22 = vrot.slane %v6234_v3, 4  ;;  %v4856_v13 = vshll.u32 %v10401_v37, 16  ;;  %v4860_v27 = vshrl.u32 %v10401_v37, 16 }
 0x2d0   : > { %v4461_v62 = vpop.f32.mrf.mxu3  ;;  %v4090_v35 = vpop.f32.mrf.mxu1  ;;  %v4835_v28 = vsel %vm8629_vm4, %v4830_v61, %v10376_v51  ;;  %v8071_v51 = vld [vmem:[#allocation2 + $0x30] sm:$0xff]  ;;  %v7698_v3 = vrot.slane %v5084_v25, 9 }
 0x2d1   : > { %v4236_v56 = vadd.f32 %v4235_v31, %v4090_v35  ;;  %v10381_v59 = vpop.f32.mrf.mxu0  ;;  %v5136_v31 = vsel %vm8636_vm5, %v7697_v50, %v5135_v14  ;;  %v6230_v14 = vsel %vm8629_vm4, %v6225_v17, %v6229_v34  ;;  %v4858_v20 = vrot.slane %v4856_v13, 5 }
 0x2d2   : > { %6508 = vmatpush.bf16.msra.mxu0 %v10295_v40  ;;  %v4842_v40 = vshll.u32 %v10384_v0, 16  ;;  %v5191_v4 = vunpack.c.l.b16 %v5136_v31  ;;  %v6425_v19 = vunpack.c.l.b16 %v6230_v14  ;;  %v4862_v35 = vrot.slane %v4860_v27, 4 }
 0x2d3   : > { %v10387_v36 = vadd.f32 %v4461_v62, %v4236_v56  ;;  %v4943_v48 = vunpack.c.l.b16 %v4835_v28  ;;  %v5145_v56 = vrot.slane %v10384_v0, 5  ;;  %v5143_v0 = vsel %vm8636_vm5, %v7698_v3, %v5142_v45  ;;  %v5085_v28 = vld [vmem:[#allocation2 + $0x48] sm:$0xe] }
 0x2d4   : > { %4655 = vmatmul.bf16.gmra.mxu1 %v8070_v46  ;;  %5038 = vmatmul.bf16.gmra.mxu2 %v4954_v44  ;;  %v5204_v5 = vpack.c.b16 %v5192_v39, %v5191_v4  ;;  %v4844_v10 = vrot.slane %v4842_v40, 5  ;;  %v4863_v29 = vor.u32 %v4862_v35, %v4858_v20  ;;  %v4866_v39 = vshll.u32 %v4719_v60, 16 }
 0x2d5   : > { %6096 = vmatmul.bf16.vlgmr.msrb.gmra.mxu0 %v6024_v2  ;;  %v4240_v52 = vpop.f32.mrf.mxu2  ;;  %v5146_v2 = vsel %vm8636_vm5, %v5144_v23, %v5145_v56  ;;  %v4722_v56 = vld [vmem:[#allocation2 + $0x5c] sm:$0x1] }
 0x2d6   : > { %6509 = vmatpush.bf16.msra.mxu0 %v10310_v18  ;;  %v6240_v18 = vsel %vm8629_vm4, %v6235_v22, %v6239_v47  ;;  %v4845_v8 = vsel %vm8629_vm4, %v4840_v21, %v4844_v10  ;;  %v5194_v40 = vunpack.c.l.b16 %v5146_v2  ;;  %v4864_v22 = vrot.slane %v4863_v29, 4  ;;  %v10426_v10 = vld [vmem:[#allocation2 + $0x58] sm:$0xf] }
 0x2d7   : > { %v6426_v38 = vunpack.c.l.b16 %v6240_v18  ;;  %v4944_v62 = vunpack.c.l.b16 %v4845_v8  ;;  %v4868_v58 = vrot.slane %v4866_v39, 5  ;;  %v4880_v18 = vshll.u32 %v10426_v10, 16  ;;  %v4720_v8 = vld [vmem:[#allocation2 + $0x54] sm:$0xf] }
 0x2d8   : > { %v4463_v26 = vpop.f32.mrf.mxu3  ;;  %v4092_v33 = vpop.f32.mrf.mxu1  ;;  %v4884_v45 = vshrl.u32 %v10426_v10, 16  ;;  %v4890_v2 = vshll.u32 %v4722_v56, 16 }
 0x2d9   : > { %v4238_v7 = vadd.f32 %v4237_v30, %v4092_v33  ;;  %v10393_v16 = vpop.f32.mrf.mxu0  ;;  %v6441_v1 = vpack.c.b16 %v6426_v38, %v6425_v19  ;;  %v4869_v14 = vsel %vm8629_vm4, %v4864_v22, %v4868_v58  ;;  %v4871_v19 = vshrl.u32 %v4720_v8, 16  ;;  %v10447_v58 = vld [vmem:[#allocation2 + $0x64] sm:$0xf] }
 0x2da   : > { %11026 = vst [vmem:[#allocation15_spill] sm:$0xff] %v10393_v16  ;;  %6510 = vmatpush.bf16.msra.mxu0 %v10324_v41  ;;  %v4717_v41 = vld [vmem:[#allocation2 + $0x48] sm:$0xf]  ;;  %v4946_v27 = vunpack.c.l.b16 %v4869_v14  ;;  %v4874_v38 = vshll.u32 %v4720_v8, 16  ;;  %v4886_v23 = vrot.slane %v4884_v45, 4 }
 0x2db   : > { %v10407_v63 = vadd.f32 %v4463_v26, %v4238_v7  ;;  %v4847_v34 = vshrl.u32 %v4717_v41, 16  ;;  %v4850_v30 = vshll.u32 %v4717_v41, 16  ;;  %v5193_v26 = vunpack.c.l.b16 %v5143_v0 }
 0x2dd   : > { %v4242_v44 = vpop.f32.mrf.mxu2  ;;  %v4849_v12 = vrot.slane %v4847_v34, 4  ;;  %v4852_v6 = vrot.slane %v4850_v30, 5  ;;  %v5205_v33 = vpack.c.b16 %v5194_v40, %v5193_v26  ;;  %v5152_v30 = vrot.slane %v4719_v60, 5 }
 0x2de   : > { %5288 = vmatmul.bf16.gmra.mxu3 %v5204_v5  ;;  %6511 = vmatpush.bf16.msra.mxu0 %v10338_v55  ;;  %v4955_v55 = vpack.c.b16 %v4944_v62, %v4943_v48  ;;  %v5149_v5 = vrot.slane %v10401_v37, 5  ;;  %v4882_v62 = vrot.slane %v4880_v18, 5  ;;  %v4723_v18 = vld [vmem:[#allocation2 + $0x60] sm:$0xf] }
 0x2df   : > { %v4853_v17 = vor.u32 %v4852_v6, %v4849_v12 }
 0x2e0   : > { %v4466_v54 = vpop.f32.mrf.mxu3  ;;  %v5151_v41 = vrot.slane %v5149_v5, 4 }
 0x2e1   : > { %v4095_v50 = vpop.f32.mrf.mxu1  ;;  %v10414_v32 = vpop.f32.mrf.mxu0  ;;  %v4854_v7 = vrot.slane %v4853_v17, 4  ;;  %v4892_v17 = vrot.slane %v4890_v2, 5 }
 0x2e2   : > { %v4241_v46 = vadd.f32 %v4240_v52, %v4095_v50  ;;  %11027 = vst [vmem:[#allocation16_spill] sm:$0xff] %v10414_v32  ;;  %6512 = vmatpush.bf16.msra.mxu0 %v10351_v42 }
 0x2e3   : > { %v4859_v13 = vsel %vm8629_vm4, %v4854_v7, %v4858_v20  ;;  %v5153_v20 = vsel %vm8636_vm5, %v5151_v41, %v5152_v30  ;;  %v4908_v7 = vshrl.u32 %v10447_v58, 16  ;;  %v4895_v41 = vshrl.u32 %v4723_v18, 16  ;;  %v8073_v30 = vld [vmem:[#allocation2 + $0x48] sm:$0xff] }
 0x2e4   : > { %v10419_v31 = vadd.f32 %v4466_v54, %v4241_v46  ;;  %4660 = vmatmul.bf16.gmra.mxu1 %v8071_v51  ;;  %5043 = vmatmul.bf16.gmra.mxu2 %v4955_v55  ;;  %v4945_v25 = vunpack.c.l.b16 %v4859_v13  ;;  %v4873_v46 = vrot.slane %v4871_v19, 4  ;;  %v4876_v51 = vrot.slane %v4874_v38, 5 }
 0x2e5   : > { %6513 = vmatmul.bf16.vlgmr.msra.gmra.mxu0 %v6441_v1  ;;  %v7699_v1 = vrot.slane %v5085_v28, 9  ;;  %v4887_v55 = vor.u32 %v4886_v23, %v4882_v62  ;;  %v5196_v12 = vunpack.c.l.b16 %v5153_v20  ;;  %v4910_v19 = vrot.slane %v4908_v7, 4  ;;  %v7873_v7 = vld [vmem:[%s8594_s30 + $0x24] sm:$0xf] }
 0x2e6   : > { %v4245_v47 = vpop.f32.mrf.mxu2  ;;  %v4956_v50 = vpack.c.b16 %v4946_v27, %v4945_v25  ;;  %v4877_v29 = vor.u32 %v4876_v51, %v4873_v46  ;;  %v5086_v27 = vld [vmem:[#allocation2 + $0x54] sm:$0xe]  ;;  %v5159_v25 = vrot.slane %v4722_v56, 5  ;;  %v4897_v20 = vrot.slane %v4895_v41, 4 }
 0x2e7   : > { %v5150_v60 = vsel %vm8636_vm5, %v7699_v1, %v5149_v5  ;;  %v4888_v0 = vrot.slane %v4887_v55, 4  ;;  %v4904_v5 = vshll.u32 %v10447_v58, 16  ;;  %v4725_v1 = vld [vmem:[#allocation2 + $0x68] sm:$0x1]  ;;  %v6242_v41 = vshrl.u32 %v7873_v7, 16 }
 0x2e8   : > { %v4468_v42 = vpop.f32.mrf.mxu3  ;;  %v5195_v40 = vunpack.c.l.b16 %v5150_v60  ;;  %v4914_v60 = vshll.u32 %v4725_v1, 16 }
 0x2e9   : > { %v4097_v4 = vpop.f32.mrf.mxu1  ;;  %v10423_v52 = vpop.f32.mrf.mxu0  ;;  %v4906_v28 = vrot.slane %v4904_v5, 5 }
 0x2ea   : > { %v4243_v21 = vadd.f32 %v4242_v44, %v4097_v4  ;;  %11028 = vst [vmem:[#allocation19_spill] sm:$0xff] %v10423_v52  ;;  %v8072_v44 = vld [vmem:[#allocation2 + $0x3c] sm:$0xff]  ;;  %v5206_v26 = vpack.c.b16 %v5196_v12, %v5195_v40  ;;  %v5156_v4 = vrot.slane %v10426_v10, 5 }
 0x2eb   : > { %v4911_v51 = vor.u32 %v4910_v19, %v4906_v28 }
 0x2ec   : > { %v10432_v61 = vadd.f32 %v4468_v42, %v4243_v21  ;;  %v4878_v21 = vrot.slane %v4877_v29, 4  ;;  %v5158_v13 = vrot.slane %v5156_v4, 4 }
 0x2ed   : > { %v4912_v29 = vrot.slane %v4911_v51, 4  ;;  %v6244_v51 = vrot.slane %v6242_v41, 4 }
 0x2ee   : > { %5293 = vmatmul.bf16.gmra.mxu3 %v5205_v33  ;;  %v4247_v54 = vpop.f32.mrf.mxu2  ;;  %v4893_v33 = vsel %vm8629_vm4, %v4888_v0, %v4892_v17  ;;  %v4883_v45 = vsel %vm8629_vm4, %v4878_v21, %v4882_v62  ;;  %v5160_v62 = vsel %vm8636_vm5, %v5158_v13, %v5159_v25 }
 0x2ef   : > { %v4948_v8 = vunpack.c.l.b16 %v4893_v33  ;;  %v4947_v23 = vunpack.c.l.b16 %v4883_v45  ;;  %v5198_v2 = vunpack.c.l.b16 %v5160_v62  ;;  %v7874_v45 = vld [vmem:[%s8594_s30 + $0x28] sm:$0xf] }
 0x2f0   : > { %v6255_v25 = vshrl.u32 %v7874_v45, 16 }
 0x2f1   : > { %v4471_v37 = vpop.f32.mrf.mxu3  ;;  %v4100_v34 = vpop.f32.mrf.mxu1 }
 0x2f2   : > { %v4246_v35 = vadd.f32 %v4245_v47, %v4100_v34  ;;  %v10436_v48 = vpop.f32.mrf.mxu0 }
 0x2f3   : > { %11029 = vst [vmem:[#allocation17_spill] sm:$0xff] %v10436_v48 }
 0x2f4   : > { %v10440_v3 = vadd.f32 %v4471_v37, %v4246_v35  ;;  %4665 = vmatmul.bf16.gmra.mxu1 %v8072_v44  ;;  %5048 = vmatmul.bf16.gmra.mxu2 %v4956_v50  ;;  %v4898_v37 = vshll.u32 %v4723_v18, 16  ;;  %v4957_v44 = vpack.c.b16 %v4948_v8, %v4947_v23  ;;  %v7700_v50 = vrot.slane %v5086_v27, 9  ;;  %v5529_v27 = vld [vmem:[#allocation2 + $0x28] sm:$0xf] }
 0x2f5   : > { %v6245_v23 = vshll.u32 %v7873_v7, 16 }
 0x2f6   : > { %v4250_v39 = vpop.f32.mrf.mxu2  ;;  %v4900_v46 = vrot.slane %v4898_v37, 5  ;;  %v5157_v56 = vsel %vm8636_vm5, %v7700_v50, %v5156_v4  ;;  %v5163_v4 = vrot.slane %v10447_v58, 5 }
 0x2f9   : > { %v4473_v6 = vpop.f32.mrf.mxu3  ;;  %v4102_v42 = vpop.f32.mrf.mxu1 }
 0x2fa   : > { %v4248_v22 = vadd.f32 %v4247_v54, %v4102_v42  ;;  %v10444_v47 = vpop.f32.mrf.mxu0  ;;  %v4916_v42 = vrot.slane %v4914_v60, 5  ;;  %v6247_v60 = vrot.slane %v6245_v23, 5  ;;  %v5587_v23 = vshrl.u32 %v5529_v27, 16 }
 0x2fb   : > { %11030 = vst [vmem:[#allocation18_spill] sm:$0xff] %v10444_v47 }
 0x2fc   : > { %v10453_v14 = vadd.f32 %v4473_v6, %v4248_v22  ;;  %v4901_v6 = vor.u32 %v4900_v46, %v4897_v20  ;;  %v4917_v33 = vsel %vm8629_vm4, %v4912_v29, %v4916_v42  ;;  %v5944_v46 = vrot.slane %v5529_v27, 5 }
 0x2fd   : > { %v4950_v8 = vunpack.c.l.b16 %v4917_v33 }
 0x2fe   : > { %5298 = vmatmul.bf16.gmra.mxu3 %v5206_v26  ;;  %v4252_v38 = vpop.f32.mrf.mxu2  ;;  %v4902_v21 = vrot.slane %v4901_v6, 4  ;;  %v7875_v6 = vld [vmem:[%s8594_s30 + $0x2c] sm:$0x1] }
 0x2ff   : > { %v6261_v7 = vshll.u32 %v7875_v6, 16 }
 0x300   : > { %v4907_v18 = vsel %vm8629_vm4, %v4902_v21, %v4906_v28  ;;  %v6248_v21 = vor.u32 %v6247_v60, %v6244_v51 }
 0x301   : > { %v4476_v10 = vpop.f32.mrf.mxu3  ;;  %v4105_v54 = vpop.f32.mrf.mxu1  ;;  %v4949_v19 = vunpack.c.l.b16 %v4907_v18 }
 0x302   : > { %v4251_v34 = vadd.f32 %v4250_v39, %v4105_v54  ;;  %v10457_v35 = vpop.f32.mrf.mxu0  ;;  %v5197_v39 = vunpack.c.l.b16 %v5157_v56  ;;  %v6251_v54 = vshll.u32 %v7874_v45, 16 }
 0x303   : > { %11031 = vst [vmem:[#allocation14_spill] sm:$0xff] %v10457_v35  ;;  %v4958_v28 = vpack.c.b16 %v4950_v8, %v4949_v19  ;;  %v5528_v19 = vld [vmem:[#allocation2 + $0x24] sm:$0xf] }
 0x304   : > { %v10461_v55 = vadd.f32 %v4476_v10, %v4251_v34  ;;  %4670 = vmatmul.bf16.gmra.mxu1 %v8073_v30  ;;  %5053 = vmatmul.bf16.gmra.mxu2 %v4957_v44  ;;  %v5207_v26 = vpack.c.b16 %v5198_v2, %v5197_v39  ;;  %v5165_v10 = vrot.slane %v5163_v4, 4  ;;  %v5166_v34 = vrot.slane %v4725_v1, 5  ;;  %v8074_v44 = vld [vmem:[#allocation2 + $0x54] sm:$0xff] }
 0x305   : > { %v6253_v2 = vrot.slane %v6251_v54, 5 }
 0x306   : > { %v4255_v0 = vpop.f32.mrf.mxu2  ;;  %v5167_v20 = vsel %vm8636_vm5, %v5165_v10, %v5166_v34  ;;  %v6263_v34 = vrot.slane %v6261_v7, 5  ;;  %v8075_v7 = vld [vmem:[#allocation2 + $0x60] sm:$0xff] }
 0x307   : > { %v5200_v29 = vunpack.c.l.b16 %v5167_v20  ;;  %v7877_v20 = vld [vmem:[%s8594_s30 + $0x34] sm:$0xf] }
 0x309   : > { %v4478_v12 = vpop.f32.mrf.mxu3  ;;  %v4107_v40 = vpop.f32.mrf.mxu1 }
 0x30a   : > { %v4253_v17 = vadd.f32 %v4252_v38, %v4107_v40  ;;  %v10465_v22 = vpop.f32.mrf.mxu0  ;;  %v5087_v38 = vld [vmem:[#allocation2 + $0x60] sm:$0xe]  ;;  %v5946_v40 = vrot.slane %v5944_v46, 4 }
 0x30b   : > { %11032 = vst [vmem:[#allocation27_spill] sm:$0xff] %v10465_v22  ;;  %v7701_v62 = vrot.slane %v5087_v38, 9  ;;  %v5583_v38 = vshll.u32 %v5529_v27, 16 }
 0x30c   : > { %v10470_v5 = vadd.f32 %v4478_v12, %v4253_v17  ;;  %v6257_v12 = vrot.slane %v6255_v25, 4  ;;  %v6249_v25 = vrot.slane %v6248_v21, 4  ;;  %v6279_v21 = vshrl.u32 %v7877_v20, 16 }
 0x30d   : > { %v5164_v1 = vsel %vm8636_vm5, %v7701_v62, %v5163_v4  ;;  %v7876_v62 = vld [vmem:[%s8594_s30 + $0x30] sm:$0xf]  ;;  %v10498_v60 = vrot.slane %v5583_v38, 5 }
 0x30e   : > { %5303 = vmatmul.bf16.gmra.mxu3 %v5207_v26  ;;  %v4257_v37 = vpop.f32.mrf.mxu2  ;;  %v5199_v17 = vunpack.c.l.b16 %v5164_v1  ;;  %v5904_v26 = vld [vmem:[#allocation2 + $0x24] sm:$0xe]  ;;  %v6258_v33 = vor.u32 %v6257_v12, %v6253_v2  ;;  %v5589_v12 = vrot.slane %v5587_v23, 4  ;;  %v6254_v6 = vsel %vm8629_vm4, %v6249_v25, %v6253_v2 }
 0x30f   : > { %v7831_v10 = vrot.slane %v5904_v26, 9  ;;  %v6275_v26 = vshll.u32 %v7877_v20, 16  ;;  %v5905_v20 = vld [vmem:[#allocation2 + $0x30] sm:$0xe] }
 0x310   : > { %v5208_v4 = vpack.c.b16 %v5200_v29, %v5199_v17  ;;  %v6269_v17 = vshll.u32 %v7876_v62, 16  ;;  %v5590_v2 = vor.u32 %v5589_v12, %v10498_v60 }
 0x311   : > { %v4481_v13 = vpop.f32.mrf.mxu3  ;;  %v4110_v58 = vpop.f32.mrf.mxu1 }
 0x312   : > { %v4256_v30 = vadd.f32 %v4255_v0, %v4110_v58  ;;  %v10476_v50 = vpop.f32.mrf.mxu0  ;;  %v10485_v0 = vld [vmem:[#allocation2 + $0x2c] sm:$0x1]  ;;  %v6259_v58 = vrot.slane %v6258_v33, 4  ;;  %v6271_v25 = vrot.slane %v6269_v17, 5 }
 0x313   : > { %11033 = vst [vmem:[#allocation20_spill] sm:$0xff] %v10476_v50  ;;  %v5947_v45 = vrot.slane %v10485_v0, 5  ;;  %v5593_v23 = vshll.u32 %v10485_v0, 16  ;;  %v5534_v50 = vld [vmem:[#allocation2 + $0x3c] sm:$0xf] }
 0x314   : > { %v10480_v56 = vadd.f32 %v4481_v13, %v4256_v30  ;;  %4675 = vmatmul.bf16.gmra.mxu1 %v8074_v44  ;;  %5058 = vmatmul.bf16.gmra.mxu2 %v4958_v28  ;;  %v5574_v44 = vshrl.u32 %v5528_v19, 16  ;;  %v5577_v28 = vshll.u32 %v5528_v19, 16  ;;  %v6264_v29 = vsel %vm8629_vm4, %v6259_v58, %v6263_v34 }
 0x315   : > { %v5948_v41 = vsel %vm8636_vm5, %v5946_v40, %v5947_v45  ;;  %v6266_v40 = vshrl.u32 %v7876_v62, 16  ;;  %v6427_v19 = vunpack.c.l.b16 %v6254_v6  ;;  %v6428_v38 = vunpack.c.l.b16 %v6264_v29 }
 0x316   : > { %v4260_v42 = vpop.f32.mrf.mxu2  ;;  %v6011_v30 = vunpack.c.l.b16 %v5948_v41  ;;  %v10513_v58 = vrot.slane %v6275_v26, 5  ;;  %v6281_v34 = vrot.slane %v6279_v21, 4  ;;  %v5591_v62 = vrot.slane %v5590_v2, 4 }
 0x317   : > { %v5595_v6 = vrot.slane %v5593_v23, 5 }
 0x319   : > { %v4483_v39 = vpop.f32.mrf.mxu3  ;;  %v4112_v18 = vpop.f32.mrf.mxu1 }
 0x31a   : > { %v4258_v8 = vadd.f32 %v4257_v37, %v4112_v18  ;;  %v10488_v13 = vpop.f32.mrf.mxu0  ;;  %v5945_v37 = vsel %vm8636_vm5, %v7831_v10, %v5944_v46 }
 0x31b   : > { %11034 = vst [vmem:[#allocation21_spill] sm:$0xff] %v10488_v13  ;;  %v6010_v27 = vunpack.c.l.b16 %v5945_v37 }
 0x31c   : > { %v10492_v54 = vadd.f32 %v4483_v39, %v4258_v8  ;;  %v10504_v39 = vld [vmem:[#allocation2 + $0x34] sm:$0xf]  ;;  %v5576_v8 = vrot.slane %v5574_v44, 4  ;;  %v7878_v44 = vld [vmem:[%s8594_s30 + $0x38] sm:$0x1] }
 0x31d   : > { %v6025_v45 = vpack.c.b16 %v6011_v30, %v6010_v27  ;;  %v5951_v10 = vrot.slane %v10504_v39, 5  ;;  %v10515_v30 = vld [vmem:[#allocation2 + $0x38] sm:$0x1]  ;;  %v6442_v27 = vpack.c.b16 %v6428_v38, %v6427_v19  ;;  %v6285_v17 = vshll.u32 %v7878_v44, 16 }
 0x31e   : > { %5308 = vmatmul.bf16.gmra.mxu3 %v5208_v4  ;;  %v4262_v1 = vpop.f32.mrf.mxu2  ;;  %v5579_v4 = vrot.slane %v5577_v28, 5  ;;  %v5954_v0 = vrot.slane %v10515_v30, 5  ;;  %v5607_v2 = vshll.u32 %v10504_v39, 16  ;;  %v5611_v19 = vshrl.u32 %v10504_v39, 16 }
 0x320   : > { %v5580_v37 = vor.u32 %v5579_v4, %v5576_v8  ;;  %v5531_v4 = vld [vmem:[#allocation2 + $0x30] sm:$0xf] }
 0x321   : > { %v4486_v51 = vpop.f32.mrf.mxu3  ;;  %v4115_v46 = vpop.f32.mrf.mxu1 }
 0x322   : > { %v4261_v33 = vadd.f32 %v4260_v42, %v4115_v46  ;;  %v10506_v18 = vpop.f32.mrf.mxu0  ;;  %v6268_v42 = vrot.slane %v6266_v40, 4  ;;  %v6282_v40 = vor.u32 %v6281_v34, %v10513_v58  ;;  %v6287_v34 = vrot.slane %v6285_v17, 5 }
 0x323   : > { %11035 = vst [vmem:[#allocation22_spill] sm:$0xff] %v10506_v18 }
 0x324   : > { %v10510_v41 = vadd.f32 %v4486_v51, %v4261_v33  ;;  %4680 = vmatmul.bf16.gmra.mxu1 %v8075_v7  ;;  %6101 = vmatmul.bf16.vlgmr.msra.gmra.mxu2 %v6025_v45  ;;  %v5953_v51 = vrot.slane %v5951_v10, 4  ;;  %v6272_v46 = vor.u32 %v6271_v25, %v6268_v42  ;;  %v5581_v33 = vrot.slane %v5580_v37, 4 }
 0x325   : > { %v7832_v7 = vrot.slane %v5905_v20, 9  ;;  %v5596_v45 = vsel %vm8629_vm4, %v5591_v62, %v5595_v6  ;;  %v6283_v25 = vrot.slane %v6282_v40, 4  ;;  %v5598_v62 = vshrl.u32 %v5531_v4, 16  ;;  %v7880_v6 = vld [vmem:[%s8594_s30 + $0x40] sm:$0xf] }
 0x326   : > { %v5955_v8 = vsel %vm8636_vm5, %v5953_v51, %v5954_v0  ;;  %v6273_v42 = vrot.slane %v6272_v46, 4  ;;  %v5761_v37 = vunpack.c.l.b16 %v5596_v45  ;;  %v5601_v20 = vshll.u32 %v5531_v4, 16  ;;  %v7879_v51 = vld [vmem:[%s8594_s30 + $0x3c] sm:$0xf]  ;;  %v5535_v46 = vld [vmem:[#allocation2 + $0x40] sm:$0xf] }
 0x327   : > { %v10518_v12 = vpop.f32.mrf.mxu2  ;;  %v5952_v23 = vsel %vm8636_vm5, %v7832_v7, %v5951_v10  ;;  %v6013_v44 = vunpack.c.l.b16 %v5955_v8  ;;  %v6293_v0 = vshll.u32 %v7879_v51, 16  ;;  %v6299_v40 = vshll.u32 %v7880_v6, 16 }
 0x328   : > { %v6012_v10 = vunpack.c.l.b16 %v5952_v23  ;;  %v6303_v17 = vshrl.u32 %v7880_v6, 16  ;;  %v6278_v7 = vsel %vm8629_vm4, %v6273_v42, %v10513_v58  ;;  %v6288_v45 = vsel %vm8629_vm4, %v6283_v25, %v6287_v34  ;;  %v7881_v34 = vld [vmem:[%s8594_s30 + $0x44] sm:$0x1] }
 0x329   : > { %v4488_v28 = vpop.f32.mrf.mxu3  ;;  %v4117_v29 = vpop.f32.mrf.mxu1  ;;  %v6429_v18 = vunpack.c.l.b16 %v6278_v7  ;;  %v6430_v13 = vunpack.c.l.b16 %v6288_v45  ;;  %v6301_v58 = vrot.slane %v6299_v40, 5  ;;  %v5617_v25 = vshll.u32 %v10515_v30, 16 }
 0x32a   : > { %v4263_v26 = vadd.f32 %v4262_v1, %v4117_v29  ;;  %v10522_v21 = vpop.f32.mrf.mxu0  ;;  %v5586_v1 = vsel %vm8629_vm4, %v5581_v33, %v10498_v60  ;;  %v6290_v29 = vshrl.u32 %v7879_v51, 16  ;;  %v5958_v51 = vrot.slane %v5535_v46, 5 }
 0x32b   : > { %11036 = vst [vmem:[#allocation23_spill] sm:$0xff] %v10522_v21  ;;  %v6295_v21 = vrot.slane %v6293_v0, 5  ;;  %v6305_v42 = vrot.slane %v6303_v17, 4  ;;  %v6443_v0 = vpack.c.b16 %v6430_v13, %v6429_v18  ;;  %v5619_v40 = vrot.slane %v5617_v25, 5 }
 0x32c   : > { %v10530_v38 = vadd.f32 %v4488_v28, %v4263_v26  ;;  %v10541_v28 = vrot.slane %v5607_v2, 5  ;;  %v5760_v26 = vunpack.c.l.b16 %v5586_v1  ;;  %v6026_v2 = vpack.c.b16 %v6013_v44, %v6012_v10 }
 0x32d   : > { %v5603_v1 = vrot.slane %v5601_v20, 5  ;;  %v6292_v6 = vrot.slane %v6290_v29, 4  ;;  %v5906_v20 = vld [vmem:[#allocation2 + $0x3c] sm:$0xe]  ;;  %v5631_v30 = vshll.u32 %v5535_v46, 16  ;;  %v5635_v45 = vshrl.u32 %v5535_v46, 16 }
 0x32e   : > { %6518 = vmatmul.bf16.vlgmr.msra.gmra.mxu3 %v6442_v27  ;;  %v5613_v27 = vrot.slane %v5611_v19, 4  ;;  %v5775_v8 = vpack.c.b16 %v5761_v37, %v5760_v26  ;;  %v5600_v19 = vrot.slane %v5598_v62, 4  ;;  %v10557_v26 = vld [vmem:[#allocation2 + $0x44] sm:$0x1]  ;;  %v5622_v25 = vshrl.u32 %v5534_v50, 16 }
 0x32f   : > { %v10543_v60 = vpop.f32.mrf.mxu2  ;;  %v6296_v10 = vor.u32 %v6295_v21, %v6292_v6  ;;  %v5961_v17 = vrot.slane %v10557_v26, 5 }
 0x330   : > { %v5614_v23 = vor.u32 %v5613_v27, %v10541_v28  ;;  %v5604_v37 = vor.u32 %v5603_v1, %v5600_v19  ;;  %v5960_v27 = vrot.slane %v5958_v51, 4 }
 0x331   : > { %v10539_v39 = vpop.f32.mrf.mxu3  ;;  %v10545_v33 = vpop.f32.mrf.mxu1  ;;  %v6297_v18 = vrot.slane %v6296_v10, 4 }
 0x332   : > { %v10552_v4 = vpop.f32.mrf.mxu0  ;;  %v5615_v62 = vrot.slane %v5614_v23, 4  ;;  %v5605_v1 = vrot.slane %v5604_v37, 4  ;;  %v5962_v13 = vsel %vm8636_vm5, %v5960_v27, %v5961_v17  ;;  %v10575_v37 = vrot.slane %v5631_v30, 5 }
 0x333   : > { %11037 = vst [vmem:[#allocation24_spill] sm:$0xff] %v10552_v4  ;;  %v7833_v4 = vrot.slane %v5906_v20, 9  ;;  %v6015_v27 = vunpack.c.l.b16 %v5962_v13  ;;  %v6302_v17 = vsel %vm8629_vm4, %v6297_v18, %v6301_v58  ;;  %v5624_v30 = vrot.slane %v5622_v25, 4  ;;  %v10588_v25 = vld [vmem:[#allocation2 + $0x50] sm:$0x1] }
 0x334   : > { %5851 = vmatmul.bf16.vlgmr.msra.gmra.mxu1 %v5775_v8  ;;  %6106 = vmatmul.bf16.gmra.mxu2 %v6026_v2  ;;  %v6306_v8 = vor.u32 %v6305_v42, %v6301_v58  ;;  %v6309_v2 = vshll.u32 %v7881_v34, 16  ;;  %v5620_v23 = vsel %vm8629_vm4, %v5615_v62, %v5619_v40  ;;  %v5610_v21 = vsel %vm8629_vm4, %v5605_v1, %v10541_v28  ;;  %v5538_v28 = vld [vmem:[#allocation2 + $0x4c] sm:$0xf]  ;;  %v7882_v1 = vld [vmem:[%s8594_s30 + $0x48] sm:$0xf] }
 0x335   : > { %v5959_v46 = vsel %vm8636_vm5, %v7833_v4, %v5958_v51  ;;  %v5625_v34 = vshll.u32 %v5534_v50, 16  ;;  %v5637_v62 = vrot.slane %v5635_v45, 4  ;;  %v5763_v20 = vunpack.c.l.b16 %v5620_v23 }
 0x336   : > { %v6307_v6 = vrot.slane %v6306_v8, 4  ;;  %v6311_v42 = vrot.slane %v6309_v2, 5  ;;  %v6014_v40 = vunpack.c.l.b16 %v5959_v46  ;;  %v6314_v51 = vshrl.u32 %v7882_v1, 16 }
 0x337   : > { %v5029_v29 = vpop.f32.mrf.mxu2  ;;  %v6317_v50 = vshll.u32 %v7882_v1, 16  ;;  %v5627_v45 = vrot.slane %v5625_v34, 5  ;;  %v5638_v23 = vor.u32 %v5637_v62, %v10575_v37  ;;  %v5965_v35 = vrot.slane %v5538_v28, 5  ;;  %v5537_v1 = vld [vmem:[#allocation2 + $0x48] sm:$0xf] }
 0x338   : > { %v6312_v4 = vsel %vm8629_vm4, %v6307_v6, %v6311_v42  ;;  %v6027_v18 = vpack.c.b16 %v6015_v27, %v6014_v40  ;;  %v6431_v47 = vunpack.c.l.b16 %v6302_v17  ;;  %v5641_v6 = vshll.u32 %v10557_v26, 16  ;;  %v7884_v27 = vld [vmem:[%s8594_s30 + $0x50] sm:$0x1]  ;;  %v5907_v40 = vld [vmem:[#allocation2 + $0x48] sm:$0xe] }
 0x339   : > { %v10559_v44 = vpop.f32.mrf.mxu3  ;;  %v10561_v7 = vpop.f32.mrf.mxu1  ;;  %v6432_v48 = vunpack.c.l.b16 %v6312_v4  ;;  %v6316_v42 = vrot.slane %v6314_v51, 4  ;;  %v5628_v62 = vor.u32 %v5627_v45, %v5624_v30  ;;  %v5967_v17 = vrot.slane %v5965_v35, 4 }
 0x33a   : > { %v10564_v19 = vpop.f32.mrf.mxu0  ;;  %v5646_v4 = vshrl.u32 %v5537_v1, 16  ;;  %v5649_v26 = vshll.u32 %v5537_v1, 16  ;;  %v6333_v30 = vshll.u32 %v7884_v27, 16  ;;  %v4686_v27 = vadd.f32 %v10545_v33, %v10275_v9 }
 0x33b   : > { %11038 = vst [vmem:[#allocation25_spill] sm:$0xff] %v10564_v19  ;;  %v7883_v19 = vld [vmem:[%s8594_s30 + $0x4c] sm:$0xf] }
 0x33c   : > { %v6323_v8 = vshll.u32 %v7883_v19, 16  ;;  %v6327_v13 = vshrl.u32 %v7883_v19, 16  ;;  %v6319_v19 = vrot.slane %v6317_v50, 5  ;;  %v6444_v50 = vpack.c.b16 %v6432_v48, %v6431_v47 }
 0x33d   : > { %v5651_v16 = vrot.slane %v5649_v26, 5 }
 0x33e   : > { %6523 = vmatmul.bf16.gmra.mxu3 %v6443_v0  ;;  %v5762_v0 = vunpack.c.l.b16 %v5610_v21  ;;  %v10590_v34 = vrot.slane %v6323_v8, 5  ;;  %v6320_v8 = vor.u32 %v6319_v19, %v6316_v42 }
 0x33f   : > { %v5031_v22 = vpop.f32.mrf.mxu2 }
 0x340   : > { %v5776_v46 = vpack.c.b16 %v5763_v20, %v5762_v0  ;;  %v5639_v20 = vrot.slane %v5638_v23, 4  ;;  %v5629_v23 = vrot.slane %v5628_v62, 4 }
 0x341   : > { %v5279_v10 = vpop.f32.mrf.mxu3  ;;  %v4651_v2 = vpop.f32.mrf.mxu1 }
 0x342   : > { %v4688_v21 = vadd.f32 %v4651_v2, %v10340_v11  ;;  %v10585_v58 = vpop.f32.mrf.mxu0  ;;  %v6329_v11 = vrot.slane %v6327_v13, 4  ;;  %v5643_v2 = vrot.slane %v5641_v6, 5  ;;  %v5634_v48 = vsel %vm8629_vm4, %v5629_v23, %v10575_v37 }
 0x343   : > { %v5665_v37 = vshll.u32 %v10588_v25, 16 }
 0x344   : > { %v5066_v52 = vadd.f32 %v5029_v29, %v4688_v21  ;;  %5856 = vmatmul.bf16.gmra.mxu1 %v5776_v46  ;;  %6111 = vmatmul.bf16.gmra.mxu2 %v6027_v18  ;;  %v5968_v29 = vrot.slane %v10588_v25, 5  ;;  %v5655_v21 = vshll.u32 %v5538_v28, 16  ;;  %v5659_v46 = vshrl.u32 %v5538_v28, 16 }
 0x345   : > { %v6330_v13 = vor.u32 %v6329_v11, %v10590_v34  ;;  %v5648_v28 = vrot.slane %v5646_v4, 4 }
 0x346   : > { %v10593_v0 = vadd.f32 %v5279_v10, %v5066_v52  ;;  %v5644_v52 = vsel %vm8629_vm4, %v5639_v20, %v5643_v2  ;;  %v7834_v10 = vrot.slane %v5907_v40, 9  ;;  %v5969_v6 = vsel %vm8636_vm5, %v5967_v17, %v5968_v29  ;;  %v10616_v2 = vld [vmem:[#allocation2 + $0x58] sm:$0xf] }
 0x347   : > { %v5034_v18 = vpop.f32.mrf.mxu2  ;;  %v10609_v42 = vrot.slane %v5655_v21, 5  ;;  %v5661_v19 = vrot.slane %v5659_v46, 4  ;;  %v6331_v62 = vrot.slane %v6330_v13, 4  ;;  %v6335_v20 = vrot.slane %v6333_v30, 5  ;;  %v5908_v46 = vld [vmem:[#allocation2 + $0x54] sm:$0xe] }
 0x348   : > { %v5966_v47 = vsel %vm8636_vm5, %v7834_v10, %v5965_v35  ;;  %v5765_v40 = vunpack.c.l.b16 %v5644_v52  ;;  %v6017_v17 = vunpack.c.l.b16 %v5969_v6  ;;  %v5652_v26 = vor.u32 %v5651_v16, %v5648_v28 }
 0x349   : > { %v5281_v51 = vpop.f32.mrf.mxu3  ;;  %v4653_v45 = vpop.f32.mrf.mxu1  ;;  %v5764_v29 = vunpack.c.l.b16 %v5634_v48  ;;  %v6016_v21 = vunpack.c.l.b16 %v5966_v47  ;;  %v6336_v33 = vsel %vm8629_vm4, %v6331_v62, %v6335_v20  ;;  %v5064_v16 = vadd.f32 %v10518_v12, %v4686_v27  ;;  %v7885_v48 = vld [vmem:[%s8594_s30 + $0x54] sm:$0xf]  ;;  %v7886_v12 = vld [vmem:[%s8594_s30 + $0x58] sm:$0xf]  ;;  %v10635_v20 = vld [vmem:[#allocation2 + $0x5c] sm:$0x1] }
 0x34a   : > { %v4689_v1 = vadd.f32 %v4653_v45, %v10371_v15  ;;  %v10600_v32 = vpop.f32.mrf.mxu0  ;;  %v6321_v15 = vrot.slane %v6320_v8, 4  ;;  %v5972_v13 = vrot.slane %v10616_v2, 5  ;;  %v5653_v23 = vrot.slane %v5652_v26, 4 }
 0x34b   : > { %v6028_v8 = vpack.c.b16 %v6017_v17, %v6016_v21  ;;  %v5667_v52 = vrot.slane %v5665_v37, 5  ;;  %v7835_v10 = vrot.slane %v5908_v46, 9  ;;  %v6434_v6 = vunpack.c.l.b16 %v6336_v33  ;;  %v5540_v37 = vld [vmem:[#allocation2 + $0x54] sm:$0xf] }
 0x34c   : > { %v5067_v11 = vadd.f32 %v5031_v22, %v4689_v1  ;;  %v5662_v22 = vor.u32 %v5661_v19, %v10609_v42  ;;  %v6326_v9 = vsel %vm8629_vm4, %v6321_v15, %v10590_v34  ;;  %v4687_v34 = vadd.f32 %v10561_v7, %v10302_v53  ;;  %v7887_v7 = vld [vmem:[%s8594_s30 + $0x5c] sm:$0x1] }
 0x34d   : > { %v6433_v1 = vunpack.c.l.b16 %v6326_v9  ;;  %v6338_v19 = vshrl.u32 %v7885_v48, 16  ;;  %v6347_v15 = vshll.u32 %v7886_v12, 16  ;;  %v5658_v62 = vsel %vm8629_vm4, %v5653_v23, %v10609_v42 }
 0x34e   : > { %6528 = vmatmul.bf16.gmra.mxu3 %v6444_v50  ;;  %v10613_v4 = vadd.f32 %v5281_v51, %v5067_v11  ;;  %v5777_v51 = vpack.c.b16 %v5765_v40, %v5764_v29  ;;  %v5663_v28 = vrot.slane %v5662_v22, 4  ;;  %v6341_v11 = vshll.u32 %v7885_v48, 16 }
 0x34f   : > { %v5036_v50 = vpop.f32.mrf.mxu2  ;;  %v5974_v53 = vrot.slane %v5972_v13, 4  ;;  %v6351_v27 = vshrl.u32 %v7886_v12, 16  ;;  %v6340_v17 = vrot.slane %v6338_v19, 4  ;;  %v10640_v26 = vrot.slane %v6347_v15, 5 }
 0x350   : > { %v5065_v29 = vadd.f32 %v10543_v60, %v4687_v34  ;;  %v5973_v42 = vsel %vm8636_vm5, %v7835_v10, %v5972_v13  ;;  %v6445_v9 = vpack.c.b16 %v6434_v6, %v6433_v1  ;;  %v5679_v10 = vshll.u32 %v10616_v2, 16 }
 0x351   : > { %v5284_v35 = vpop.f32.mrf.mxu3  ;;  %v4656_v25 = vpop.f32.mrf.mxu1  ;;  %v6353_v22 = vrot.slane %v6351_v27, 4  ;;  %v5683_v34 = vshrl.u32 %v10616_v2, 16 }
 0x352   : > { %v4690_v30 = vadd.f32 %v4656_v25, %v10387_v36  ;;  %v6097_v45 = vpop.f32.mrf.mxu0  ;;  %v5314_v36 = vadd.f32 %v10539_v39, %v5064_v16  ;;  %v5668_v39 = vsel %vm8629_vm4, %v5663_v28, %v5667_v52  ;;  %v6357_v16 = vshll.u32 %v7887_v7, 16  ;;  %v7889_v7 = vld [vmem:[%s8594_s30 + $0x64] sm:$0xf] }
 0x353   : > { %v6354_v60 = vor.u32 %v6353_v22, %v10640_v26  ;;  %v5315_v1 = vadd.f32 %v10559_v44, %v5065_v29  ;;  %v5767_v12 = vunpack.c.l.b16 %v5668_v39  ;;  %v10680_v29 = vld [vmem:[#allocation2 + $0x64] sm:$0xf]  ;;  %v6371_v22 = vshll.u32 %v7889_v7, 16 }
 0x354   : > { %v5068_v47 = vadd.f32 %v5034_v18, %v4690_v30  ;;  %5861 = vmatmul.bf16.gmra.mxu1 %v5777_v51  ;;  %6116 = vmatmul.bf16.gmra.mxu2 %v6028_v8  ;;  %v6343_v18 = vrot.slane %v6341_v11, 5  ;;  %v5509_v25 = vadd.f32 %v10331_v49, %v5314_v36  ;;  %v5670_v8 = vshrl.u32 %v5540_v37, 16  ;;  %v10662_v11 = vld [vmem:[%s10942_s5] ss:$0 sm:$0xff] }
 0x355   : > { %v5673_v30 = vshll.u32 %v5540_v37, 16  ;;  %v5766_v49 = vunpack.c.l.b16 %v5658_v62  ;;  %v10666_v62 = vrot.slane %v5679_v10, 5  ;;  %v5510_v27 = vadd.f32 %v10359_v57, %v5315_v1 }
 0x356   : > { %v10638_v40 = vadd.f32 %v5284_v35, %v5068_v47  ;;  %v5975_v35 = vrot.slane %v10635_v20, 5  ;;  %v6344_v33 = vor.u32 %v6343_v18, %v6340_v17  ;;  %v5887_v6 = vadd.f32 %v10585_v58, %v5509_v25 }
 0x357   : > { %v10647_v46 = vpop.f32.mrf.mxu2  ;;  %v6359_v47 = vrot.slane %v6357_v16, 5  ;;  %v5672_v15 = vrot.slane %v5670_v8, 4  ;;  %v5675_v44 = vrot.slane %v5673_v30, 5  ;;  %v6018_v58 = vunpack.c.l.b16 %v5973_v42  ;;  %v10695_v16 = vld [vmem:[%s10946_s9] ss:$0 sm:$0xff] }
 0x358   : > { %v5976_v13 = vsel %vm8636_vm5, %v5974_v53, %v5975_v35  ;;  %v6345_v28 = vrot.slane %v6344_v33, 4  ;;  %v6137_v19 = vadd.f32 %v6097_v45, %v5887_v6  ;;  %v5685_v53 = vrot.slane %v5683_v34, 4  ;;  %v10674_v45 = vld [vmem:[%s10945_s8] ss:$0 sm:$0xff] }
 0x359   : > { %v5286_v21 = vpop.f32.mrf.mxu3  ;;  %v4658_v51 = vpop.f32.mrf.mxu1  ;;  %v6019_v2 = vunpack.c.l.b16 %v5976_v13  ;;  %v5689_v37 = vshll.u32 %v10635_v20, 16  ;;  %v5778_v33 = vpack.c.b16 %v5767_v12, %v5766_v49  ;;  %v5979_v13 = vrot.slane %v10680_v29, 5 }
 0x35a   : > { %v4691_v23 = vadd.f32 %v4658_v51, %v10407_v63  ;;  %v6099_v52 = vpop.f32.mrf.mxu0  ;;  %v6355_v63 = vrot.slane %v6354_v60, 4  ;;  %v6350_v18 = vsel %vm8629_vm4, %v6345_v28, %v10640_v26  ;;  %v6157_v35 = vmul.f32 %v10662_v11, %v6137_v19  ;;  %v10690_v26 = vld [vmem:[%s10943_s6] ss:$0 sm:$0xff] }
 0x35b   : > { %v6029_v25 = vpack.c.b16 %v6019_v2, %v6018_v58  ;;  %v5676_v51 = vor.u32 %v5675_v44, %v5672_v15  ;;  %v5888_v60 = vadd.f32 %v10600_v32, %v5510_v27  ;;  %v6435_v34 = vunpack.c.l.b16 %v6350_v18  ;;  %v10713_v15 = vld [vmem:[#allocation2 + $0x68] sm:$0x1]  ;;  %v5543_v27 = vld [vmem:[#allocation2 + $0x60] sm:$0xf] }
 0x35c   : > { %v5069_v48 = vadd.f32 %v5036_v50, %v4691_v23  ;;  %v7888_v50 = vld [vmem:[%s8594_s30 + $0x60] sm:$0xf]  ;;  %v6360_v57 = vsel %vm8629_vm4, %v6355_v63, %v6359_v47  ;;  %v5686_v23 = vor.u32 %v5685_v53, %v10666_v62  ;;  %v10704_v28 = vrot.slane %v6371_v22, 5  ;;  %v7890_v47 = vld [vmem:[%s8594_s30 + $0x68] sm:$0x1] }
 0x35d   : > { %v6365_v42 = vshll.u32 %v7888_v50, 16  ;;  %v6436_v1 = vunpack.c.l.b16 %v6360_v57  ;;  %v6138_v12 = vadd.f32 %v6099_v52, %v5888_v60  ;;  %v5677_v53 = vrot.slane %v5676_v51, 4 }
 0x35e   : > { %6533 = vmatmul.bf16.gmra.mxu3 %v6445_v9  ;;  %v10664_v36 = vadd.f32 %v5286_v21, %v5069_v48  ;;  %v6362_v21 = vshrl.u32 %v7888_v50, 16  ;;  %v6375_v9 = vshrl.u32 %v7889_v7, 16  ;;  %v6177_v48 = vadd.f32 %v10690_v26, %v6157_v35 }
 0x35f   : > { %v10682_v39 = vpop.f32.mrf.mxu2  ;;  %v6367_v32 = vrot.slane %v6365_v42, 5  ;;  %v5687_v2 = vrot.slane %v5686_v23, 4  ;;  %v5691_v50 = vrot.slane %v5689_v37, 5  ;;  %v5981_v7 = vrot.slane %v5979_v13, 4 }
 0x360   : > { %v6364_v6 = vrot.slane %v6362_v21, 4  ;;  %v6446_v21 = vpack.c.b16 %v6436_v1, %v6435_v34  ;;  %v6381_v42 = vshll.u32 %v7890_v47, 16  ;;  %v6158_v22 = vmul.f32 %v10662_v11, %v6138_v12 }
 0x361   : > { %v5289_v17 = vpop.f32.mrf.mxu3  ;;  %v4661_v20 = vpop.f32.mrf.mxu1  ;;  %v5682_v37 = vsel %vm8629_vm4, %v5677_v53, %v10666_v62  ;;  %v5692_v51 = vsel %vm8629_vm4, %v5687_v2, %v5691_v50  ;;  %v5694_v60 = vshrl.u32 %v5543_v27, 16  ;;  %v5707_v23 = vshrl.u32 %v10680_v29, 16  ;;  %v7892_v2 = vld [vmem:[%s8594_s30 + $0x70] sm:$0xf] }
 0x362   : > { %v4692_v8 = vadd.f32 %v4661_v20, %v10419_v31  ;;  %v6514_v30 = vpop.f32.mrf.mxu0  ;;  %v6377_v31 = vrot.slane %v6375_v9, 4  ;;  %v6368_v52 = vor.u32 %v6367_v32, %v6364_v6  ;;  %v5982_v20 = vrot.slane %v10713_v15, 5 }
 0x363   : > { %v6558_v10 = vmul.f32 %v10674_v45, %v6514_v30  ;;  %v6383_v1 = vrot.slane %v6381_v42, 5  ;;  %v6178_v6 = vadd.f32 %v10690_v26, %v6158_v22  ;;  %v5768_v32 = vunpack.c.l.b16 %v5682_v37 }
 0x364   : > { %v5070_v49 = vadd.f32 %v10647_v46, %v4692_v8  ;;  %5866 = vmatmul.bf16.gmra.mxu1 %v5778_v33  ;;  %6121 = vmatmul.bf16.gmra.mxu2 %v6029_v25  ;;  %v5909_v46 = vld [vmem:[#allocation2 + $0x60] sm:$0xe]  ;;  %v6378_v57 = vor.u32 %v6377_v31, %v10704_v28  ;;  %v5983_v30 = vsel %vm8636_vm5, %v5981_v7, %v5982_v20  ;;  %v5769_v12 = vunpack.c.l.b16 %v5692_v51 }
 0x365   : > { %v6578_v63 = vadd.f32 %v10695_v16, %v6558_v10  ;;  %v7836_v35 = vrot.slane %v5909_v46, 9  ;;  %v6369_v10 = vrot.slane %v6368_v52, 4  ;;  %v5697_v47 = vshll.u32 %v5543_v27, 16  ;;  %v5547_v52 = vld [vmem:[#allocation2 + $0x70] sm:$0xf] }
 0x366   : > { %v10711_v19 = vadd.f32 %v5289_v17, %v5070_v49  ;;  %v6379_v34 = vrot.slane %v6378_v57, 4  ;;  %v5709_v50 = vrot.slane %v5707_v23, 4  ;;  %v5779_v20 = vpack.c.b16 %v5769_v12, %v5768_v32 }
 0x367   : > { %v6594_v44 = vadd.f32 %v6578_v63, %v6177_v48  ;;  %v5044_v18 = vpop.f32.mrf.mxu2  ;;  %v5980_v31 = vsel %vm8636_vm5, %v7836_v35, %v5979_v13  ;;  %v6021_v63 = vunpack.c.l.b16 %v5983_v30  ;;  %v6374_v13 = vsel %vm8629_vm4, %v6369_v10, %v10704_v28 }
 0x368   : > { %v5986_v28 = vrot.slane %v5547_v52, 5  ;;  %v5713_v30 = vshll.u32 %v10713_v15, 16 }
 0x369   : > { %v5291_v58 = vpop.f32.mrf.mxu3  ;;  %v6610_v17 = vmax.f32 %v6594_v44, 0.0  ;;  %v4663_v9 = vpop.f32.mrf.mxu1  ;;  %v5696_v44 = vrot.slane %v5694_v60, 4  ;;  %v6437_v60 = vunpack.c.l.b16 %v6374_v13 }
 0x36a   : > { %v4693_v33 = vadd.f32 %v4663_v9, %v10432_v61  ;;  %v6516_v25 = vpop.f32.mrf.mxu0  ;;  %v5703_v61 = vshll.u32 %v10680_v29, 16  ;;  %v7891_v29 = vld [vmem:[%s8594_s30 + $0x6c] sm:$0xf]  ;;  %v6399_v9 = vshrl.u32 %v7892_v2, 16  ;;  %v5988_v12 = vrot.slane %v5986_v28, 4 }
 0x36b   : > { %6626 = vst [vmem:[%s10724_s12] sm:$0xff] %v6610_v17  ;;  %v6559_v8 = vmul.f32 %v10674_v45, %v6516_v25  ;;  %v6386_v27 = vshrl.u32 %v7891_v29, 16  ;;  %v6389_v22 = vshll.u32 %v7891_v29, 16  ;;  %v6395_v17 = vshll.u32 %v7892_v2, 16 }
 0x36c   : > { %v5071_v62 = vadd.f32 %v10682_v39, %v4693_v33  ;;  %v10741_v53 = vrot.slane %v5703_v61, 5  ;;  %v5699_v25 = vrot.slane %v5697_v47, 5  ;;  %v6401_v10 = vrot.slane %v6399_v9, 4 }
 0x36d   : > { %v6579_v49 = vadd.f32 %v10695_v16, %v6559_v8  ;;  %v6388_v61 = vrot.slane %v6386_v27, 4  ;;  %v6391_v23 = vrot.slane %v6389_v22, 5  ;;  %v5715_v47 = vrot.slane %v5713_v30, 5 }
 0x36e   : > { %6538 = vmatmul.bf16.gmra.mxu3 %v6446_v21  ;;  %v10737_v48 = vadd.f32 %v5291_v58, %v5071_v62  ;;  %v6020_v21 = vunpack.c.l.b16 %v5980_v31  ;;  %v6384_v58 = vsel %vm8629_vm4, %v6379_v34, %v6383_v1  ;;  %v5710_v37 = vor.u32 %v5709_v50, %v10741_v53  ;;  %v5548_v1 = vld [vmem:[#allocation2 + $0x74] sm:$0x1]  ;;  %v5910_v31 = vld [vmem:[#allocation2 + $0x6c] sm:$0xe] }
 0x36f   : > { %v6595_v39 = vadd.f32 %v6579_v49, %v6178_v6  ;;  %v5046_v7 = vpop.f32.mrf.mxu2  ;;  %v6438_v8 = vunpack.c.l.b16 %v6384_v58  ;;  %v6397_v62 = vrot.slane %v6395_v17, 5  ;;  %v5700_v34 = vor.u32 %v5699_v25, %v5696_v44  ;;  %v7893_v6 = vld [vmem:[%s8594_s30 + $0x74] sm:$0x1]  ;;  %v5546_v17 = vld [vmem:[#allocation2 + $0x6c] sm:$0xf]  ;;  %s8140_s30 = sshll.u32 %s8382_s16, 4 }
 0x370   : > { %v6030_v33 = vpack.c.b16 %v6021_v63, %v6020_v21  ;;  %v5711_v32 = vrot.slane %v5710_v37, 4  ;;  %v5989_v2 = vrot.slane %v5548_v1, 5  ;;  %v6405_v50 = vshll.u32 %v7893_v6, 16  ;;  %s6655_s19 = sadd.s32 %s8140_s30, %s7929_s21  ;;  %s8320_s21 = scalar_lea.hbm %s10947_s10, 512 }
 0x371   : > { %v5294_v46 = vpop.f32.mrf.mxu3  ;;  %v6611_v57 = vmax.f32 %v6595_v39, 0.0  ;;  %v4666_v42 = vpop.f32.mrf.mxu1  ;;  %v6447_v63 = vpack.c.b16 %v6438_v8, %v6437_v60  ;;  %v6392_v39 = vor.u32 %v6391_v23, %v6388_v61  ;;  %v6402_v15 = vor.u32 %v6401_v10, %v6397_v62  ;;  %s7930_s16 = sshll.u32 %s6655_s19, 3 }
 0x372   : > { %v4694_v35 = vadd.f32 %v4666_v42, %v10440_v3  ;;  %v5701_v13 = vrot.slane %v5700_v34, 4  ;;  %v5716_v44 = vsel %vm8629_vm4, %v5711_v32, %v5715_v47  ;;  %v5990_v58 = vsel %vm8636_vm5, %v5988_v12, %v5989_v2  ;;  %s6657_s25 = scalar_lea.hbm %s10947_s10, %s7930_s16 }
 0x373   : > { %6627 = vst [vmem:[%s10724_s12 + $0x8] sm:$0xff] %v6611_v57  ;;  %v5727_v27 = vshll.u32 %v5547_v52, 16  ;;  %v5731_v57 = vshrl.u32 %v5547_v52, 16  ;;  %v6393_v9 = vrot.slane %v6392_v39, 4  ;;  %v5771_v25 = vunpack.c.l.b16 %v5716_v44  ;;  %s6660_s26 = sshll.u32 %s6657_s25, 4  ;;  %s6661_s26 = int_to_ptr.hbm [resolvable:$true] %s6660_s26 }
 0x374   : > { %v5072_v51 = vadd.f32 %v5044_v18, %v4694_v35  ;;  %5871 = vmatmul.bf16.gmra.mxu1 %v5779_v20  ;;  %6126 = vmatmul.bf16.gmra.mxu2 %v6030_v33  ;;  %v5706_v22 = vsel %vm8629_vm4, %v5701_v13, %v10741_v53  ;;  %v6403_v35 = vrot.slane %v6402_v15, 4  ;;  %v6407_v20 = vrot.slane %v6405_v50, 5  ;;  %s8314_s4 = sshra.s32 %s6661_s26, 4  ;;  %s8315_s4 = int_to_ptr.hbm [resolvable:$true] %s8314_s4 }
 0x375   : > { %v6023_v37 = vunpack.c.l.b16 %v5990_v58  ;;  %v5718_v60 = vshrl.u32 %v5546_v17, 16  ;;  %v5721_v52 = vshll.u32 %v5546_v17, 16  ;;  %v5733_v8 = vrot.slane %v5731_v57, 4  ;;  %s8316_s18 = scalar_lea.hbm %s8315_s4, 128  ;;  %p8321_p6 = scmp.lt.s32.totalorder %s8315_s4, %s10947_s10 }
 0x376   : > { %v10752_v3 = vadd.f32 %v5294_v46, %v5072_v51  ;;  %v7837_v46 = vrot.slane %v5910_v31, 9  ;;  %v5770_v61 = vunpack.c.l.b16 %v5706_v22  ;;  %v6398_v43 = vsel %vm8629_vm4, %v6393_v9, %v6397_v62  ;;  %p8317_p2 = scmp.ne.s32.totalorder %s8315_s4, %s8316_s18  ;;  %p8322_p7 = scmp.lt.s32.totalorder %s8320_s21, %s8316_s18 }
 0x377   : > { %v5049_v18 = vpop.f32.mrf.mxu2  ;;  %v5723_v32 = vrot.slane %v5721_v52, 5 }
 0x378   : > { %v5780_v34 = vpack.c.b16 %v5771_v25, %v5770_v61  ;;  %p8318_p4 = pnand %p8317_p2, %p8512_p3  ;;  %p8323_p9 = por %p8322_p7, %p8321_p6 }
 0x379   : > { %v5296_v49 = vpop.f32.mrf.mxu3  ;;  %v4668_v29 = vpop.f32.mrf.mxu1 }
 0x37a   : > { %v4695_v21 = vadd.f32 %v4668_v29, %v10453_v14  ;;  %v5987_v14 = vsel %vm8636_vm5, %v7837_v46, %v5986_v28  ;;  %v6408_v28 = vsel %vm8629_vm4, %v6403_v35, %v6407_v20  ;;  %v5737_v29 = vshll.u32 %v5548_v1, 16  ;;  %p8319_p5 = pneg %p8318_p4 }
 0x37b   : > { %v6022_v23 = vunpack.c.l.b16 %v5987_v14  ;;  %v6440_v47 = vunpack.c.l.b16 %v6408_v28 }
 0x37c   : > { %v5073_v42 = vadd.f32 %v5046_v7, %v4695_v21  ;;  %v5729_v7 = vrot.slane %v5727_v27, 5  ;;  %p8324_p10 = pnand %p8323_p9, %p8319_p5 }
 0x37d   : > { %v6031_v6 = vpack.c.b16 %v6023_v37, %v6022_v23 }
 0x37e   : > { %6543 = vmatmul.bf16.gmra.mxu3 %v6447_v63  ;;  %v10765_v33 = vadd.f32 %v5296_v49, %v5073_v42  ;;  %v5720_v49 = vrot.slane %v5718_v60, 4  ;;  %v5734_v31 = vor.u32 %v5733_v8, %v5729_v7  ;;  %v6439_v63 = vunpack.c.l.b16 %v6398_v43 }
 0x37f   : > { %v5051_v30 = vpop.f32.mrf.mxu2 }
 0x380   : > { %v5724_v62 = vor.u32 %v5723_v32, %v5720_v49  ;;  %v5735_v15 = vrot.slane %v5734_v31, 4  ;;  %v6448_v21 = vpack.c.b16 %v6440_v47, %v6439_v63  ;;  %v5511_v49 = vadd.f32 %v10381_v59, %v10593_v0 }
 0x381   : > { %v5299_v51 = vpop.f32.mrf.mxu3  ;;  %v4671_v53 = vpop.f32.mrf.mxu1 }
 0x382   : > { %v4696_v10 = vadd.f32 %v4671_v53, %v10461_v55  ;;  %v5739_v55 = vrot.slane %v5737_v29, 5  ;;  %v5725_v44 = vrot.slane %v5724_v62, 4  ;;  %v11039_v62 = vld [vmem:[#allocation15_spill] sm:$0xff] }
 0x384   : > { %v5074_v12 = vadd.f32 %v5049_v18, %v4696_v10  ;;  %5876 = vmatmul.bf16.gmra.mxu1 %v5780_v34  ;;  %6131 = vmatmul.bf16.gmra.mxu2 %v6031_v6  ;;  %v5740_v18 = vsel %vm8629_vm4, %v5735_v15, %v5739_v55  ;;  %v5730_v1 = vsel %vm8629_vm4, %v5725_v44, %v5729_v7 }
 0x385   : > { %v5773_v57 = vunpack.c.l.b16 %v5740_v18  ;;  %v5772_v17 = vunpack.c.l.b16 %v5730_v1  ;;  %v5512_v15 = vadd.f32 %v11039_v62, %v10613_v4 }
 0x386   : > { %v10772_v2 = vadd.f32 %v5299_v51, %v5074_v12 }
 0x387   : > { %v5054_v50 = vpop.f32.mrf.mxu2  ;;  %v5781_v35 = vpack.c.b16 %v5773_v57, %v5772_v17  ;;  %v11040_v57 = vld [vmem:[#allocation16_spill] sm:$0xff] }
 0x388   : > { %v5513_v4 = vadd.f32 %v11040_v57, %v10638_v40 }
 0x389   : > { %v5301_v39 = vpop.f32.mrf.mxu3  ;;  %v4673_v13 = vpop.f32.mrf.mxu1 }
 0x38a   : > { %v4697_v46 = vadd.f32 %v4673_v13, %v10470_v5 }
 0x38c   : > { %v5075_v58 = vadd.f32 %v5051_v30, %v4697_v46 }
 0x38e   : > { %6548 = vmatmul.bf16.gmra.mxu3 %v6448_v21  ;;  %v10779_v27 = vadd.f32 %v5301_v39, %v5075_v58 }
 0x38f   : > { %v5056_v22 = vpop.f32.mrf.mxu2 }
 0x391   : > { %v5304_v42 = vpop.f32.mrf.mxu3  ;;  %v4676_v14 = vpop.f32.mrf.mxu1 }
 0x392   : > { %v4698_v9 = vadd.f32 %v4676_v14, %v10480_v56 }
 0x394   : > { %v5076_v5 = vadd.f32 %v5054_v50, %v4698_v9  ;;  %5881 = vmatmul.bf16.gmra.mxu1 %v5781_v35 }
 0x396   : > { %v10782_v20 = vadd.f32 %v5304_v42, %v5076_v5 }
 0x397   : > { %v5059_v37 = vpop.f32.mrf.mxu2 }
 0x399   : > { %v5306_v25 = vpop.f32.mrf.mxu3  ;;  %v4678_v51 = vpop.f32.mrf.mxu1 }
 0x39a   : > { %v4699_v24 = vadd.f32 %v4678_v51, %v10492_v54 }
 0x39c   : > { %v5077_v60 = vadd.f32 %v5056_v22, %v4699_v24 }
 0x39e   : > { %v10785_v52 = vadd.f32 %v5306_v25, %v5077_v60  ;;  %v11041_v60 = vld [vmem:[#allocation19_spill] sm:$0xff] }
 0x39f   : > { %v5061_v8 = vpop.f32.mrf.mxu2  ;;  %v5514_v40 = vadd.f32 %v11041_v60, %v10664_v36  ;;  %v11045_v60 = vld [vmem:[#allocation27_spill] sm:$0xff] }
 0x3a1   : > { %v5309_v7 = vpop.f32.mrf.mxu3  ;;  %v4681_v30 = vpop.f32.mrf.mxu1 }
 0x3a2   : > { %v4700_v61 = vadd.f32 %v4681_v30, %v10510_v41 }
 0x3a4   : > { %v5078_v23 = vadd.f32 %v5059_v37, %v4700_v61 }
 0x3a6   : > { %v10788_v56 = vadd.f32 %v5309_v7, %v5078_v23 }
 0x3a7   : > { %v6102_v43 = vpop.f32.mrf.mxu2 }
 0x3a9   : > { %v5311_v53 = vpop.f32.mrf.mxu3  ;;  %v4683_v28 = vpop.f32.mrf.mxu1 }
 0x3aa   : > { %v4701_v10 = vadd.f32 %v4683_v28, %v10530_v38 }
 0x3ac   : > { %v5079_v34 = vadd.f32 %v5061_v8, %v4701_v10 }
 0x3ae   : > { %v10791_v6 = vadd.f32 %v5311_v53, %v5079_v34 }
 0x3af   : > { %v6104_v32 = vpop.f32.mrf.mxu2 }
 0x3b1   : > { %v6519_v54 = vpop.f32.mrf.mxu3  ;;  %v5852_v31 = vpop.f32.mrf.mxu1 }
 0x3b2   : > { %v5889_v12 = vadd.f32 %v5852_v31, %v5511_v49  ;;  %v6560_v41 = vmul.f32 %v10674_v45, %v6519_v54  ;;  %v11042_v49 = vld [vmem:[#allocation17_spill] sm:$0xff] }
 0x3b3   : > { %v5515_v36 = vadd.f32 %v11042_v49, %v10711_v19 }
 0x3b4   : > { %v6139_v63 = vadd.f32 %v6102_v43, %v5889_v12  ;;  %v6580_v29 = vadd.f32 %v10695_v16, %v6560_v41 }
 0x3b6   : > { %v6159_v47 = vmul.f32 %v10662_v11, %v6139_v63 }
 0x3b7   : > { %v6107_v50 = vpop.f32.mrf.mxu2 }
 0x3b8   : > { %v6179_v38 = vadd.f32 %v10690_v26, %v6159_v47 }
 0x3b9   : > { %v6521_v39 = vpop.f32.mrf.mxu3  ;;  %v5854_v21 = vpop.f32.mrf.mxu1 }
 0x3ba   : > { %v6596_v59 = vadd.f32 %v6580_v29, %v6179_v38  ;;  %v5890_v0 = vadd.f32 %v5854_v21, %v5512_v15  ;;  %v6561_v46 = vmul.f32 %v10674_v45, %v6521_v39 }
 0x3bc   : > { %v6612_v13 = vmax.f32 %v6596_v59, 0.0  ;;  %v6140_v55 = vadd.f32 %v6104_v32, %v5890_v0  ;;  %v6581_v1 = vadd.f32 %v10695_v16, %v6561_v46 }
 0x3be   : > { %6628 = vst [vmem:[%s10724_s12 + $0x10] sm:$0xff] %v6612_v13  ;;  %v6160_v44 = vmul.f32 %v10662_v11, %v6140_v55 }
 0x3bf   : > { %v6109_v42 = vpop.f32.mrf.mxu2 }
 0x3c0   : > { %v6180_v58 = vadd.f32 %v10690_v26, %v6160_v44 }
 0x3c1   : > { %v6524_v18 = vpop.f32.mrf.mxu3  ;;  %v5857_v22 = vpop.f32.mrf.mxu1 }
 0x3c2   : > { %v6597_v17 = vadd.f32 %v6581_v1, %v6180_v58  ;;  %v5891_v14 = vadd.f32 %v5857_v22, %v5513_v4  ;;  %v6562_v9 = vmul.f32 %v10674_v45, %v6524_v18  ;;  %v11044_v4 = vld [vmem:[#allocation14_spill] sm:$0xff] }
 0x3c4   : > { %v6613_v35 = vmax.f32 %v6597_v17, 0.0  ;;  %v6141_v5 = vadd.f32 %v6107_v50, %v5891_v14  ;;  %v6582_v37 = vadd.f32 %v10695_v16, %v6562_v9  ;;  %v11043_v50 = vld [vmem:[#allocation18_spill] sm:$0xff] }
 0x3c5   : > { %v5516_v19 = vadd.f32 %v11043_v50, %v10737_v48  ;;  %v5517_v48 = vadd.f32 %v11044_v4, %v10752_v3  ;;  %v5518_v3 = vadd.f32 %v11045_v60, %v10765_v33 }
 0x3c6   : > { %6629 = vst [vmem:[%s10724_s12 + $0x18] sm:$0xff] %v6613_v35  ;;  %v6161_v25 = vmul.f32 %v10662_v11, %v6141_v5 }
 0x3c7   : > { %v6112_v7 = vpop.f32.mrf.mxu2 }
 0x3c8   : > { %v6181_v24 = vadd.f32 %v10690_v26, %v6161_v25 }
 0x3c9   : > { %v6526_v51 = vpop.f32.mrf.mxu3  ;;  %v5859_v8 = vpop.f32.mrf.mxu1 }
 0x3ca   : > { %v6598_v30 = vadd.f32 %v6582_v37, %v6181_v24  ;;  %v5892_v61 = vadd.f32 %v5859_v8, %v5514_v40  ;;  %v6563_v43 = vmul.f32 %v10674_v45, %v6526_v51 }
 0x3cc   : > { %v6614_v23 = vmax.f32 %v6598_v30, 0.0  ;;  %v6142_v53 = vadd.f32 %v6109_v42, %v5892_v61  ;;  %v6583_v54 = vadd.f32 %v10695_v16, %v6563_v43 }
 0x3ce   : > { %6630 = vst [vmem:[%s10724_s12 + $0x20] sm:$0xff] %v6614_v23  ;;  %v6162_v28 = vmul.f32 %v10662_v11, %v6142_v53 }
 0x3cf   : > { %v6114_v32 = vpop.f32.mrf.mxu2 }
 0x3d0   : > { %v6182_v34 = vadd.f32 %v10690_v26, %v6162_v28 }
 0x3d1   : > { %v6529_v10 = vpop.f32.mrf.mxu3  ;;  %v5862_v31 = vpop.f32.mrf.mxu1 }
 0x3d2   : > { %v6599_v12 = vadd.f32 %v6583_v54, %v6182_v34  ;;  %v5893_v41 = vadd.f32 %v5862_v31, %v5515_v36  ;;  %v6564_v63 = vmul.f32 %v10674_v45, %v6529_v10  ;;  %v11046_v54 = vld [vmem:[#allocation20_spill] sm:$0xff] }
 0x3d3   : > { %v5519_v33 = vadd.f32 %v11046_v54, %v10772_v2 }
 0x3d4   : > { %v6615_v47 = vmax.f32 %v6599_v12, 0.0  ;;  %v6143_v29 = vadd.f32 %v6112_v7, %v5893_v41  ;;  %v6584_v38 = vadd.f32 %v10695_v16, %v6564_v63 }
 0x3d6   : > { %6631 = vst [vmem:[%s10724_s12 + $0x28] sm:$0xff] %v6615_v47  ;;  %v6163_v39 = vmul.f32 %v10662_v11, %v6143_v29 }
 0x3d7   : > { %v6117_v21 = vpop.f32.mrf.mxu2 }
 0x3d8   : > { %v6183_v15 = vadd.f32 %v10690_v26, %v6163_v39 }
 0x3d9   : > { %v6531_v62 = vpop.f32.mrf.mxu3  ;;  %v5864_v59 = vpop.f32.mrf.mxu1 }
 0x3da   : > { %v6600_v0 = vadd.f32 %v6584_v38, %v6183_v15  ;;  %v5894_v13 = vadd.f32 %v5864_v59, %v5516_v19  ;;  %v6565_v44 = vmul.f32 %v10674_v45, %v6531_v62  ;;  %v11047_v62 = vld [vmem:[#allocation21_spill] sm:$0xff] }
 0x3db   : > { %v5520_v2 = vadd.f32 %v11047_v62, %v10779_v27 }
 0x3dc   : > { %v6616_v55 = vmax.f32 %v6600_v0, 0.0  ;;  %v6144_v46 = vadd.f32 %v6114_v32, %v5894_v13  ;;  %v6585_v57 = vadd.f32 %v10695_v16, %v6565_v44 }
 0x3de   : > { %6632 = vst [vmem:[%s10724_s12 + $0x30] sm:$0xff] %v6616_v55  ;;  %v6164_v18 = vmul.f32 %v10662_v11, %v6144_v46 }
 0x3df   : > { %v6119_v42 = vpop.f32.mrf.mxu2 }
 0x3e0   : > { %v6184_v1 = vadd.f32 %v10690_v26, %v6164_v18 }
 0x3e1   : > { %v6534_v58 = vpop.f32.mrf.mxu3  ;;  %v5867_v22 = vpop.f32.mrf.mxu1 }
 0x3e2   : > { %v6601_v17 = vadd.f32 %v6585_v57, %v6184_v1  ;;  %v5895_v14 = vadd.f32 %v5867_v22, %v5517_v48  ;;  %v6566_v9 = vmul.f32 %v10674_v45, %v6534_v58  ;;  %v11048_v58 = vld [vmem:[#allocation22_spill] sm:$0xff] }
 0x3e3   : > { %v5521_v27 = vadd.f32 %v11048_v58, %v10782_v20 }
 0x3e4   : > { %v6617_v35 = vmax.f32 %v6601_v17, 0.0  ;;  %v6145_v5 = vadd.f32 %v6117_v21, %v5895_v14  ;;  %v6586_v37 = vadd.f32 %v10695_v16, %v6566_v9 }
 0x3e6   : > { %6633 = vst [vmem:[%s10724_s12 + $0x38] sm:$0xff] %v6617_v35  ;;  %v6165_v25 = vmul.f32 %v10662_v11, %v6145_v5 }
 0x3e7   : > { %v6122_v7 = vpop.f32.mrf.mxu2 }
 0x3e8   : > { %v6185_v24 = vadd.f32 %v10690_v26, %v6165_v25  ;;  %v11049_v25 = vld [vmem:[#allocation23_spill] sm:$0xff] }
 0x3e9   : > { %v6536_v51 = vpop.f32.mrf.mxu3  ;;  %v5869_v40 = vpop.f32.mrf.mxu1  ;;  %v5522_v20 = vadd.f32 %v11049_v25, %v10785_v52  ;;  %v11050_v52 = vld [vmem:[#allocation24_spill] sm:$0xff] }
 0x3ea   : > { %v6602_v8 = vadd.f32 %v6586_v37, %v6185_v24  ;;  %v5896_v30 = vadd.f32 %v5869_v40, %v5518_v3  ;;  %v6567_v53 = vmul.f32 %v10674_v45, %v6536_v51 }
 0x3ec   : > { %v6618_v61 = vmax.f32 %v6602_v8, 0.0  ;;  %v6146_v23 = vadd.f32 %v6119_v42, %v5896_v30  ;;  %v6587_v34 = vadd.f32 %v10695_v16, %v6567_v53 }
 0x3ee   : > { %6634 = vst [vmem:[%s10724_s12 + $0x40] sm:$0xff] %v6618_v61  ;;  %v6166_v43 = vmul.f32 %v10662_v11, %v6146_v23  ;;  %v5523_v23 = vadd.f32 %v11050_v52, %v10788_v56  ;;  %v11051_v56 = vld [vmem:[#allocation25_spill] sm:$0xff] }
 0x3ef   : > { %v6124_v12 = vpop.f32.mrf.mxu2 }
 0x3f0   : > { %v6186_v10 = vadd.f32 %v10690_v26, %v6166_v43 }
 0x3f1   : > { %v6539_v28 = vpop.f32.mrf.mxu3  ;;  %v5872_v49 = vpop.f32.mrf.mxu1 }
 0x3f2   : > { %v6603_v36 = vadd.f32 %v6587_v34, %v6186_v10  ;;  %v5897_v32 = vadd.f32 %v5872_v49, %v5519_v33  ;;  %v6568_v31 = vmul.f32 %v10674_v45, %v6539_v28 }
 0x3f4   : > { %v6619_v41 = vmax.f32 %v6603_v36, 0.0  ;;  %v6147_v63 = vadd.f32 %v6122_v7, %v5897_v32  ;;  %v6588_v29 = vadd.f32 %v10695_v16, %v6568_v31  ;;  %v5524_v31 = vadd.f32 %v11051_v56, %v10791_v6 }
 0x3f6   : > { %6635 = vst [vmem:[%s10724_s12 + $0x48] sm:$0xff] %v6619_v41  ;;  %v6167_v47 = vmul.f32 %v10662_v11, %v6147_v63 }
 0x3f7   : > { %v6127_v13 = vpop.f32.mrf.mxu2 }
 0x3f8   : > { %v6187_v38 = vadd.f32 %v10690_v26, %v6167_v47 }
 0x3f9   : > { %v6541_v39 = vpop.f32.mrf.mxu3  ;;  %v5874_v15 = vpop.f32.mrf.mxu1 }
 0x3fa   : > { %v6604_v50 = vadd.f32 %v6588_v29, %v6187_v38  ;;  %v5898_v19 = vadd.f32 %v5874_v15, %v5520_v2  ;;  %v6569_v0 = vmul.f32 %v10674_v45, %v6541_v39 }
 0x3fc   : > { %v6620_v21 = vmax.f32 %v6604_v50, 0.0  ;;  %v6148_v59 = vadd.f32 %v6124_v12, %v5898_v19  ;;  %v6589_v18 = vadd.f32 %v10695_v16, %v6569_v0 }
 0x3fe   : > { %6636 = vst [vmem:[%s10724_s12 + $0x50] sm:$0xff] %v6620_v21  ;;  %v6168_v55 = vmul.f32 %v10662_v11, %v6148_v59 }
 0x3ff   : > { %v6129_v9 = vpop.f32.mrf.mxu2 }
 0x400   : > { %v6188_v44 = vadd.f32 %v10690_v26, %v6168_v55 }
 0x401   : > { %v6544_v46 = vpop.f32.mrf.mxu3  ;;  %v5877_v1 = vpop.f32.mrf.mxu1 }
 0x402   : > { %v6605_v57 = vadd.f32 %v6589_v18, %v6188_v44  ;;  %v5899_v4 = vadd.f32 %v5877_v1, %v5521_v27  ;;  %v6570_v48 = vmul.f32 %v10674_v45, %v6544_v46 }
 0x404   : > { %v6621_v42 = vmax.f32 %v6605_v57, 0.0  ;;  %v6149_v22 = vadd.f32 %v6127_v13, %v5899_v4  ;;  %v6590_v14 = vadd.f32 %v10695_v16, %v6570_v48 }
 0x406   : > { %6637 = vst [vmem:[%s10724_s12 + $0x58] sm:$0xff] %v6621_v42  ;;  %v6169_v17 = vmul.f32 %v10662_v11, %v6149_v22 }
 0x407   : > { %v6132_v53 = vpop.f32.mrf.mxu2 }
 0x408   : > { %v6189_v5 = vadd.f32 %v10690_v26, %v6169_v17 }
 0x409   : > { %v6546_v35 = vpop.f32.mrf.mxu3  ;;  %v5879_v37 = vpop.f32.mrf.mxu1 }
 0x40a   : > { %v6606_v51 = vadd.f32 %v6590_v14, %v6189_v5  ;;  %v5900_v24 = vadd.f32 %v5879_v37, %v5522_v20  ;;  %v6571_v40 = vmul.f32 %v10674_v45, %v6546_v35 }
 0x40c   : > { %v6622_v60 = vmax.f32 %v6606_v51, 0.0  ;;  %v6150_v3 = vadd.f32 %v6129_v9, %v5900_v24  ;;  %v6591_v61 = vadd.f32 %v10695_v16, %v6571_v40 }
 0x40e   : > { %6638 = vst [vmem:[%s10724_s12 + $0x60] sm:$0xff] %v6622_v60  ;;  %v6170_v7 = vmul.f32 %v10662_v11, %v6150_v3 }
 0x40f   : > { %v6134_v29 = vpop.f32.mrf.mxu2 }
 0x410   : > { %v6190_v30 = vadd.f32 %v10690_v26, %v6170_v7 }
 0x411   : > { %v6549_v8 = vpop.f32.mrf.mxu3  ;;  %v5882_v43 = vpop.f32.mrf.mxu1 }
 0x412   : > { %v6607_v28 = vadd.f32 %v6591_v61, %v6190_v30  ;;  %v5901_v10 = vadd.f32 %v5882_v43, %v5523_v23  ;;  %v6572_v34 = vmul.f32 %v10674_v45, %v6549_v8 }
 0x414   : > { %v6623_v54 = vmax.f32 %v6607_v28, 0.0  ;;  %v6151_v33 = vadd.f32 %v6132_v53, %v5901_v10  ;;  %v6592_v36 = vadd.f32 %v10695_v16, %v6572_v34 }
 0x416   : > { %6639 = vst [vmem:[%s10724_s12 + $0x68] sm:$0xff] %v6623_v54  ;;  %v6171_v49 = vmul.f32 %v10662_v11, %v6151_v33 }
 0x418   : > { %v6191_v32 = vadd.f32 %v10690_v26, %v6171_v49 }
 0x419   : > { %v5884_v12 = vpop.f32.mrf.mxu1  ;;  %v6551_v41 = vpop.f32.mrf.mxu3 }
 0x41a   : > { %v6608_v63 = vadd.f32 %v6592_v36, %v6191_v32  ;;  %v5902_v47 = vadd.f32 %v5884_v12, %v5524_v31  ;;  %v6573_v62 = vmul.f32 %v10674_v45, %v6551_v41 }
 0x41c   : > { %v6624_v39 = vmax.f32 %v6608_v63, 0.0  ;;  %v6152_v38 = vadd.f32 %v6134_v29, %v5902_v47  ;;  %v6593_v15 = vadd.f32 %v10695_v16, %v6573_v62 }
 0x41e   : > { %6640 = vst [vmem:[%s10724_s12 + $0x70] sm:$0xff] %v6624_v39  ;;  %v6172_v2 = vmul.f32 %v10662_v11, %v6152_v38 }
 0x420   : > { %v6192_v6 = vadd.f32 %v10690_v26, %v6172_v2 }
 0x422   : > { %v6609_v50 = vadd.f32 %v6593_v15, %v6192_v6 }
 0x424   : > { %v6625_v19 = vmax.f32 %v6609_v50, 0.0 }
 0x426   : > { %6641 = vst [vmem:[%s10724_s12 + $0x78] sm:$0xff] %v6625_v19 }
 0x427   : > { %8327 = shalt.err (!%p8324_p10)
}
 0x428   : > { %s8403_s23 = smov 128   ;;  %s8404_s12 = smov 8  }
 0x429   : > { %8170 = dma.vmem_to_hbm [thread:$0]  (%p8512_p3), %s6659_s22, 2048, %s6661_s26, %s6643_s29, %s8403_s23, %s8403_s23, %s8404_s12  }
 0x42a PF: > { %p8182_p11 = scmp.ge.s32.totalorder %s8398_s20, 2  ;;  %s6675_s24 = sand.u32 1, %s8370_s13  }
 0x42b   : > { %s6676_s25 = scalar_lea.sflag [#allocation5], %s6675_s24 }
 0x42c   : > { %p8177_p12 = pnand %p8182_p11, %p8521_p8 }
 0x42e   : > { %p8178_p13 = pneg %p8177_p12 }
 0x430   : > { %8365 = dma.done.wait (%p8178_p13), %s6676_s25, 2048  }
 0x431   : > { %8367 = vsyncadd (%p8178_p13), %s6676_s25, 4294965248  ;;  %s24_s20 = sadd.s32 1, %s8398_s20   ;;  %s11053_s16 = sld [smem:[#allocation9_spill]] }
 0x432   : > { %p21_p0 = scmp.ge.s32.totalorder %s24_s20, 6   ;;  %s11054_s17 = sld [smem:[#allocation10_spill]] }
 0x433   : > { %s11055_s18 = sld [smem:[#allocation11_spill]]  ;;  %s11057_s13 = smov %s8374_s14 }
 0x434   : > { %s11056_s19 = sld [smem:[#allocation12_spill]]  ;;  %s11058_s14 = smov %s8378_s15 }
 0x435   : > { %s11059_s15 = smov %s8542_s28  ;;  %23 = sbr.rel (!%p21_p0) target bundleno = 8 (0x8), region = 121 }
 0x43a   :  { %6682 = vsyncpa [#allocation4], 1 }
 0x43b   :  { %6684 = vsyncpa [#allocation4 + $0x1], 1 }
 0x43c   :  { %6685 = vsyncpa [#allocation5], 1 }
 0x43d   :  { %6687 = vsyncpa [#allocation5 + $0x1], 1 }

</bundles_post_ra>
